<compile_context>
chip_gen: v6e
topology: v6e:2x2x1
jax: 0.10.0
libtpu: 0.0.40
codegen_flags: <defaults>
</compile_context>

<pallas_src>
import functools
import math

import jax
import jax.numpy as jnp
from jax.experimental import pallas as pl
from jax.experimental.pallas import tpu as pltpu

VMEM = pl.BlockSpec(memory_space=pltpu.MemorySpace.VMEM)
LN_EPS = 1e-5
_SQRT_2_OVER_PI = math.sqrt(2.0 / math.pi)


# ------------------------------------------------------ in-kernel helpers ---

def _layernorm(x, g, b):
  mu = jnp.mean(x, axis=-1, keepdims=True)
  var = jnp.mean(jnp.square(x - mu), axis=-1, keepdims=True)
  return (x - mu) * jax.lax.rsqrt(var + LN_EPS) * g + b


def _gelu_tanh(x):
  # TODO(synk): PyTorch F.gelu defaults to the exact erf form; Mosaic has no
  # guaranteed erf lowering, so the tanh approximation is used in-kernel
  # (deviation ~1e-3 on unit-scale activations).
  return 0.5 * x * (1.0 + jnp.tanh(_SQRT_2_OVER_PI * (x + 0.044715 * x * x * x)))


def _mha_core(q, k, v, *, batch, seq_q, seq_k, heads, q_shared):
  """softmax(q k^T) v per (batch, head); scale already folded into q.

  q: (seq_q, d) if q_shared (identical per batch) else (batch*seq_q, d);
  k, v: (batch*seq_k, d).  Returns (batch*seq_q, d), heads merged on lanes.
  """
  d = k.shape[-1]
  dh = d // heads
  batch_rows = []
  for bi in range(batch):                      # static unroll (tiny batch)
    kb = k[bi * seq_k:(bi + 1) * seq_k]
    vb = v[bi * seq_k:(bi + 1) * seq_k]
    qb = q if q_shared else q[bi * seq_q:(bi + 1) * seq_q]
    head_outs = []
    for h in range(heads):                     # static unroll over heads
      sl = slice(h * dh, (h + 1) * dh)
      s = jnp.dot(qb[:, sl], kb[:, sl].T, preferred_element_type=jnp.float32)
      s = s - jnp.max(s, axis=-1, keepdims=True)
      p = jnp.exp(s)
      p = p * pl.reciprocal(jnp.sum(p, axis=-1, keepdims=True), approx=True)
      head_outs.append(jnp.dot(p, vb[:, sl], preferred_element_type=jnp.float32))
    batch_rows.append(jnp.concatenate(head_outs, axis=-1))
  return jnp.concatenate(batch_rows, axis=0)


def _feedforward(x, g, b, w1, b1, w2, b2):
  """LayerNorm -> Linear(d, 8d) -> GEGLU -> Linear(4d, d)."""
  hidden = w2.shape[0]
  y = _layernorm(x, g, b)
  h = jnp.dot(y, w1, preferred_element_type=jnp.float32) + b1
  a = h[:, :hidden]          # lane-aligned split (hidden = 128)
  gates = h[:, hidden:]
  return jnp.dot(a * _gelu_tanh(gates), w2,
                 preferred_element_type=jnp.float32) + b2


# ----------------------------------------------------------------- kernel ---

def _prompt_translator_kernel(
    xkv_ref, sp_ref,
    cq_g, cq_b, ckv_g, ckv_b,
    c_wq, c_bq, c_wkv, c_bkv, c_wo, c_bo,
    c_ffg, c_ffb, c_w1, c_b1, c_w2, c_b2,
    s_ng, s_nb, s_wqkv, s_bqkv, s_wo, s_bo,
    s_ffg, s_ffb, s_w1, s_b1, s_w2, s_b2,
    o_ref,
    *, batch, n_prompt, seq_kv, cross_heads, self_heads, depth):
  f32 = jnp.float32
  d = sp_ref.shape[1]

  # ---- cross-attention block: PreNorm MHA (NO residual, per reference) ----
  # soft prompt is identical for every batch element -> compute q once.
  xq = _layernorm(sp_ref[...].astype(f32), cq_g[...], cq_b[...])        # (n, d)
  xkv = _layernorm(xkv_ref[...].astype(f32), ckv_g[...], ckv_b[...])    # (b*sk, kvd)
  q = jnp.dot(xq, c_wq[...], preferred_element_type=f32) + c_bq[...]    # scale folded
  kv = jnp.dot(xkv, c_wkv[...], preferred_element_type=f32) + c_bkv[...]
  k = kv[:, :d]
  v = kv[:, d:]
  a = _mha_core(q, k, v, batch=batch, seq_q=n_prompt, seq_k=seq_kv,
                heads=cross_heads, q_shared=True)
  x = jnp.dot(a, c_wo[...], preferred_element_type=f32) + c_bo[...]     # (b*n, d)

  # ---- cross FeedForward + residual ----
  x = x + _feedforward(x, c_ffg[...], c_ffb[...], c_w1[...], c_b1[...],
                       c_w2[...], c_b2[...])

  # ---- self-attention stack (pre-norm MHA + residual, FF + residual) ----
  # TODO(synk): static unroll is fine for small depth; for deep stacks switch
  # to lax.fori_loop with dynamic leading-axis indexing of the stacked refs.
  for li in range(depth):
    xn = _layernorm(x, s_ng[li], s_nb[li])
    qkv = jnp.dot(xn, s_wqkv[li], preferred_element_type=f32) + s_bqkv[li]
    qs = qkv[:, :d]
    ks = qkv[:, d:2 * d]
    vs = qkv[:, 2 * d:]
    a = _mha_core(qs, ks, vs, batch=batch, seq_q=n_prompt, seq_k=n_prompt,
                  heads=self_heads, q_shared=False)
    x = x + jnp.dot(a, s_wo[li], preferred_element_type=f32) + s_bo[li]
    x = x + _feedforward(x, s_ffg[li], s_ffb[li], s_w1[li], s_b1[li],
                         s_w2[li], s_b2[li])

  o_ref[...] = x.astype(o_ref.dtype)


# ---------------------------------------------------------------- wrapper ---

def prompt_translator_forward(text_emb, fp, *, prompt_len, prompt_depth,
                              depth, cross_heads, self_heads):
  b, sk, kvd = text_emb.shape
  n, d = fp["soft_prompt"].shape
  kernel = functools.partial(
      _prompt_translator_kernel, batch=b, n_prompt=n, seq_kv=sk,
      cross_heads=cross_heads, self_heads=self_heads, depth=depth)
  args = (
      text_emb.reshape(b * sk, kvd), fp["soft_prompt"],
      fp["c_nq_g"], fp["c_nq_b"], fp["c_nkv_g"], fp["c_nkv_b"],
      fp["c_wq"], fp["c_bq"], fp["c_wkv"], fp["c_bkv"], fp["c_wo"], fp["c_bo"],
      fp["c_ffg"], fp["c_ffb"], fp["c_w1"], fp["c_b1"], fp["c_w2"], fp["c_b2"],
      fp["s_ng"], fp["s_nb"], fp["s_wqkv"], fp["s_bqkv"], fp["s_wo"], fp["s_bo"],
      fp["s_ffg"], fp["s_ffb"], fp["s_w1"], fp["s_b1"], fp["s_w2"], fp["s_b2"],
  )
  out2d = pl.pallas_call(
      kernel,
      out_shape=jax.ShapeDtypeStruct((b * n, d), text_emb.dtype),
      in_specs=[VMEM] * len(args),
      out_specs=VMEM,
  )(*args)
  # (b*n, d) row-major == (b, n, d) row-major, so this is exactly the
  # PyTorch prompt.reshape(prompt_depth, prompt_len, -1).
  prompt = out2d.reshape(prompt_depth, prompt_len, -1)
  return prompt, prompt


# ----------------------------------------------------------------- params ---

def _nrm(key, shape, std=0.02):
  return std * jax.random.normal(key, shape, jnp.float32)


def _mha_params(key, e_dim, kv_dim):
  k = jax.random.split(key, 4)
  z = lambda m: jnp.zeros((m,), jnp.float32)
  return dict(wq=_nrm(k[0], (e_dim, e_dim)), bq=z(e_dim),
              wk=_nrm(k[1], (kv_dim, e_dim)), bk=z(e_dim),
              wv=_nrm(k[2], (kv_dim, e_dim)), bv=z(e_dim),
              wo=_nrm(k[3], (e_dim, e_dim)), bo=z(e_dim))


def _ff_params(key, dim, mult=4):
  k1, k2 = jax.random.split(key)
  return dict(ln_g=jnp.ones((dim,), jnp.float32),
              ln_b=jnp.zeros((dim,), jnp.float32),
              w1=_nrm(k1, (dim, dim * mult * 2)),
              b1=jnp.zeros((dim * mult * 2,), jnp.float32),
              w2=_nrm(k2, (dim * mult, dim)),
              b2=jnp.zeros((dim,), jnp.float32))


def init_params(key, *, prompt_len, prompt_depth, prompt_dim, textemb_dim, depth):
  ki = iter(jax.random.split(key, 4 + 2 * depth))
  return dict(
      soft_prompt=_nrm(next(ki), (prompt_len * prompt_depth, prompt_dim)),
      encoder=dict(
          norm_q_g=jnp.ones((prompt_dim,), jnp.float32),
          norm_q_b=jnp.zeros((prompt_dim,), jnp.float32),
          norm_kv_g=jnp.ones((textemb_dim,), jnp.float32),
          norm_kv_b=jnp.zeros((textemb_dim,), jnp.float32),
          mha=_mha_params(next(ki), prompt_dim, textemb_dim),
          ff=_ff_params(next(ki), prompt_dim),
      ),
      layers=[dict(
          norm_g=jnp.ones((prompt_dim,), jnp.float32),
          norm_b=jnp.zeros((prompt_dim,), jnp.float32),
          mha=_mha_params(next(ki), prompt_dim, prompt_dim),
          ff=_ff_params(next(ki), prompt_dim),
      ) for _ in range(depth)],
  )


def prepare_params(params, *, cross_heads, self_heads):
  """One-time prep: fold softmax scale into Wq/bq, concat K|V and Q|K|V
  projections, stack self-attention layers on a leading axis, and reshape
  1-D vectors to (1, dim) rows for lane broadcast inside the kernel."""
  sp = params["soft_prompt"]
  d = sp.shape[1]
  row = lambda v: v.reshape(1, -1)

  enc = params["encoder"]
  m = enc["mha"]
  ff = enc["ff"]
  scale_c = 1.0 / math.sqrt(d // cross_heads)
  fused = dict(
      soft_prompt=sp,
      c_nq_g=row(enc["norm_q_g"]), c_nq_b=row(enc["norm_q_b"]),
      c_nkv_g=row(enc["norm_kv_g"]), c_nkv_b=row(enc["norm_kv_b"]),
      c_wq=m["wq"] * scale_c, c_bq=row(m["bq"] * scale_c),
      c_wkv=jnp.concatenate([m["wk"], m["wv"]], axis=1),
      c_bkv=row(jnp.concatenate([m["bk"], m["bv"]])),
      c_wo=m["wo"], c_bo=row(m["bo"]),
      c_ffg=row(ff["ln_g"]), c_ffb=row(ff["ln_b"]),
      c_w1=ff["w1"], c_b1=row(ff["b1"]),
      c_w2=ff["w2"], c_b2=row(ff["b2"]),
  )

  layers = params["layers"]
  if layers:
    scale_s = 1.0 / math.sqrt(d // self_heads)

    def one(lp):
      m = lp["mha"]
      f = lp["ff"]
      return dict(
          s_ng=row(lp["norm_g"]), s_nb=row(lp["norm_b"]),
          s_wqkv=jnp.concatenate([m["wq"] * scale_s, m["wk"], m["wv"]], axis=1),
          s_bqkv=row(jnp.concatenate([m["bq"] * scale_s, m["bk"], m["bv"]])),
          s_wo=m["wo"], s_bo=row(m["bo"]),
          s_ffg=row(f["ln_g"]), s_ffb=row(f["ln_b"]),
          s_w1=f["w1"], s_b1=row(f["b1"]),
          s_w2=f["w2"], s_b2=row(f["b2"]),
      )

    per = [one(lp) for lp in layers]
    stacked = jax.tree_util.tree_map(lambda *xs: jnp.stack(xs, 0), *per)
  else:
    hidden = d * 4
    z = lambda *s: jnp.zeros(s, jnp.float32)
    stacked = dict(
        s_ng=z(1, 1, d), s_nb=z(1, 1, d),
        s_wqkv=z(1, d, 3 * d), s_bqkv=z(1, 1, 3 * d),
        s_wo=z(1, d, d), s_bo=z(1, 1, d),
        s_ffg=z(1, 1, d), s_ffb=z(1, 1, d),
        s_w1=z(1, d, 2 * hidden), s_b1=z(1, 1, 2 * hidden),
        s_w2=z(1, hidden, d), s_b2=z(1, 1, d))
  fused.update(stacked)
  return fused


# ------------------------------------------------------------------- main ---

if __name__ == "__main__":
  PROMPT_LEN, PROMPT_DEPTH = 4, 2
  PROMPT_DIM = 32          # latent dim (divisible by heads)
  TEXTEMB_DIM = 48         # kv_dim != latent_dim exercises the kdim/vdim path
  DEPTH = 2
  CROSS_HEADS = SELF_HEADS = 4
  BATCH, TEXT_SEQ = 2, 8

  root = jax.random.PRNGKey(0)
  pkey, xkey = jax.random.split(root)
  params = init_params(pkey, prompt_len=PROMPT_LEN, prompt_depth=PROMPT_DEPTH,
                       prompt_dim=PROMPT_DIM, textemb_dim=TEXTEMB_DIM,
                       depth=DEPTH)
  fused_params = prepare_params(params, cross_heads=CROSS_HEADS,
                                self_heads=SELF_HEADS)
  text_emb = jax.random.normal(xkey, (BATCH, TEXT_SEQ, TEXTEMB_DIM), jnp.float32)

  fwd = jax.jit(functools.partial(
      prompt_translator_forward,
      prompt_len=PROMPT_LEN, prompt_depth=PROMPT_DEPTH, depth=DEPTH,
      cross_heads=CROSS_HEADS, self_heads=SELF_HEADS))

  prompt_a, prompt_b = fwd(text_emb, fused_params)
  jax.block_until_ready((prompt_a, prompt_b))
  assert prompt_a.shape == (PROMPT_DEPTH, PROMPT_LEN, BATCH * PROMPT_DIM)
  assert prompt_b.shape == prompt_a.shape
  print("KERNEL_OK")
</pallas_src>

<mosaic_0001>
module attributes {stable_mosaic.version = 11 : i64} {
  func.func @_prompt_translator_kernel(%arg0: memref<16x48xf32, #tpu.memory_space<vmem>>, %arg1: memref<8x32xf32, #tpu.memory_space<vmem>>, %arg2: memref<1x32xf32, #tpu.memory_space<vmem>>, %arg3: memref<1x32xf32, #tpu.memory_space<vmem>>, %arg4: memref<1x48xf32, #tpu.memory_space<vmem>>, %arg5: memref<1x48xf32, #tpu.memory_space<vmem>>, %arg6: memref<32x32xf32, #tpu.memory_space<vmem>>, %arg7: memref<1x32xf32, #tpu.memory_space<vmem>>, %arg8: memref<48x64xf32, #tpu.memory_space<vmem>>, %arg9: memref<1x64xf32, #tpu.memory_space<vmem>>, %arg10: memref<32x32xf32, #tpu.memory_space<vmem>>, %arg11: memref<1x32xf32, #tpu.memory_space<vmem>>, %arg12: memref<1x32xf32, #tpu.memory_space<vmem>>, %arg13: memref<1x32xf32, #tpu.memory_space<vmem>>, %arg14: memref<32x256xf32, #tpu.memory_space<vmem>>, %arg15: memref<1x256xf32, #tpu.memory_space<vmem>>, %arg16: memref<128x32xf32, #tpu.memory_space<vmem>>, %arg17: memref<1x32xf32, #tpu.memory_space<vmem>>, %arg18: memref<2x1x32xf32, #tpu.memory_space<vmem>>, %arg19: memref<2x1x32xf32, #tpu.memory_space<vmem>>, %arg20: memref<2x32x96xf32, #tpu.memory_space<vmem>>, %arg21: memref<2x1x96xf32, #tpu.memory_space<vmem>>, %arg22: memref<2x32x32xf32, #tpu.memory_space<vmem>>, %arg23: memref<2x1x32xf32, #tpu.memory_space<vmem>>, %arg24: memref<2x1x32xf32, #tpu.memory_space<vmem>>, %arg25: memref<2x1x32xf32, #tpu.memory_space<vmem>>, %arg26: memref<2x32x256xf32, #tpu.memory_space<vmem>>, %arg27: memref<2x1x256xf32, #tpu.memory_space<vmem>>, %arg28: memref<2x128x32xf32, #tpu.memory_space<vmem>>, %arg29: memref<2x1x32xf32, #tpu.memory_space<vmem>>, %arg30: memref<16x32xf32, #tpu.memory_space<vmem>>) attributes {dimension_semantics = [], scalar_prefetch = 0 : i64, scratch_operands = 0 : i64, tpu.core_type = #tpu.core_type<tc>} {
    %c0 = arith.constant 0 : index
    %c0_0 = arith.constant 0 : index
    %0 = vector.load %arg1[%c0, %c0_0] : memref<8x32xf32, #tpu.memory_space<vmem>>, vector<8x32xf32>
    %c0_1 = arith.constant 0 : index
    %c0_2 = arith.constant 0 : index
    %1 = vector.load %arg2[%c0_1, %c0_2] : memref<1x32xf32, #tpu.memory_space<vmem>>, vector<1x32xf32>
    %c0_3 = arith.constant 0 : index
    %c0_4 = arith.constant 0 : index
    %2 = vector.load %arg3[%c0_3, %c0_4] : memref<1x32xf32, #tpu.memory_space<vmem>>, vector<1x32xf32>
    %cst = arith.constant dense<0.000000e+00> : vector<8xf32>
    %3 = vector.multi_reduction <add>, %0, %cst [1] : vector<8x32xf32> to vector<8xf32>
    %4 = vector.shape_cast %3 : vector<8xf32> to vector<8x1xf32>
    %cst_5 = arith.constant 3.200000e+01 : f32
    %5 = vector.broadcast %cst_5 : f32 to vector<8x1xf32>
    %6 = arith.divf %4, %5 : vector<8x1xf32>
    %7 = vector.broadcast %6 : vector<8x1xf32> to vector<8x32xf32>
    %8 = arith.subf %0, %7 : vector<8x32xf32>
    %9 = arith.mulf %8, %8 : vector<8x32xf32>
    %cst_6 = arith.constant dense<0.000000e+00> : vector<8xf32>
    %10 = vector.multi_reduction <add>, %9, %cst_6 [1] : vector<8x32xf32> to vector<8xf32>
    %11 = vector.shape_cast %10 : vector<8xf32> to vector<8x1xf32>
    %cst_7 = arith.constant 3.200000e+01 : f32
    %12 = vector.broadcast %cst_7 : f32 to vector<8x1xf32>
    %13 = arith.divf %11, %12 : vector<8x1xf32>
    %14 = vector.broadcast %6 : vector<8x1xf32> to vector<8x32xf32>
    %15 = arith.subf %0, %14 : vector<8x32xf32>
    %cst_8 = arith.constant 9.99999974E-6 : f32
    %16 = vector.broadcast %cst_8 : f32 to vector<8x1xf32>
    %17 = arith.addf %13, %16 : vector<8x1xf32>
    %18 = math.rsqrt %17 : vector<8x1xf32>
    %19 = vector.broadcast %18 : vector<8x1xf32> to vector<8x32xf32>
    %20 = arith.mulf %15, %19 : vector<8x32xf32>
    %21 = vector.broadcast %1 : vector<1x32xf32> to vector<8x32xf32>
    %22 = arith.mulf %20, %21 : vector<8x32xf32>
    %23 = vector.broadcast %2 : vector<1x32xf32> to vector<8x32xf32>
    %24 = arith.addf %22, %23 : vector<8x32xf32>
    %c0_9 = arith.constant 0 : index
    %c0_10 = arith.constant 0 : index
    %25 = vector.load %arg0[%c0_9, %c0_10] : memref<16x48xf32, #tpu.memory_space<vmem>>, vector<16x48xf32>
    %c0_11 = arith.constant 0 : index
    %c0_12 = arith.constant 0 : index
    %26 = vector.load %arg4[%c0_11, %c0_12] : memref<1x48xf32, #tpu.memory_space<vmem>>, vector<1x48xf32>
    %c0_13 = arith.constant 0 : index
    %c0_14 = arith.constant 0 : index
    %27 = vector.load %arg5[%c0_13, %c0_14] : memref<1x48xf32, #tpu.memory_space<vmem>>, vector<1x48xf32>
    %cst_15 = arith.constant dense<0.000000e+00> : vector<16xf32>
    %28 = vector.multi_reduction <add>, %25, %cst_15 [1] : vector<16x48xf32> to vector<16xf32>
    %29 = vector.shape_cast %28 : vector<16xf32> to vector<16x1xf32>
    %cst_16 = arith.constant 4.800000e+01 : f32
    %30 = vector.broadcast %cst_16 : f32 to vector<16x1xf32>
    %31 = arith.divf %29, %30 : vector<16x1xf32>
    %32 = vector.broadcast %31 : vector<16x1xf32> to vector<16x48xf32>
    %33 = arith.subf %25, %32 : vector<16x48xf32>
    %34 = arith.mulf %33, %33 : vector<16x48xf32>
    %cst_17 = arith.constant dense<0.000000e+00> : vector<16xf32>
    %35 = vector.multi_reduction <add>, %34, %cst_17 [1] : vector<16x48xf32> to vector<16xf32>
    %36 = vector.shape_cast %35 : vector<16xf32> to vector<16x1xf32>
    %cst_18 = arith.constant 4.800000e+01 : f32
    %37 = vector.broadcast %cst_18 : f32 to vector<16x1xf32>
    %38 = arith.divf %36, %37 : vector<16x1xf32>
    %39 = vector.broadcast %31 : vector<16x1xf32> to vector<16x48xf32>
    %40 = arith.subf %25, %39 : vector<16x48xf32>
    %cst_19 = arith.constant 9.99999974E-6 : f32
    %41 = vector.broadcast %cst_19 : f32 to vector<16x1xf32>
    %42 = arith.addf %38, %41 : vector<16x1xf32>
    %43 = math.rsqrt %42 : vector<16x1xf32>
    %44 = vector.broadcast %43 : vector<16x1xf32> to vector<16x48xf32>
    %45 = arith.mulf %40, %44 : vector<16x48xf32>
    %46 = vector.broadcast %26 : vector<1x48xf32> to vector<16x48xf32>
    %47 = arith.mulf %45, %46 : vector<16x48xf32>
    %48 = vector.broadcast %27 : vector<1x48xf32> to vector<16x48xf32>
    %49 = arith.addf %47, %48 : vector<16x48xf32>
    %c0_20 = arith.constant 0 : index
    %c0_21 = arith.constant 0 : index
    %50 = vector.load %arg6[%c0_20, %c0_21] : memref<32x32xf32, #tpu.memory_space<vmem>>, vector<32x32xf32>
    %cst_22 = arith.constant dense<0.000000e+00> : vector<8x32xf32>
    %51 = tpu.matmul %24, %50, %cst_22 {dimension_numbers = #tpu.dot_dimension_numbers<[1], [0], [0], [1], [0, 0, 1, 1], [], []>} : vector<8x32xf32>, vector<32x32xf32>, vector<8x32xf32> -> vector<8x32xf32>
    %c0_23 = arith.constant 0 : index
    %c0_24 = arith.constant 0 : index
    %52 = vector.load %arg7[%c0_23, %c0_24] : memref<1x32xf32, #tpu.memory_space<vmem>>, vector<1x32xf32>
    %53 = vector.broadcast %52 : vector<1x32xf32> to vector<8x32xf32>
    %54 = arith.addf %51, %53 : vector<8x32xf32>
    %c0_25 = arith.constant 0 : index
    %c0_26 = arith.constant 0 : index
    %55 = vector.load %arg8[%c0_25, %c0_26] : memref<48x64xf32, #tpu.memory_space<vmem>>, vector<48x64xf32>
    %cst_27 = arith.constant dense<0.000000e+00> : vector<16x64xf32>
    %56 = tpu.matmul %49, %55, %cst_27 {dimension_numbers = #tpu.dot_dimension_numbers<[1], [0], [0], [1], [0, 0, 1, 1], [], []>} : vector<16x48xf32>, vector<48x64xf32>, vector<16x64xf32> -> vector<16x64xf32>
    %c0_28 = arith.constant 0 : index
    %c0_29 = arith.constant 0 : index
    %57 = vector.load %arg9[%c0_28, %c0_29] : memref<1x64xf32, #tpu.memory_space<vmem>>, vector<1x64xf32>
    %58 = vector.broadcast %57 : vector<1x64xf32> to vector<16x64xf32>
    %59 = arith.addf %56, %58 : vector<16x64xf32>
    %60 = vector.extract_strided_slice %59 {offsets = [0, 0], sizes = [16, 32], strides = [1, 1]} : vector<16x64xf32> to vector<16x32xf32>
    %61 = vector.extract_strided_slice %59 {offsets = [0, 32], sizes = [16, 32], strides = [1, 1]} : vector<16x64xf32> to vector<16x32xf32>
    %62 = vector.extract_strided_slice %60 {offsets = [0, 0], sizes = [8, 32], strides = [1, 1]} : vector<16x32xf32> to vector<8x32xf32>
    %63 = vector.extract_strided_slice %61 {offsets = [0, 0], sizes = [8, 32], strides = [1, 1]} : vector<16x32xf32> to vector<8x32xf32>
    %64 = vector.extract_strided_slice %54 {offsets = [0, 0], sizes = [8, 8], strides = [1, 1]} : vector<8x32xf32> to vector<8x8xf32>
    %65 = vector.extract_strided_slice %62 {offsets = [0, 0], sizes = [8, 8], strides = [1, 1]} : vector<8x32xf32> to vector<8x8xf32>
    %66 = tpu.transpose %65, [1, 0] : vector<8x8xf32> -> vector<8x8xf32>
    %cst_30 = arith.constant dense<0.000000e+00> : vector<8x8xf32>
    %67 = tpu.matmul %64, %66, %cst_30 {dimension_numbers = #tpu.dot_dimension_numbers<[1], [0], [0], [1], [0, 0, 1, 1], [], []>} : vector<8x8xf32>, vector<8x8xf32>, vector<8x8xf32> -> vector<8x8xf32>
    %cst_31 = arith.constant dense<0xFF800000> : vector<8xf32>
    %68 = vector.multi_reduction <maximumf>, %67, %cst_31 [1] : vector<8x8xf32> to vector<8xf32>
    %69 = vector.shape_cast %68 : vector<8xf32> to vector<8x1xf32>
    %70 = vector.broadcast %69 : vector<8x1xf32> to vector<8x8xf32>
    %71 = arith.subf %67, %70 : vector<8x8xf32>
    %72 = math.exp %71 : vector<8x8xf32>
    %cst_32 = arith.constant dense<0.000000e+00> : vector<8xf32>
    %73 = vector.multi_reduction <add>, %72, %cst_32 [1] : vector<8x8xf32> to vector<8xf32>
    %74 = vector.shape_cast %73 : vector<8xf32> to vector<8x1xf32>
    %75 = tpu.reciprocal %74 {approx = true} : vector<8x1xf32> -> vector<8x1xf32>
    %76 = vector.broadcast %75 : vector<8x1xf32> to vector<8x8xf32>
    %77 = arith.mulf %72, %76 : vector<8x8xf32>
    %78 = vector.extract_strided_slice %63 {offsets = [0, 0], sizes = [8, 8], strides = [1, 1]} : vector<8x32xf32> to vector<8x8xf32>
    %cst_33 = arith.constant dense<0.000000e+00> : vector<8x8xf32>
    %79 = tpu.matmul %77, %78, %cst_33 {dimension_numbers = #tpu.dot_dimension_numbers<[1], [0], [0], [1], [0, 0, 1, 1], [], []>} : vector<8x8xf32>, vector<8x8xf32>, vector<8x8xf32> -> vector<8x8xf32>
    %80 = vector.extract_strided_slice %54 {offsets = [0, 8], sizes = [8, 8], strides = [1, 1]} : vector<8x32xf32> to vector<8x8xf32>
    %81 = vector.extract_strided_slice %62 {offsets = [0, 8], sizes = [8, 8], strides = [1, 1]} : vector<8x32xf32> to vector<8x8xf32>
    %82 = tpu.transpose %81, [1, 0] : vector<8x8xf32> -> vector<8x8xf32>
    %cst_34 = arith.constant dense<0.000000e+00> : vector<8x8xf32>
    %83 = tpu.matmul %80, %82, %cst_34 {dimension_numbers = #tpu.dot_dimension_numbers<[1], [0], [0], [1], [0, 0, 1, 1], [], []>} : vector<8x8xf32>, vector<8x8xf32>, vector<8x8xf32> -> vector<8x8xf32>
    %cst_35 = arith.constant dense<0xFF800000> : vector<8xf32>
    %84 = vector.multi_reduction <maximumf>, %83, %cst_35 [1] : vector<8x8xf32> to vector<8xf32>
    %85 = vector.shape_cast %84 : vector<8xf32> to vector<8x1xf32>
    %86 = vector.broadcast %85 : vector<8x1xf32> to vector<8x8xf32>
    %87 = arith.subf %83, %86 : vector<8x8xf32>
    %88 = math.exp %87 : vector<8x8xf32>
    %cst_36 = arith.constant dense<0.000000e+00> : vector<8xf32>
    %89 = vector.multi_reduction <add>, %88, %cst_36 [1] : vector<8x8xf32> to vector<8xf32>
    %90 = vector.shape_cast %89 : vector<8xf32> to vector<8x1xf32>
    %91 = tpu.reciprocal %90 {approx = true} : vector<8x1xf32> -> vector<8x1xf32>
    %92 = vector.broadcast %91 : vector<8x1xf32> to vector<8x8xf32>
    %93 = arith.mulf %88, %92 : vector<8x8xf32>
    %94 = vector.extract_strided_slice %63 {offsets = [0, 8], sizes = [8, 8], strides = [1, 1]} : vector<8x32xf32> to vector<8x8xf32>
    %cst_37 = arith.constant dense<0.000000e+00> : vector<8x8xf32>
    %95 = tpu.matmul %93, %94, %cst_37 {dimension_numbers = #tpu.dot_dimension_numbers<[1], [0], [0], [1], [0, 0, 1, 1], [], []>} : vector<8x8xf32>, vector<8x8xf32>, vector<8x8xf32> -> vector<8x8xf32>
    %96 = vector.extract_strided_slice %54 {offsets = [0, 16], sizes = [8, 8], strides = [1, 1]} : vector<8x32xf32> to vector<8x8xf32>
    %97 = vector.extract_strided_slice %62 {offsets = [0, 16], sizes = [8, 8], strides = [1, 1]} : vector<8x32xf32> to vector<8x8xf32>
    %98 = tpu.transpose %97, [1, 0] : vector<8x8xf32> -> vector<8x8xf32>
    %cst_38 = arith.constant dense<0.000000e+00> : vector<8x8xf32>
    %99 = tpu.matmul %96, %98, %cst_38 {dimension_numbers = #tpu.dot_dimension_numbers<[1], [0], [0], [1], [0, 0, 1, 1], [], []>} : vector<8x8xf32>, vector<8x8xf32>, vector<8x8xf32> -> vector<8x8xf32>
    %cst_39 = arith.constant dense<0xFF800000> : vector<8xf32>
    %100 = vector.multi_reduction <maximumf>, %99, %cst_39 [1] : vector<8x8xf32> to vector<8xf32>
    %101 = vector.shape_cast %100 : vector<8xf32> to vector<8x1xf32>
    %102 = vector.broadcast %101 : vector<8x1xf32> to vector<8x8xf32>
    %103 = arith.subf %99, %102 : vector<8x8xf32>
    %104 = math.exp %103 : vector<8x8xf32>
    %cst_40 = arith.constant dense<0.000000e+00> : vector<8xf32>
    %105 = vector.multi_reduction <add>, %104, %cst_40 [1] : vector<8x8xf32> to vector<8xf32>
    %106 = vector.shape_cast %105 : vector<8xf32> to vector<8x1xf32>
    %107 = tpu.reciprocal %106 {approx = true} : vector<8x1xf32> -> vector<8x1xf32>
    %108 = vector.broadcast %107 : vector<8x1xf32> to vector<8x8xf32>
    %109 = arith.mulf %104, %108 : vector<8x8xf32>
    %110 = vector.extract_strided_slice %63 {offsets = [0, 16], sizes = [8, 8], strides = [1, 1]} : vector<8x32xf32> to vector<8x8xf32>
    %cst_41 = arith.constant dense<0.000000e+00> : vector<8x8xf32>
    %111 = tpu.matmul %109, %110, %cst_41 {dimension_numbers = #tpu.dot_dimension_numbers<[1], [0], [0], [1], [0, 0, 1, 1], [], []>} : vector<8x8xf32>, vector<8x8xf32>, vector<8x8xf32> -> vector<8x8xf32>
    %112 = vector.extract_strided_slice %54 {offsets = [0, 24], sizes = [8, 8], strides = [1, 1]} : vector<8x32xf32> to vector<8x8xf32>
    %113 = vector.extract_strided_slice %62 {offsets = [0, 24], sizes = [8, 8], strides = [1, 1]} : vector<8x32xf32> to vector<8x8xf32>
    %114 = tpu.transpose %113, [1, 0] : vector<8x8xf32> -> vector<8x8xf32>
    %cst_42 = arith.constant dense<0.000000e+00> : vector<8x8xf32>
    %115 = tpu.matmul %112, %114, %cst_42 {dimension_numbers = #tpu.dot_dimension_numbers<[1], [0], [0], [1], [0, 0, 1, 1], [], []>} : vector<8x8xf32>, vector<8x8xf32>, vector<8x8xf32> -> vector<8x8xf32>
    %cst_43 = arith.constant dense<0xFF800000> : vector<8xf32>
    %116 = vector.multi_reduction <maximumf>, %115, %cst_43 [1] : vector<8x8xf32> to vector<8xf32>
    %117 = vector.shape_cast %116 : vector<8xf32> to vector<8x1xf32>
    %118 = vector.broadcast %117 : vector<8x1xf32> to vector<8x8xf32>
    %119 = arith.subf %115, %118 : vector<8x8xf32>
    %120 = math.exp %119 : vector<8x8xf32>
    %cst_44 = arith.constant dense<0.000000e+00> : vector<8xf32>
    %121 = vector.multi_reduction <add>, %120, %cst_44 [1] : vector<8x8xf32> to vector<8xf32>
    %122 = vector.shape_cast %121 : vector<8xf32> to vector<8x1xf32>
    %123 = tpu.reciprocal %122 {approx = true} : vector<8x1xf32> -> vector<8x1xf32>
    %124 = vector.broadcast %123 : vector<8x1xf32> to vector<8x8xf32>
    %125 = arith.mulf %120, %124 : vector<8x8xf32>
    %126 = vector.extract_strided_slice %63 {offsets = [0, 24], sizes = [8, 8], strides = [1, 1]} : vector<8x32xf32> to vector<8x8xf32>
    %cst_45 = arith.constant dense<0.000000e+00> : vector<8x8xf32>
    %127 = tpu.matmul %125, %126, %cst_45 {dimension_numbers = #tpu.dot_dimension_numbers<[1], [0], [0], [1], [0, 0, 1, 1], [], []>} : vector<8x8xf32>, vector<8x8xf32>, vector<8x8xf32> -> vector<8x8xf32>
    %128 = tpu.concatenate %79, %95, %111, %127 in 1 : vector<8x8xf32>, vector<8x8xf32>, vector<8x8xf32>, vector<8x8xf32> -> vector<8x32xf32>
    %129 = vector.extract_strided_slice %60 {offsets = [8, 0], sizes = [8, 32], strides = [1, 1]} : vector<16x32xf32> to vector<8x32xf32>
    %130 = vector.extract_strided_slice %61 {offsets = [8, 0], sizes = [8, 32], strides = [1, 1]} : vector<16x32xf32> to vector<8x32xf32>
    %131 = vector.extract_strided_slice %54 {offsets = [0, 0], sizes = [8, 8], strides = [1, 1]} : vector<8x32xf32> to vector<8x8xf32>
    %132 = vector.extract_strided_slice %129 {offsets = [0, 0], sizes = [8, 8], strides = [1, 1]} : vector<8x32xf32> to vector<8x8xf32>
    %133 = tpu.transpose %132, [1, 0] : vector<8x8xf32> -> vector<8x8xf32>
    %cst_46 = arith.constant dense<0.000000e+00> : vector<8x8xf32>
    %134 = tpu.matmul %131, %133, %cst_46 {dimension_numbers = #tpu.dot_dimension_numbers<[1], [0], [0], [1], [0, 0, 1, 1], [], []>} : vector<8x8xf32>, vector<8x8xf32>, vector<8x8xf32> -> vector<8x8xf32>
    %cst_47 = arith.constant dense<0xFF800000> : vector<8xf32>
    %135 = vector.multi_reduction <maximumf>, %134, %cst_47 [1] : vector<8x8xf32> to vector<8xf32>
    %136 = vector.shape_cast %135 : vector<8xf32> to vector<8x1xf32>
    %137 = vector.broadcast %136 : vector<8x1xf32> to vector<8x8xf32>
    %138 = arith.subf %134, %137 : vector<8x8xf32>
    %139 = math.exp %138 : vector<8x8xf32>
    %cst_48 = arith.constant dense<0.000000e+00> : vector<8xf32>
    %140 = vector.multi_reduction <add>, %139, %cst_48 [1] : vector<8x8xf32> to vector<8xf32>
    %141 = vector.shape_cast %140 : vector<8xf32> to vector<8x1xf32>
    %142 = tpu.reciprocal %141 {approx = true} : vector<8x1xf32> -> vector<8x1xf32>
    %143 = vector.broadcast %142 : vector<8x1xf32> to vector<8x8xf32>
    %144 = arith.mulf %139, %143 : vector<8x8xf32>
    %145 = vector.extract_strided_slice %130 {offsets = [0, 0], sizes = [8, 8], strides = [1, 1]} : vector<8x32xf32> to vector<8x8xf32>
    %cst_49 = arith.constant dense<0.000000e+00> : vector<8x8xf32>
    %146 = tpu.matmul %144, %145, %cst_49 {dimension_numbers = #tpu.dot_dimension_numbers<[1], [0], [0], [1], [0, 0, 1, 1], [], []>} : vector<8x8xf32>, vector<8x8xf32>, vector<8x8xf32> -> vector<8x8xf32>
    %147 = vector.extract_strided_slice %54 {offsets = [0, 8], sizes = [8, 8], strides = [1, 1]} : vector<8x32xf32> to vector<8x8xf32>
    %148 = vector.extract_strided_slice %129 {offsets = [0, 8], sizes = [8, 8], strides = [1, 1]} : vector<8x32xf32> to vector<8x8xf32>
    %149 = tpu.transpose %148, [1, 0] : vector<8x8xf32> -> vector<8x8xf32>
    %cst_50 = arith.constant dense<0.000000e+00> : vector<8x8xf32>
    %150 = tpu.matmul %147, %149, %cst_50 {dimension_numbers = #tpu.dot_dimension_numbers<[1], [0], [0], [1], [0, 0, 1, 1], [], []>} : vector<8x8xf32>, vector<8x8xf32>, vector<8x8xf32> -> vector<8x8xf32>
    %cst_51 = arith.constant dense<0xFF800000> : vector<8xf32>
    %151 = vector.multi_reduction <maximumf>, %150, %cst_51 [1] : vector<8x8xf32> to vector<8xf32>
    %152 = vector.shape_cast %151 : vector<8xf32> to vector<8x1xf32>
    %153 = vector.broadcast %152 : vector<8x1xf32> to vector<8x8xf32>
    %154 = arith.subf %150, %153 : vector<8x8xf32>
    %155 = math.exp %154 : vector<8x8xf32>
    %cst_52 = arith.constant dense<0.000000e+00> : vector<8xf32>
    %156 = vector.multi_reduction <add>, %155, %cst_52 [1] : vector<8x8xf32> to vector<8xf32>
    %157 = vector.shape_cast %156 : vector<8xf32> to vector<8x1xf32>
    %158 = tpu.reciprocal %157 {approx = true} : vector<8x1xf32> -> vector<8x1xf32>
    %159 = vector.broadcast %158 : vector<8x1xf32> to vector<8x8xf32>
    %160 = arith.mulf %155, %159 : vector<8x8xf32>
    %161 = vector.extract_strided_slice %130 {offsets = [0, 8], sizes = [8, 8], strides = [1, 1]} : vector<8x32xf32> to vector<8x8xf32>
    %cst_53 = arith.constant dense<0.000000e+00> : vector<8x8xf32>
    %162 = tpu.matmul %160, %161, %cst_53 {dimension_numbers = #tpu.dot_dimension_numbers<[1], [0], [0], [1], [0, 0, 1, 1], [], []>} : vector<8x8xf32>, vector<8x8xf32>, vector<8x8xf32> -> vector<8x8xf32>
    %163 = vector.extract_strided_slice %54 {offsets = [0, 16], sizes = [8, 8], strides = [1, 1]} : vector<8x32xf32> to vector<8x8xf32>
    %164 = vector.extract_strided_slice %129 {offsets = [0, 16], sizes = [8, 8], strides = [1, 1]} : vector<8x32xf32> to vector<8x8xf32>
    %165 = tpu.transpose %164, [1, 0] : vector<8x8xf32> -> vector<8x8xf32>
    %cst_54 = arith.constant dense<0.000000e+00> : vector<8x8xf32>
    %166 = tpu.matmul %163, %165, %cst_54 {dimension_numbers = #tpu.dot_dimension_numbers<[1], [0], [0], [1], [0, 0, 1, 1], [], []>} : vector<8x8xf32>, vector<8x8xf32>, vector<8x8xf32> -> vector<8x8xf32>
    %cst_55 = arith.constant dense<0xFF800000> : vector<8xf32>
    %167 = vector.multi_reduction <maximumf>, %166, %cst_55 [1] : vector<8x8xf32> to vector<8xf32>
    %168 = vector.shape_cast %167 : vector<8xf32> to vector<8x1xf32>
    %169 = vector.broadcast %168 : vector<8x1xf32> to vector<8x8xf32>
    %170 = arith.subf %166, %169 : vector<8x8xf32>
    %171 = math.exp %170 : vector<8x8xf32>
    %cst_56 = arith.constant dense<0.000000e+00> : vector<8xf32>
    %172 = vector.multi_reduction <add>, %171, %cst_56 [1] : vector<8x8xf32> to vector<8xf32>
    %173 = vector.shape_cast %172 : vector<8xf32> to vector<8x1xf32>
    %174 = tpu.reciprocal %173 {approx = true} : vector<8x1xf32> -> vector<8x1xf32>
    %175 = vector.broadcast %174 : vector<8x1xf32> to vector<8x8xf32>
    %176 = arith.mulf %171, %175 : vector<8x8xf32>
    %177 = vector.extract_strided_slice %130 {offsets = [0, 16], sizes = [8, 8], strides = [1, 1]} : vector<8x32xf32> to vector<8x8xf32>
    %cst_57 = arith.constant dense<0.000000e+00> : vector<8x8xf32>
    %178 = tpu.matmul %176, %177, %cst_57 {dimension_numbers = #tpu.dot_dimension_numbers<[1], [0], [0], [1], [0, 0, 1, 1], [], []>} : vector<8x8xf32>, vector<8x8xf32>, vector<8x8xf32> -> vector<8x8xf32>
    %179 = vector.extract_strided_slice %54 {offsets = [0, 24], sizes = [8, 8], strides = [1, 1]} : vector<8x32xf32> to vector<8x8xf32>
    %180 = vector.extract_strided_slice %129 {offsets = [0, 24], sizes = [8, 8], strides = [1, 1]} : vector<8x32xf32> to vector<8x8xf32>
    %181 = tpu.transpose %180, [1, 0] : vector<8x8xf32> -> vector<8x8xf32>
    %cst_58 = arith.constant dense<0.000000e+00> : vector<8x8xf32>
    %182 = tpu.matmul %179, %181, %cst_58 {dimension_numbers = #tpu.dot_dimension_numbers<[1], [0], [0], [1], [0, 0, 1, 1], [], []>} : vector<8x8xf32>, vector<8x8xf32>, vector<8x8xf32> -> vector<8x8xf32>
    %cst_59 = arith.constant dense<0xFF800000> : vector<8xf32>
    %183 = vector.multi_reduction <maximumf>, %182, %cst_59 [1] : vector<8x8xf32> to vector<8xf32>
    %184 = vector.shape_cast %183 : vector<8xf32> to vector<8x1xf32>
    %185 = vector.broadcast %184 : vector<8x1xf32> to vector<8x8xf32>
    %186 = arith.subf %182, %185 : vector<8x8xf32>
    %187 = math.exp %186 : vector<8x8xf32>
    %cst_60 = arith.constant dense<0.000000e+00> : vector<8xf32>
    %188 = vector.multi_reduction <add>, %187, %cst_60 [1] : vector<8x8xf32> to vector<8xf32>
    %189 = vector.shape_cast %188 : vector<8xf32> to vector<8x1xf32>
    %190 = tpu.reciprocal %189 {approx = true} : vector<8x1xf32> -> vector<8x1xf32>
    %191 = vector.broadcast %190 : vector<8x1xf32> to vector<8x8xf32>
    %192 = arith.mulf %187, %191 : vector<8x8xf32>
    %193 = vector.extract_strided_slice %130 {offsets = [0, 24], sizes = [8, 8], strides = [1, 1]} : vector<8x32xf32> to vector<8x8xf32>
    %cst_61 = arith.constant dense<0.000000e+00> : vector<8x8xf32>
    %194 = tpu.matmul %192, %193, %cst_61 {dimension_numbers = #tpu.dot_dimension_numbers<[1], [0], [0], [1], [0, 0, 1, 1], [], []>} : vector<8x8xf32>, vector<8x8xf32>, vector<8x8xf32> -> vector<8x8xf32>
    %195 = tpu.concatenate %146, %162, %178, %194 in 1 : vector<8x8xf32>, vector<8x8xf32>, vector<8x8xf32>, vector<8x8xf32> -> vector<8x32xf32>
    %196 = tpu.concatenate %128, %195 in 0 : vector<8x32xf32>, vector<8x32xf32> -> vector<16x32xf32>
    %c0_62 = arith.constant 0 : index
    %c0_63 = arith.constant 0 : index
    %197 = vector.load %arg10[%c0_62, %c0_63] : memref<32x32xf32, #tpu.memory_space<vmem>>, vector<32x32xf32>
    %cst_64 = arith.constant dense<0.000000e+00> : vector<16x32xf32>
    %198 = tpu.matmul %196, %197, %cst_64 {dimension_numbers = #tpu.dot_dimension_numbers<[1], [0], [0], [1], [0, 0, 1, 1], [], []>} : vector<16x32xf32>, vector<32x32xf32>, vector<16x32xf32> -> vector<16x32xf32>
    %c0_65 = arith.constant 0 : index
    %c0_66 = arith.constant 0 : index
    %199 = vector.load %arg11[%c0_65, %c0_66] : memref<1x32xf32, #tpu.memory_space<vmem>>, vector<1x32xf32>
    %200 = vector.broadcast %199 : vector<1x32xf32> to vector<16x32xf32>
    %201 = arith.addf %198, %200 : vector<16x32xf32>
    %c0_67 = arith.constant 0 : index
    %c0_68 = arith.constant 0 : index
    %202 = vector.load %arg12[%c0_67, %c0_68] : memref<1x32xf32, #tpu.memory_space<vmem>>, vector<1x32xf32>
    %c0_69 = arith.constant 0 : index
    %c0_70 = arith.constant 0 : index
    %203 = vector.load %arg13[%c0_69, %c0_70] : memref<1x32xf32, #tpu.memory_space<vmem>>, vector<1x32xf32>
    %c0_71 = arith.constant 0 : index
    %c0_72 = arith.constant 0 : index
    %204 = vector.load %arg14[%c0_71, %c0_72] : memref<32x256xf32, #tpu.memory_space<vmem>>, vector<32x256xf32>
    %c0_73 = arith.constant 0 : index
    %c0_74 = arith.constant 0 : index
    %205 = vector.load %arg15[%c0_73, %c0_74] : memref<1x256xf32, #tpu.memory_space<vmem>>, vector<1x256xf32>
    %c0_75 = arith.constant 0 : index
    %c0_76 = arith.constant 0 : index
    %206 = vector.load %arg16[%c0_75, %c0_76] : memref<128x32xf32, #tpu.memory_space<vmem>>, vector<128x32xf32>
    %c0_77 = arith.constant 0 : index
    %c0_78 = arith.constant 0 : index
    %207 = vector.load %arg17[%c0_77, %c0_78] : memref<1x32xf32, #tpu.memory_space<vmem>>, vector<1x32xf32>
    %cst_79 = arith.constant dense<0.000000e+00> : vector<16xf32>
    %208 = vector.multi_reduction <add>, %201, %cst_79 [1] : vector<16x32xf32> to vector<16xf32>
    %209 = vector.shape_cast %208 : vector<16xf32> to vector<16x1xf32>
    %cst_80 = arith.constant 3.200000e+01 : f32
    %210 = vector.broadcast %cst_80 : f32 to vector<16x1xf32>
    %211 = arith.divf %209, %210 : vector<16x1xf32>
    %212 = vector.broadcast %211 : vector<16x1xf32> to vector<16x32xf32>
    %213 = arith.subf %201, %212 : vector<16x32xf32>
    %214 = arith.mulf %213, %213 : vector<16x32xf32>
    %cst_81 = arith.constant dense<0.000000e+00> : vector<16xf32>
    %215 = vector.multi_reduction <add>, %214, %cst_81 [1] : vector<16x32xf32> to vector<16xf32>
    %216 = vector.shape_cast %215 : vector<16xf32> to vector<16x1xf32>
    %cst_82 = arith.constant 3.200000e+01 : f32
    %217 = vector.broadcast %cst_82 : f32 to vector<16x1xf32>
    %218 = arith.divf %216, %217 : vector<16x1xf32>
    %219 = vector.broadcast %211 : vector<16x1xf32> to vector<16x32xf32>
    %220 = arith.subf %201, %219 : vector<16x32xf32>
    %cst_83 = arith.constant 9.99999974E-6 : f32
    %221 = vector.broadcast %cst_83 : f32 to vector<16x1xf32>
    %222 = arith.addf %218, %221 : vector<16x1xf32>
    %223 = math.rsqrt %222 : vector<16x1xf32>
    %224 = vector.broadcast %223 : vector<16x1xf32> to vector<16x32xf32>
    %225 = arith.mulf %220, %224 : vector<16x32xf32>
    %226 = vector.broadcast %202 : vector<1x32xf32> to vector<16x32xf32>
    %227 = arith.mulf %225, %226 : vector<16x32xf32>
    %228 = vector.broadcast %203 : vector<1x32xf32> to vector<16x32xf32>
    %229 = arith.addf %227, %228 : vector<16x32xf32>
    %cst_84 = arith.constant dense<0.000000e+00> : vector<16x256xf32>
    %230 = tpu.matmul %229, %204, %cst_84 {dimension_numbers = #tpu.dot_dimension_numbers<[1], [0], [0], [1], [0, 0, 1, 1], [], []>} : vector<16x32xf32>, vector<32x256xf32>, vector<16x256xf32> -> vector<16x256xf32>
    %231 = vector.broadcast %205 : vector<1x256xf32> to vector<16x256xf32>
    %232 = arith.addf %230, %231 : vector<16x256xf32>
    %233 = vector.extract_strided_slice %232 {offsets = [0, 0], sizes = [16, 128], strides = [1, 1]} : vector<16x256xf32> to vector<16x128xf32>
    %234 = vector.extract_strided_slice %232 {offsets = [0, 128], sizes = [16, 128], strides = [1, 1]} : vector<16x256xf32> to vector<16x128xf32>
    %cst_85 = arith.constant 5.000000e-01 : f32
    %235 = vector.broadcast %cst_85 : f32 to vector<16x128xf32>
    %236 = arith.mulf %235, %234 : vector<16x128xf32>
    %cst_86 = arith.constant 4.471500e-02 : f32
    %237 = vector.broadcast %cst_86 : f32 to vector<16x128xf32>
    %238 = arith.mulf %237, %234 : vector<16x128xf32>
    %239 = arith.mulf %238, %234 : vector<16x128xf32>
    %240 = arith.mulf %239, %234 : vector<16x128xf32>
    %241 = arith.addf %234, %240 : vector<16x128xf32>
    %cst_87 = arith.constant 0.797884583 : f32
    %242 = vector.broadcast %cst_87 : f32 to vector<16x128xf32>
    %243 = arith.mulf %242, %241 : vector<16x128xf32>
    %244 = math.tanh %243 : vector<16x128xf32>
    %cst_88 = arith.constant 1.000000e+00 : f32
    %245 = vector.broadcast %cst_88 : f32 to vector<16x128xf32>
    %246 = arith.addf %245, %244 : vector<16x128xf32>
    %247 = arith.mulf %236, %246 : vector<16x128xf32>
    %248 = arith.mulf %233, %247 : vector<16x128xf32>
    %cst_89 = arith.constant dense<0.000000e+00> : vector<16x32xf32>
    %249 = tpu.matmul %248, %206, %cst_89 {dimension_numbers = #tpu.dot_dimension_numbers<[1], [0], [0], [1], [0, 0, 1, 1], [], []>} : vector<16x128xf32>, vector<128x32xf32>, vector<16x32xf32> -> vector<16x32xf32>
    %250 = vector.broadcast %207 : vector<1x32xf32> to vector<16x32xf32>
    %251 = arith.addf %249, %250 : vector<16x32xf32>
    %252 = arith.addf %201, %251 : vector<16x32xf32>
    %c0_90 = arith.constant 0 : index
    %c0_91 = arith.constant 0 : index
    %c0_92 = arith.constant 0 : index
    %253 = vector.load %arg18[%c0_90, %c0_91, %c0_92] : memref<2x1x32xf32, #tpu.memory_space<vmem>>, vector<1x1x32xf32>
    %254 = vector.shape_cast %253 : vector<1x1x32xf32> to vector<1x32xf32>
    %c0_93 = arith.constant 0 : index
    %c0_94 = arith.constant 0 : index
    %c0_95 = arith.constant 0 : index
    %255 = vector.load %arg19[%c0_93, %c0_94, %c0_95] : memref<2x1x32xf32, #tpu.memory_space<vmem>>, vector<1x1x32xf32>
    %256 = vector.shape_cast %255 : vector<1x1x32xf32> to vector<1x32xf32>
    %cst_96 = arith.constant dense<0.000000e+00> : vector<16xf32>
    %257 = vector.multi_reduction <add>, %252, %cst_96 [1] : vector<16x32xf32> to vector<16xf32>
    %258 = vector.shape_cast %257 : vector<16xf32> to vector<16x1xf32>
    %cst_97 = arith.constant 3.200000e+01 : f32
    %259 = vector.broadcast %cst_97 : f32 to vector<16x1xf32>
    %260 = arith.divf %258, %259 : vector<16x1xf32>
    %261 = vector.broadcast %260 : vector<16x1xf32> to vector<16x32xf32>
    %262 = arith.subf %252, %261 : vector<16x32xf32>
    %263 = arith.mulf %262, %262 : vector<16x32xf32>
    %cst_98 = arith.constant dense<0.000000e+00> : vector<16xf32>
    %264 = vector.multi_reduction <add>, %263, %cst_98 [1] : vector<16x32xf32> to vector<16xf32>
    %265 = vector.shape_cast %264 : vector<16xf32> to vector<16x1xf32>
    %cst_99 = arith.constant 3.200000e+01 : f32
    %266 = vector.broadcast %cst_99 : f32 to vector<16x1xf32>
    %267 = arith.divf %265, %266 : vector<16x1xf32>
    %268 = vector.broadcast %260 : vector<16x1xf32> to vector<16x32xf32>
    %269 = arith.subf %252, %268 : vector<16x32xf32>
    %cst_100 = arith.constant 9.99999974E-6 : f32
    %270 = vector.broadcast %cst_100 : f32 to vector<16x1xf32>
    %271 = arith.addf %267, %270 : vector<16x1xf32>
    %272 = math.rsqrt %271 : vector<16x1xf32>
    %273 = vector.broadcast %272 : vector<16x1xf32> to vector<16x32xf32>
    %274 = arith.mulf %269, %273 : vector<16x32xf32>
    %275 = vector.broadcast %254 : vector<1x32xf32> to vector<16x32xf32>
    %276 = arith.mulf %274, %275 : vector<16x32xf32>
    %277 = vector.broadcast %256 : vector<1x32xf32> to vector<16x32xf32>
    %278 = arith.addf %276, %277 : vector<16x32xf32>
    %c0_101 = arith.constant 0 : index
    %c0_102 = arith.constant 0 : index
    %c0_103 = arith.constant 0 : index
    %279 = vector.load %arg20[%c0_101, %c0_102, %c0_103] : memref<2x32x96xf32, #tpu.memory_space<vmem>>, vector<1x32x96xf32>
    %280 = vector.shape_cast %279 : vector<1x32x96xf32> to vector<32x96xf32>
    %cst_104 = arith.constant dense<0.000000e+00> : vector<16x96xf32>
    %281 = tpu.matmul %278, %280, %cst_104 {dimension_numbers = #tpu.dot_dimension_numbers<[1], [0], [0], [1], [0, 0, 1, 1], [], []>} : vector<16x32xf32>, vector<32x96xf32>, vector<16x96xf32> -> vector<16x96xf32>
    %c0_105 = arith.constant 0 : index
    %c0_106 = arith.constant 0 : index
    %c0_107 = arith.constant 0 : index
    %282 = vector.load %arg21[%c0_105, %c0_106, %c0_107] : memref<2x1x96xf32, #tpu.memory_space<vmem>>, vector<1x1x96xf32>
    %283 = vector.shape_cast %282 : vector<1x1x96xf32> to vector<1x96xf32>
    %284 = vector.broadcast %283 : vector<1x96xf32> to vector<16x96xf32>
    %285 = arith.addf %281, %284 : vector<16x96xf32>
    %286 = vector.extract_strided_slice %285 {offsets = [0, 0], sizes = [16, 32], strides = [1, 1]} : vector<16x96xf32> to vector<16x32xf32>
    %287 = vector.extract_strided_slice %285 {offsets = [0, 32], sizes = [16, 32], strides = [1, 1]} : vector<16x96xf32> to vector<16x32xf32>
    %288 = vector.extract_strided_slice %285 {offsets = [0, 64], sizes = [16, 32], strides = [1, 1]} : vector<16x96xf32> to vector<16x32xf32>
    %289 = vector.extract_strided_slice %287 {offsets = [0, 0], sizes = [8, 32], strides = [1, 1]} : vector<16x32xf32> to vector<8x32xf32>
    %290 = vector.extract_strided_slice %288 {offsets = [0, 0], sizes = [8, 32], strides = [1, 1]} : vector<16x32xf32> to vector<8x32xf32>
    %291 = vector.extract_strided_slice %286 {offsets = [0, 0], sizes = [8, 32], strides = [1, 1]} : vector<16x32xf32> to vector<8x32xf32>
    %292 = vector.extract_strided_slice %291 {offsets = [0, 0], sizes = [8, 8], strides = [1, 1]} : vector<8x32xf32> to vector<8x8xf32>
    %293 = vector.extract_strided_slice %289 {offsets = [0, 0], sizes = [8, 8], strides = [1, 1]} : vector<8x32xf32> to vector<8x8xf32>
    %294 = tpu.transpose %293, [1, 0] : vector<8x8xf32> -> vector<8x8xf32>
    %cst_108 = arith.constant dense<0.000000e+00> : vector<8x8xf32>
    %295 = tpu.matmul %292, %294, %cst_108 {dimension_numbers = #tpu.dot_dimension_numbers<[1], [0], [0], [1], [0, 0, 1, 1], [], []>} : vector<8x8xf32>, vector<8x8xf32>, vector<8x8xf32> -> vector<8x8xf32>
    %cst_109 = arith.constant dense<0xFF800000> : vector<8xf32>
    %296 = vector.multi_reduction <maximumf>, %295, %cst_109 [1] : vector<8x8xf32> to vector<8xf32>
    %297 = vector.shape_cast %296 : vector<8xf32> to vector<8x1xf32>
    %298 = vector.broadcast %297 : vector<8x1xf32> to vector<8x8xf32>
    %299 = arith.subf %295, %298 : vector<8x8xf32>
    %300 = math.exp %299 : vector<8x8xf32>
    %cst_110 = arith.constant dense<0.000000e+00> : vector<8xf32>
    %301 = vector.multi_reduction <add>, %300, %cst_110 [1] : vector<8x8xf32> to vector<8xf32>
    %302 = vector.shape_cast %301 : vector<8xf32> to vector<8x1xf32>
    %303 = tpu.reciprocal %302 {approx = true} : vector<8x1xf32> -> vector<8x1xf32>
    %304 = vector.broadcast %303 : vector<8x1xf32> to vector<8x8xf32>
    %305 = arith.mulf %300, %304 : vector<8x8xf32>
    %306 = vector.extract_strided_slice %290 {offsets = [0, 0], sizes = [8, 8], strides = [1, 1]} : vector<8x32xf32> to vector<8x8xf32>
    %cst_111 = arith.constant dense<0.000000e+00> : vector<8x8xf32>
    %307 = tpu.matmul %305, %306, %cst_111 {dimension_numbers = #tpu.dot_dimension_numbers<[1], [0], [0], [1], [0, 0, 1, 1], [], []>} : vector<8x8xf32>, vector<8x8xf32>, vector<8x8xf32> -> vector<8x8xf32>
    %308 = vector.extract_strided_slice %291 {offsets = [0, 8], sizes = [8, 8], strides = [1, 1]} : vector<8x32xf32> to vector<8x8xf32>
    %309 = vector.extract_strided_slice %289 {offsets = [0, 8], sizes = [8, 8], strides = [1, 1]} : vector<8x32xf32> to vector<8x8xf32>
    %310 = tpu.transpose %309, [1, 0] : vector<8x8xf32> -> vector<8x8xf32>
    %cst_112 = arith.constant dense<0.000000e+00> : vector<8x8xf32>
    %311 = tpu.matmul %308, %310, %cst_112 {dimension_numbers = #tpu.dot_dimension_numbers<[1], [0], [0], [1], [0, 0, 1, 1], [], []>} : vector<8x8xf32>, vector<8x8xf32>, vector<8x8xf32> -> vector<8x8xf32>
    %cst_113 = arith.constant dense<0xFF800000> : vector<8xf32>
    %312 = vector.multi_reduction <maximumf>, %311, %cst_113 [1] : vector<8x8xf32> to vector<8xf32>
    %313 = vector.shape_cast %312 : vector<8xf32> to vector<8x1xf32>
    %314 = vector.broadcast %313 : vector<8x1xf32> to vector<8x8xf32>
    %315 = arith.subf %311, %314 : vector<8x8xf32>
    %316 = math.exp %315 : vector<8x8xf32>
    %cst_114 = arith.constant dense<0.000000e+00> : vector<8xf32>
    %317 = vector.multi_reduction <add>, %316, %cst_114 [1] : vector<8x8xf32> to vector<8xf32>
    %318 = vector.shape_cast %317 : vector<8xf32> to vector<8x1xf32>
    %319 = tpu.reciprocal %318 {approx = true} : vector<8x1xf32> -> vector<8x1xf32>
    %320 = vector.broadcast %319 : vector<8x1xf32> to vector<8x8xf32>
    %321 = arith.mulf %316, %320 : vector<8x8xf32>
    %322 = vector.extract_strided_slice %290 {offsets = [0, 8], sizes = [8, 8], strides = [1, 1]} : vector<8x32xf32> to vector<8x8xf32>
    %cst_115 = arith.constant dense<0.000000e+00> : vector<8x8xf32>
    %323 = tpu.matmul %321, %322, %cst_115 {dimension_numbers = #tpu.dot_dimension_numbers<[1], [0], [0], [1], [0, 0, 1, 1], [], []>} : vector<8x8xf32>, vector<8x8xf32>, vector<8x8xf32> -> vector<8x8xf32>
    %324 = vector.extract_strided_slice %291 {offsets = [0, 16], sizes = [8, 8], strides = [1, 1]} : vector<8x32xf32> to vector<8x8xf32>
    %325 = vector.extract_strided_slice %289 {offsets = [0, 16], sizes = [8, 8], strides = [1, 1]} : vector<8x32xf32> to vector<8x8xf32>
    %326 = tpu.transpose %325, [1, 0] : vector<8x8xf32> -> vector<8x8xf32>
    %cst_116 = arith.constant dense<0.000000e+00> : vector<8x8xf32>
    %327 = tpu.matmul %324, %326, %cst_116 {dimension_numbers = #tpu.dot_dimension_numbers<[1], [0], [0], [1], [0, 0, 1, 1], [], []>} : vector<8x8xf32>, vector<8x8xf32>, vector<8x8xf32> -> vector<8x8xf32>
    %cst_117 = arith.constant dense<0xFF800000> : vector<8xf32>
    %328 = vector.multi_reduction <maximumf>, %327, %cst_117 [1] : vector<8x8xf32> to vector<8xf32>
    %329 = vector.shape_cast %328 : vector<8xf32> to vector<8x1xf32>
    %330 = vector.broadcast %329 : vector<8x1xf32> to vector<8x8xf32>
    %331 = arith.subf %327, %330 : vector<8x8xf32>
    %332 = math.exp %331 : vector<8x8xf32>
    %cst_118 = arith.constant dense<0.000000e+00> : vector<8xf32>
    %333 = vector.multi_reduction <add>, %332, %cst_118 [1] : vector<8x8xf32> to vector<8xf32>
    %334 = vector.shape_cast %333 : vector<8xf32> to vector<8x1xf32>
    %335 = tpu.reciprocal %334 {approx = true} : vector<8x1xf32> -> vector<8x1xf32>
    %336 = vector.broadcast %335 : vector<8x1xf32> to vector<8x8xf32>
    %337 = arith.mulf %332, %336 : vector<8x8xf32>
    %338 = vector.extract_strided_slice %290 {offsets = [0, 16], sizes = [8, 8], strides = [1, 1]} : vector<8x32xf32> to vector<8x8xf32>
    %cst_119 = arith.constant dense<0.000000e+00> : vector<8x8xf32>
    %339 = tpu.matmul %337, %338, %cst_119 {dimension_numbers = #tpu.dot_dimension_numbers<[1], [0], [0], [1], [0, 0, 1, 1], [], []>} : vector<8x8xf32>, vector<8x8xf32>, vector<8x8xf32> -> vector<8x8xf32>
    %340 = vector.extract_strided_slice %291 {offsets = [0, 24], sizes = [8, 8], strides = [1, 1]} : vector<8x32xf32> to vector<8x8xf32>
    %341 = vector.extract_strided_slice %289 {offsets = [0, 24], sizes = [8, 8], strides = [1, 1]} : vector<8x32xf32> to vector<8x8xf32>
    %342 = tpu.transpose %341, [1, 0] : vector<8x8xf32> -> vector<8x8xf32>
    %cst_120 = arith.constant dense<0.000000e+00> : vector<8x8xf32>
    %343 = tpu.matmul %340, %342, %cst_120 {dimension_numbers = #tpu.dot_dimension_numbers<[1], [0], [0], [1], [0, 0, 1, 1], [], []>} : vector<8x8xf32>, vector<8x8xf32>, vector<8x8xf32> -> vector<8x8xf32>
    %cst_121 = arith.constant dense<0xFF800000> : vector<8xf32>
    %344 = vector.multi_reduction <maximumf>, %343, %cst_121 [1] : vector<8x8xf32> to vector<8xf32>
    %345 = vector.shape_cast %344 : vector<8xf32> to vector<8x1xf32>
    %346 = vector.broadcast %345 : vector<8x1xf32> to vector<8x8xf32>
    %347 = arith.subf %343, %346 : vector<8x8xf32>
    %348 = math.exp %347 : vector<8x8xf32>
    %cst_122 = arith.constant dense<0.000000e+00> : vector<8xf32>
    %349 = vector.multi_reduction <add>, %348, %cst_122 [1] : vector<8x8xf32> to vector<8xf32>
    %350 = vector.shape_cast %349 : vector<8xf32> to vector<8x1xf32>
    %351 = tpu.reciprocal %350 {approx = true} : vector<8x1xf32> -> vector<8x1xf32>
    %352 = vector.broadcast %351 : vector<8x1xf32> to vector<8x8xf32>
    %353 = arith.mulf %348, %352 : vector<8x8xf32>
    %354 = vector.extract_strided_slice %290 {offsets = [0, 24], sizes = [8, 8], strides = [1, 1]} : vector<8x32xf32> to vector<8x8xf32>
    %cst_123 = arith.constant dense<0.000000e+00> : vector<8x8xf32>
    %355 = tpu.matmul %353, %354, %cst_123 {dimension_numbers = #tpu.dot_dimension_numbers<[1], [0], [0], [1], [0, 0, 1, 1], [], []>} : vector<8x8xf32>, vector<8x8xf32>, vector<8x8xf32> -> vector<8x8xf32>
    %356 = tpu.concatenate %307, %323, %339, %355 in 1 : vector<8x8xf32>, vector<8x8xf32>, vector<8x8xf32>, vector<8x8xf32> -> vector<8x32xf32>
    %357 = vector.extract_strided_slice %287 {offsets = [8, 0], sizes = [8, 32], strides = [1, 1]} : vector<16x32xf32> to vector<8x32xf32>
    %358 = vector.extract_strided_slice %288 {offsets = [8, 0], sizes = [8, 32], strides = [1, 1]} : vector<16x32xf32> to vector<8x32xf32>
    %359 = vector.extract_strided_slice %286 {offsets = [8, 0], sizes = [8, 32], strides = [1, 1]} : vector<16x32xf32> to vector<8x32xf32>
    %360 = vector.extract_strided_slice %359 {offsets = [0, 0], sizes = [8, 8], strides = [1, 1]} : vector<8x32xf32> to vector<8x8xf32>
    %361 = vector.extract_strided_slice %357 {offsets = [0, 0], sizes = [8, 8], strides = [1, 1]} : vector<8x32xf32> to vector<8x8xf32>
    %362 = tpu.transpose %361, [1, 0] : vector<8x8xf32> -> vector<8x8xf32>
    %cst_124 = arith.constant dense<0.000000e+00> : vector<8x8xf32>
    %363 = tpu.matmul %360, %362, %cst_124 {dimension_numbers = #tpu.dot_dimension_numbers<[1], [0], [0], [1], [0, 0, 1, 1], [], []>} : vector<8x8xf32>, vector<8x8xf32>, vector<8x8xf32> -> vector<8x8xf32>
    %cst_125 = arith.constant dense<0xFF800000> : vector<8xf32>
    %364 = vector.multi_reduction <maximumf>, %363, %cst_125 [1] : vector<8x8xf32> to vector<8xf32>
    %365 = vector.shape_cast %364 : vector<8xf32> to vector<8x1xf32>
    %366 = vector.broadcast %365 : vector<8x1xf32> to vector<8x8xf32>
    %367 = arith.subf %363, %366 : vector<8x8xf32>
    %368 = math.exp %367 : vector<8x8xf32>
    %cst_126 = arith.constant dense<0.000000e+00> : vector<8xf32>
    %369 = vector.multi_reduction <add>, %368, %cst_126 [1] : vector<8x8xf32> to vector<8xf32>
    %370 = vector.shape_cast %369 : vector<8xf32> to vector<8x1xf32>
    %371 = tpu.reciprocal %370 {approx = true} : vector<8x1xf32> -> vector<8x1xf32>
    %372 = vector.broadcast %371 : vector<8x1xf32> to vector<8x8xf32>
    %373 = arith.mulf %368, %372 : vector<8x8xf32>
    %374 = vector.extract_strided_slice %358 {offsets = [0, 0], sizes = [8, 8], strides = [1, 1]} : vector<8x32xf32> to vector<8x8xf32>
    %cst_127 = arith.constant dense<0.000000e+00> : vector<8x8xf32>
    %375 = tpu.matmul %373, %374, %cst_127 {dimension_numbers = #tpu.dot_dimension_numbers<[1], [0], [0], [1], [0, 0, 1, 1], [], []>} : vector<8x8xf32>, vector<8x8xf32>, vector<8x8xf32> -> vector<8x8xf32>
    %376 = vector.extract_strided_slice %359 {offsets = [0, 8], sizes = [8, 8], strides = [1, 1]} : vector<8x32xf32> to vector<8x8xf32>
    %377 = vector.extract_strided_slice %357 {offsets = [0, 8], sizes = [8, 8], strides = [1, 1]} : vector<8x32xf32> to vector<8x8xf32>
    %378 = tpu.transpose %377, [1, 0] : vector<8x8xf32> -> vector<8x8xf32>
    %cst_128 = arith.constant dense<0.000000e+00> : vector<8x8xf32>
    %379 = tpu.matmul %376, %378, %cst_128 {dimension_numbers = #tpu.dot_dimension_numbers<[1], [0], [0], [1], [0, 0, 1, 1], [], []>} : vector<8x8xf32>, vector<8x8xf32>, vector<8x8xf32> -> vector<8x8xf32>
    %cst_129 = arith.constant dense<0xFF800000> : vector<8xf32>
    %380 = vector.multi_reduction <maximumf>, %379, %cst_129 [1] : vector<8x8xf32> to vector<8xf32>
    %381 = vector.shape_cast %380 : vector<8xf32> to vector<8x1xf32>
    %382 = vector.broadcast %381 : vector<8x1xf32> to vector<8x8xf32>
    %383 = arith.subf %379, %382 : vector<8x8xf32>
    %384 = math.exp %383 : vector<8x8xf32>
    %cst_130 = arith.constant dense<0.000000e+00> : vector<8xf32>
    %385 = vector.multi_reduction <add>, %384, %cst_130 [1] : vector<8x8xf32> to vector<8xf32>
    %386 = vector.shape_cast %385 : vector<8xf32> to vector<8x1xf32>
    %387 = tpu.reciprocal %386 {approx = true} : vector<8x1xf32> -> vector<8x1xf32>
    %388 = vector.broadcast %387 : vector<8x1xf32> to vector<8x8xf32>
    %389 = arith.mulf %384, %388 : vector<8x8xf32>
    %390 = vector.extract_strided_slice %358 {offsets = [0, 8], sizes = [8, 8], strides = [1, 1]} : vector<8x32xf32> to vector<8x8xf32>
    %cst_131 = arith.constant dense<0.000000e+00> : vector<8x8xf32>
    %391 = tpu.matmul %389, %390, %cst_131 {dimension_numbers = #tpu.dot_dimension_numbers<[1], [0], [0], [1], [0, 0, 1, 1], [], []>} : vector<8x8xf32>, vector<8x8xf32>, vector<8x8xf32> -> vector<8x8xf32>
    %392 = vector.extract_strided_slice %359 {offsets = [0, 16], sizes = [8, 8], strides = [1, 1]} : vector<8x32xf32> to vector<8x8xf32>
    %393 = vector.extract_strided_slice %357 {offsets = [0, 16], sizes = [8, 8], strides = [1, 1]} : vector<8x32xf32> to vector<8x8xf32>
    %394 = tpu.transpose %393, [1, 0] : vector<8x8xf32> -> vector<8x8xf32>
    %cst_132 = arith.constant dense<0.000000e+00> : vector<8x8xf32>
    %395 = tpu.matmul %392, %394, %cst_132 {dimension_numbers = #tpu.dot_dimension_numbers<[1], [0], [0], [1], [0, 0, 1, 1], [], []>} : vector<8x8xf32>, vector<8x8xf32>, vector<8x8xf32> -> vector<8x8xf32>
    %cst_133 = arith.constant dense<0xFF800000> : vector<8xf32>
    %396 = vector.multi_reduction <maximumf>, %395, %cst_133 [1] : vector<8x8xf32> to vector<8xf32>
    %397 = vector.shape_cast %396 : vector<8xf32> to vector<8x1xf32>
    %398 = vector.broadcast %397 : vector<8x1xf32> to vector<8x8xf32>
    %399 = arith.subf %395, %398 : vector<8x8xf32>
    %400 = math.exp %399 : vector<8x8xf32>
    %cst_134 = arith.constant dense<0.000000e+00> : vector<8xf32>
    %401 = vector.multi_reduction <add>, %400, %cst_134 [1] : vector<8x8xf32> to vector<8xf32>
    %402 = vector.shape_cast %401 : vector<8xf32> to vector<8x1xf32>
    %403 = tpu.reciprocal %402 {approx = true} : vector<8x1xf32> -> vector<8x1xf32>
    %404 = vector.broadcast %403 : vector<8x1xf32> to vector<8x8xf32>
    %405 = arith.mulf %400, %404 : vector<8x8xf32>
    %406 = vector.extract_strided_slice %358 {offsets = [0, 16], sizes = [8, 8], strides = [1, 1]} : vector<8x32xf32> to vector<8x8xf32>
    %cst_135 = arith.constant dense<0.000000e+00> : vector<8x8xf32>
    %407 = tpu.matmul %405, %406, %cst_135 {dimension_numbers = #tpu.dot_dimension_numbers<[1], [0], [0], [1], [0, 0, 1, 1], [], []>} : vector<8x8xf32>, vector<8x8xf32>, vector<8x8xf32> -> vector<8x8xf32>
    %408 = vector.extract_strided_slice %359 {offsets = [0, 24], sizes = [8, 8], strides = [1, 1]} : vector<8x32xf32> to vector<8x8xf32>
    %409 = vector.extract_strided_slice %357 {offsets = [0, 24], sizes = [8, 8], strides = [1, 1]} : vector<8x32xf32> to vector<8x8xf32>
    %410 = tpu.transpose %409, [1, 0] : vector<8x8xf32> -> vector<8x8xf32>
    %cst_136 = arith.constant dense<0.000000e+00> : vector<8x8xf32>
    %411 = tpu.matmul %408, %410, %cst_136 {dimension_numbers = #tpu.dot_dimension_numbers<[1], [0], [0], [1], [0, 0, 1, 1], [], []>} : vector<8x8xf32>, vector<8x8xf32>, vector<8x8xf32> -> vector<8x8xf32>
    %cst_137 = arith.constant dense<0xFF800000> : vector<8xf32>
    %412 = vector.multi_reduction <maximumf>, %411, %cst_137 [1] : vector<8x8xf32> to vector<8xf32>
    %413 = vector.shape_cast %412 : vector<8xf32> to vector<8x1xf32>
    %414 = vector.broadcast %413 : vector<8x1xf32> to vector<8x8xf32>
    %415 = arith.subf %411, %414 : vector<8x8xf32>
    %416 = math.exp %415 : vector<8x8xf32>
    %cst_138 = arith.constant dense<0.000000e+00> : vector<8xf32>
    %417 = vector.multi_reduction <add>, %416, %cst_138 [1] : vector<8x8xf32> to vector<8xf32>
    %418 = vector.shape_cast %417 : vector<8xf32> to vector<8x1xf32>
    %419 = tpu.reciprocal %418 {approx = true} : vector<8x1xf32> -> vector<8x1xf32>
    %420 = vector.broadcast %419 : vector<8x1xf32> to vector<8x8xf32>
    %421 = arith.mulf %416, %420 : vector<8x8xf32>
    %422 = vector.extract_strided_slice %358 {offsets = [0, 24], sizes = [8, 8], strides = [1, 1]} : vector<8x32xf32> to vector<8x8xf32>
    %cst_139 = arith.constant dense<0.000000e+00> : vector<8x8xf32>
    %423 = tpu.matmul %421, %422, %cst_139 {dimension_numbers = #tpu.dot_dimension_numbers<[1], [0], [0], [1], [0, 0, 1, 1], [], []>} : vector<8x8xf32>, vector<8x8xf32>, vector<8x8xf32> -> vector<8x8xf32>
    %424 = tpu.concatenate %375, %391, %407, %423 in 1 : vector<8x8xf32>, vector<8x8xf32>, vector<8x8xf32>, vector<8x8xf32> -> vector<8x32xf32>
    %425 = tpu.concatenate %356, %424 in 0 : vector<8x32xf32>, vector<8x32xf32> -> vector<16x32xf32>
    %c0_140 = arith.constant 0 : index
    %c0_141 = arith.constant 0 : index
    %c0_142 = arith.constant 0 : index
    %426 = vector.load %arg22[%c0_140, %c0_141, %c0_142] : memref<2x32x32xf32, #tpu.memory_space<vmem>>, vector<1x32x32xf32>
    %427 = vector.shape_cast %426 : vector<1x32x32xf32> to vector<32x32xf32>
    %cst_143 = arith.constant dense<0.000000e+00> : vector<16x32xf32>
    %428 = tpu.matmul %425, %427, %cst_143 {dimension_numbers = #tpu.dot_dimension_numbers<[1], [0], [0], [1], [0, 0, 1, 1], [], []>} : vector<16x32xf32>, vector<32x32xf32>, vector<16x32xf32> -> vector<16x32xf32>
    %429 = arith.addf %252, %428 : vector<16x32xf32>
    %c0_144 = arith.constant 0 : index
    %c0_145 = arith.constant 0 : index
    %c0_146 = arith.constant 0 : index
    %430 = vector.load %arg23[%c0_144, %c0_145, %c0_146] : memref<2x1x32xf32, #tpu.memory_space<vmem>>, vector<1x1x32xf32>
    %431 = vector.shape_cast %430 : vector<1x1x32xf32> to vector<1x32xf32>
    %432 = vector.broadcast %431 : vector<1x32xf32> to vector<16x32xf32>
    %433 = arith.addf %429, %432 : vector<16x32xf32>
    %c0_147 = arith.constant 0 : index
    %c0_148 = arith.constant 0 : index
    %c0_149 = arith.constant 0 : index
    %434 = vector.load %arg24[%c0_147, %c0_148, %c0_149] : memref<2x1x32xf32, #tpu.memory_space<vmem>>, vector<1x1x32xf32>
    %435 = vector.shape_cast %434 : vector<1x1x32xf32> to vector<1x32xf32>
    %c0_150 = arith.constant 0 : index
    %c0_151 = arith.constant 0 : index
    %c0_152 = arith.constant 0 : index
    %436 = vector.load %arg25[%c0_150, %c0_151, %c0_152] : memref<2x1x32xf32, #tpu.memory_space<vmem>>, vector<1x1x32xf32>
    %437 = vector.shape_cast %436 : vector<1x1x32xf32> to vector<1x32xf32>
    %c0_153 = arith.constant 0 : index
    %c0_154 = arith.constant 0 : index
    %c0_155 = arith.constant 0 : index
    %438 = vector.load %arg26[%c0_153, %c0_154, %c0_155] : memref<2x32x256xf32, #tpu.memory_space<vmem>>, vector<1x32x256xf32>
    %439 = vector.shape_cast %438 : vector<1x32x256xf32> to vector<32x256xf32>
    %c0_156 = arith.constant 0 : index
    %c0_157 = arith.constant 0 : index
    %c0_158 = arith.constant 0 : index
    %440 = vector.load %arg27[%c0_156, %c0_157, %c0_158] : memref<2x1x256xf32, #tpu.memory_space<vmem>>, vector<1x1x256xf32>
    %441 = vector.shape_cast %440 : vector<1x1x256xf32> to vector<1x256xf32>
    %c0_159 = arith.constant 0 : index
    %c0_160 = arith.constant 0 : index
    %c0_161 = arith.constant 0 : index
    %442 = vector.load %arg28[%c0_159, %c0_160, %c0_161] : memref<2x128x32xf32, #tpu.memory_space<vmem>>, vector<1x128x32xf32>
    %443 = vector.shape_cast %442 : vector<1x128x32xf32> to vector<128x32xf32>
    %c0_162 = arith.constant 0 : index
    %c0_163 = arith.constant 0 : index
    %c0_164 = arith.constant 0 : index
    %444 = vector.load %arg29[%c0_162, %c0_163, %c0_164] : memref<2x1x32xf32, #tpu.memory_space<vmem>>, vector<1x1x32xf32>
    %445 = vector.shape_cast %444 : vector<1x1x32xf32> to vector<1x32xf32>
    %cst_165 = arith.constant dense<0.000000e+00> : vector<16xf32>
    %446 = vector.multi_reduction <add>, %433, %cst_165 [1] : vector<16x32xf32> to vector<16xf32>
    %447 = vector.shape_cast %446 : vector<16xf32> to vector<16x1xf32>
    %cst_166 = arith.constant 3.200000e+01 : f32
    %448 = vector.broadcast %cst_166 : f32 to vector<16x1xf32>
    %449 = arith.divf %447, %448 : vector<16x1xf32>
    %450 = vector.broadcast %449 : vector<16x1xf32> to vector<16x32xf32>
    %451 = arith.subf %433, %450 : vector<16x32xf32>
    %452 = arith.mulf %451, %451 : vector<16x32xf32>
    %cst_167 = arith.constant dense<0.000000e+00> : vector<16xf32>
    %453 = vector.multi_reduction <add>, %452, %cst_167 [1] : vector<16x32xf32> to vector<16xf32>
    %454 = vector.shape_cast %453 : vector<16xf32> to vector<16x1xf32>
    %cst_168 = arith.constant 3.200000e+01 : f32
    %455 = vector.broadcast %cst_168 : f32 to vector<16x1xf32>
    %456 = arith.divf %454, %455 : vector<16x1xf32>
    %457 = vector.broadcast %449 : vector<16x1xf32> to vector<16x32xf32>
    %458 = arith.subf %433, %457 : vector<16x32xf32>
    %cst_169 = arith.constant 9.99999974E-6 : f32
    %459 = vector.broadcast %cst_169 : f32 to vector<16x1xf32>
    %460 = arith.addf %456, %459 : vector<16x1xf32>
    %461 = math.rsqrt %460 : vector<16x1xf32>
    %462 = vector.broadcast %461 : vector<16x1xf32> to vector<16x32xf32>
    %463 = arith.mulf %458, %462 : vector<16x32xf32>
    %464 = vector.broadcast %435 : vector<1x32xf32> to vector<16x32xf32>
    %465 = arith.mulf %463, %464 : vector<16x32xf32>
    %466 = vector.broadcast %437 : vector<1x32xf32> to vector<16x32xf32>
    %467 = arith.addf %465, %466 : vector<16x32xf32>
    %cst_170 = arith.constant dense<0.000000e+00> : vector<16x256xf32>
    %468 = tpu.matmul %467, %439, %cst_170 {dimension_numbers = #tpu.dot_dimension_numbers<[1], [0], [0], [1], [0, 0, 1, 1], [], []>} : vector<16x32xf32>, vector<32x256xf32>, vector<16x256xf32> -> vector<16x256xf32>
    %469 = vector.broadcast %441 : vector<1x256xf32> to vector<16x256xf32>
    %470 = arith.addf %468, %469 : vector<16x256xf32>
    %471 = vector.extract_strided_slice %470 {offsets = [0, 0], sizes = [16, 128], strides = [1, 1]} : vector<16x256xf32> to vector<16x128xf32>
    %472 = vector.extract_strided_slice %470 {offsets = [0, 128], sizes = [16, 128], strides = [1, 1]} : vector<16x256xf32> to vector<16x128xf32>
    %cst_171 = arith.constant 5.000000e-01 : f32
    %473 = vector.broadcast %cst_171 : f32 to vector<16x128xf32>
    %474 = arith.mulf %473, %472 : vector<16x128xf32>
    %cst_172 = arith.constant 4.471500e-02 : f32
    %475 = vector.broadcast %cst_172 : f32 to vector<16x128xf32>
    %476 = arith.mulf %475, %472 : vector<16x128xf32>
    %477 = arith.mulf %476, %472 : vector<16x128xf32>
    %478 = arith.mulf %477, %472 : vector<16x128xf32>
    %479 = arith.addf %472, %478 : vector<16x128xf32>
    %cst_173 = arith.constant 0.797884583 : f32
    %480 = vector.broadcast %cst_173 : f32 to vector<16x128xf32>
    %481 = arith.mulf %480, %479 : vector<16x128xf32>
    %482 = math.tanh %481 : vector<16x128xf32>
    %cst_174 = arith.constant 1.000000e+00 : f32
    %483 = vector.broadcast %cst_174 : f32 to vector<16x128xf32>
    %484 = arith.addf %483, %482 : vector<16x128xf32>
    %485 = arith.mulf %474, %484 : vector<16x128xf32>
    %486 = arith.mulf %471, %485 : vector<16x128xf32>
    %cst_175 = arith.constant dense<0.000000e+00> : vector<16x32xf32>
    %487 = tpu.matmul %486, %443, %cst_175 {dimension_numbers = #tpu.dot_dimension_numbers<[1], [0], [0], [1], [0, 0, 1, 1], [], []>} : vector<16x128xf32>, vector<128x32xf32>, vector<16x32xf32> -> vector<16x32xf32>
    %488 = vector.broadcast %445 : vector<1x32xf32> to vector<16x32xf32>
    %489 = arith.addf %487, %488 : vector<16x32xf32>
    %490 = arith.addf %433, %489 : vector<16x32xf32>
    %c1 = arith.constant 1 : index
    %c0_176 = arith.constant 0 : index
    %c0_177 = arith.constant 0 : index
    %491 = vector.load %arg18[%c1, %c0_176, %c0_177] : memref<2x1x32xf32, #tpu.memory_space<vmem>>, vector<1x1x32xf32>
    %492 = vector.shape_cast %491 : vector<1x1x32xf32> to vector<1x32xf32>
    %c1_178 = arith.constant 1 : index
    %c0_179 = arith.constant 0 : index
    %c0_180 = arith.constant 0 : index
    %493 = vector.load %arg19[%c1_178, %c0_179, %c0_180] : memref<2x1x32xf32, #tpu.memory_space<vmem>>, vector<1x1x32xf32>
    %494 = vector.shape_cast %493 : vector<1x1x32xf32> to vector<1x32xf32>
    %cst_181 = arith.constant dense<0.000000e+00> : vector<16xf32>
    %495 = vector.multi_reduction <add>, %490, %cst_181 [1] : vector<16x32xf32> to vector<16xf32>
    %496 = vector.shape_cast %495 : vector<16xf32> to vector<16x1xf32>
    %cst_182 = arith.constant 3.200000e+01 : f32
    %497 = vector.broadcast %cst_182 : f32 to vector<16x1xf32>
    %498 = arith.divf %496, %497 : vector<16x1xf32>
    %499 = vector.broadcast %498 : vector<16x1xf32> to vector<16x32xf32>
    %500 = arith.subf %490, %499 : vector<16x32xf32>
    %501 = arith.mulf %500, %500 : vector<16x32xf32>
    %cst_183 = arith.constant dense<0.000000e+00> : vector<16xf32>
    %502 = vector.multi_reduction <add>, %501, %cst_183 [1] : vector<16x32xf32> to vector<16xf32>
    %503 = vector.shape_cast %502 : vector<16xf32> to vector<16x1xf32>
    %cst_184 = arith.constant 3.200000e+01 : f32
    %504 = vector.broadcast %cst_184 : f32 to vector<16x1xf32>
    %505 = arith.divf %503, %504 : vector<16x1xf32>
    %506 = vector.broadcast %498 : vector<16x1xf32> to vector<16x32xf32>
    %507 = arith.subf %490, %506 : vector<16x32xf32>
    %cst_185 = arith.constant 9.99999974E-6 : f32
    %508 = vector.broadcast %cst_185 : f32 to vector<16x1xf32>
    %509 = arith.addf %505, %508 : vector<16x1xf32>
    %510 = math.rsqrt %509 : vector<16x1xf32>
    %511 = vector.broadcast %510 : vector<16x1xf32> to vector<16x32xf32>
    %512 = arith.mulf %507, %511 : vector<16x32xf32>
    %513 = vector.broadcast %492 : vector<1x32xf32> to vector<16x32xf32>
    %514 = arith.mulf %512, %513 : vector<16x32xf32>
    %515 = vector.broadcast %494 : vector<1x32xf32> to vector<16x32xf32>
    %516 = arith.addf %514, %515 : vector<16x32xf32>
    %c1_186 = arith.constant 1 : index
    %c0_187 = arith.constant 0 : index
    %c0_188 = arith.constant 0 : index
    %517 = vector.load %arg20[%c1_186, %c0_187, %c0_188] : memref<2x32x96xf32, #tpu.memory_space<vmem>>, vector<1x32x96xf32>
    %518 = vector.shape_cast %517 : vector<1x32x96xf32> to vector<32x96xf32>
    %cst_189 = arith.constant dense<0.000000e+00> : vector<16x96xf32>
    %519 = tpu.matmul %516, %518, %cst_189 {dimension_numbers = #tpu.dot_dimension_numbers<[1], [0], [0], [1], [0, 0, 1, 1], [], []>} : vector<16x32xf32>, vector<32x96xf32>, vector<16x96xf32> -> vector<16x96xf32>
    %c1_190 = arith.constant 1 : index
    %c0_191 = arith.constant 0 : index
    %c0_192 = arith.constant 0 : index
    %520 = vector.load %arg21[%c1_190, %c0_191, %c0_192] : memref<2x1x96xf32, #tpu.memory_space<vmem>>, vector<1x1x96xf32>
    %521 = vector.shape_cast %520 : vector<1x1x96xf32> to vector<1x96xf32>
    %522 = vector.broadcast %521 : vector<1x96xf32> to vector<16x96xf32>
    %523 = arith.addf %519, %522 : vector<16x96xf32>
    %524 = vector.extract_strided_slice %523 {offsets = [0, 0], sizes = [16, 32], strides = [1, 1]} : vector<16x96xf32> to vector<16x32xf32>
    %525 = vector.extract_strided_slice %523 {offsets = [0, 32], sizes = [16, 32], strides = [1, 1]} : vector<16x96xf32> to vector<16x32xf32>
    %526 = vector.extract_strided_slice %523 {offsets = [0, 64], sizes = [16, 32], strides = [1, 1]} : vector<16x96xf32> to vector<16x32xf32>
    %527 = vector.extract_strided_slice %525 {offsets = [0, 0], sizes = [8, 32], strides = [1, 1]} : vector<16x32xf32> to vector<8x32xf32>
    %528 = vector.extract_strided_slice %526 {offsets = [0, 0], sizes = [8, 32], strides = [1, 1]} : vector<16x32xf32> to vector<8x32xf32>
    %529 = vector.extract_strided_slice %524 {offsets = [0, 0], sizes = [8, 32], strides = [1, 1]} : vector<16x32xf32> to vector<8x32xf32>
    %530 = vector.extract_strided_slice %529 {offsets = [0, 0], sizes = [8, 8], strides = [1, 1]} : vector<8x32xf32> to vector<8x8xf32>
    %531 = vector.extract_strided_slice %527 {offsets = [0, 0], sizes = [8, 8], strides = [1, 1]} : vector<8x32xf32> to vector<8x8xf32>
    %532 = tpu.transpose %531, [1, 0] : vector<8x8xf32> -> vector<8x8xf32>
    %cst_193 = arith.constant dense<0.000000e+00> : vector<8x8xf32>
    %533 = tpu.matmul %530, %532, %cst_193 {dimension_numbers = #tpu.dot_dimension_numbers<[1], [0], [0], [1], [0, 0, 1, 1], [], []>} : vector<8x8xf32>, vector<8x8xf32>, vector<8x8xf32> -> vector<8x8xf32>
    %cst_194 = arith.constant dense<0xFF800000> : vector<8xf32>
    %534 = vector.multi_reduction <maximumf>, %533, %cst_194 [1] : vector<8x8xf32> to vector<8xf32>
    %535 = vector.shape_cast %534 : vector<8xf32> to vector<8x1xf32>
    %536 = vector.broadcast %535 : vector<8x1xf32> to vector<8x8xf32>
    %537 = arith.subf %533, %536 : vector<8x8xf32>
    %538 = math.exp %537 : vector<8x8xf32>
    %cst_195 = arith.constant dense<0.000000e+00> : vector<8xf32>
    %539 = vector.multi_reduction <add>, %538, %cst_195 [1] : vector<8x8xf32> to vector<8xf32>
    %540 = vector.shape_cast %539 : vector<8xf32> to vector<8x1xf32>
    %541 = tpu.reciprocal %540 {approx = true} : vector<8x1xf32> -> vector<8x1xf32>
    %542 = vector.broadcast %541 : vector<8x1xf32> to vector<8x8xf32>
    %543 = arith.mulf %538, %542 : vector<8x8xf32>
    %544 = vector.extract_strided_slice %528 {offsets = [0, 0], sizes = [8, 8], strides = [1, 1]} : vector<8x32xf32> to vector<8x8xf32>
    %cst_196 = arith.constant dense<0.000000e+00> : vector<8x8xf32>
    %545 = tpu.matmul %543, %544, %cst_196 {dimension_numbers = #tpu.dot_dimension_numbers<[1], [0], [0], [1], [0, 0, 1, 1], [], []>} : vector<8x8xf32>, vector<8x8xf32>, vector<8x8xf32> -> vector<8x8xf32>
    %546 = vector.extract_strided_slice %529 {offsets = [0, 8], sizes = [8, 8], strides = [1, 1]} : vector<8x32xf32> to vector<8x8xf32>
    %547 = vector.extract_strided_slice %527 {offsets = [0, 8], sizes = [8, 8], strides = [1, 1]} : vector<8x32xf32> to vector<8x8xf32>
    %548 = tpu.transpose %547, [1, 0] : vector<8x8xf32> -> vector<8x8xf32>
    %cst_197 = arith.constant dense<0.000000e+00> : vector<8x8xf32>
    %549 = tpu.matmul %546, %548, %cst_197 {dimension_numbers = #tpu.dot_dimension_numbers<[1], [0], [0], [1], [0, 0, 1, 1], [], []>} : vector<8x8xf32>, vector<8x8xf32>, vector<8x8xf32> -> vector<8x8xf32>
    %cst_198 = arith.constant dense<0xFF800000> : vector<8xf32>
    %550 = vector.multi_reduction <maximumf>, %549, %cst_198 [1] : vector<8x8xf32> to vector<8xf32>
    %551 = vector.shape_cast %550 : vector<8xf32> to vector<8x1xf32>
    %552 = vector.broadcast %551 : vector<8x1xf32> to vector<8x8xf32>
    %553 = arith.subf %549, %552 : vector<8x8xf32>
    %554 = math.exp %553 : vector<8x8xf32>
    %cst_199 = arith.constant dense<0.000000e+00> : vector<8xf32>
    %555 = vector.multi_reduction <add>, %554, %cst_199 [1] : vector<8x8xf32> to vector<8xf32>
    %556 = vector.shape_cast %555 : vector<8xf32> to vector<8x1xf32>
    %557 = tpu.reciprocal %556 {approx = true} : vector<8x1xf32> -> vector<8x1xf32>
    %558 = vector.broadcast %557 : vector<8x1xf32> to vector<8x8xf32>
    %559 = arith.mulf %554, %558 : vector<8x8xf32>
    %560 = vector.extract_strided_slice %528 {offsets = [0, 8], sizes = [8, 8], strides = [1, 1]} : vector<8x32xf32> to vector<8x8xf32>
    %cst_200 = arith.constant dense<0.000000e+00> : vector<8x8xf32>
    %561 = tpu.matmul %559, %560, %cst_200 {dimension_numbers = #tpu.dot_dimension_numbers<[1], [0], [0], [1], [0, 0, 1, 1], [], []>} : vector<8x8xf32>, vector<8x8xf32>, vector<8x8xf32> -> vector<8x8xf32>
    %562 = vector.extract_strided_slice %529 {offsets = [0, 16], sizes = [8, 8], strides = [1, 1]} : vector<8x32xf32> to vector<8x8xf32>
    %563 = vector.extract_strided_slice %527 {offsets = [0, 16], sizes = [8, 8], strides = [1, 1]} : vector<8x32xf32> to vector<8x8xf32>
    %564 = tpu.transpose %563, [1, 0] : vector<8x8xf32> -> vector<8x8xf32>
    %cst_201 = arith.constant dense<0.000000e+00> : vector<8x8xf32>
    %565 = tpu.matmul %562, %564, %cst_201 {dimension_numbers = #tpu.dot_dimension_numbers<[1], [0], [0], [1], [0, 0, 1, 1], [], []>} : vector<8x8xf32>, vector<8x8xf32>, vector<8x8xf32> -> vector<8x8xf32>
    %cst_202 = arith.constant dense<0xFF800000> : vector<8xf32>
    %566 = vector.multi_reduction <maximumf>, %565, %cst_202 [1] : vector<8x8xf32> to vector<8xf32>
    %567 = vector.shape_cast %566 : vector<8xf32> to vector<8x1xf32>
    %568 = vector.broadcast %567 : vector<8x1xf32> to vector<8x8xf32>
    %569 = arith.subf %565, %568 : vector<8x8xf32>
    %570 = math.exp %569 : vector<8x8xf32>
    %cst_203 = arith.constant dense<0.000000e+00> : vector<8xf32>
    %571 = vector.multi_reduction <add>, %570, %cst_203 [1] : vector<8x8xf32> to vector<8xf32>
    %572 = vector.shape_cast %571 : vector<8xf32> to vector<8x1xf32>
    %573 = tpu.reciprocal %572 {approx = true} : vector<8x1xf32> -> vector<8x1xf32>
    %574 = vector.broadcast %573 : vector<8x1xf32> to vector<8x8xf32>
    %575 = arith.mulf %570, %574 : vector<8x8xf32>
    %576 = vector.extract_strided_slice %528 {offsets = [0, 16], sizes = [8, 8], strides = [1, 1]} : vector<8x32xf32> to vector<8x8xf32>
    %cst_204 = arith.constant dense<0.000000e+00> : vector<8x8xf32>
    %577 = tpu.matmul %575, %576, %cst_204 {dimension_numbers = #tpu.dot_dimension_numbers<[1], [0], [0], [1], [0, 0, 1, 1], [], []>} : vector<8x8xf32>, vector<8x8xf32>, vector<8x8xf32> -> vector<8x8xf32>
    %578 = vector.extract_strided_slice %529 {offsets = [0, 24], sizes = [8, 8], strides = [1, 1]} : vector<8x32xf32> to vector<8x8xf32>
    %579 = vector.extract_strided_slice %527 {offsets = [0, 24], sizes = [8, 8], strides = [1, 1]} : vector<8x32xf32> to vector<8x8xf32>
    %580 = tpu.transpose %579, [1, 0] : vector<8x8xf32> -> vector<8x8xf32>
    %cst_205 = arith.constant dense<0.000000e+00> : vector<8x8xf32>
    %581 = tpu.matmul %578, %580, %cst_205 {dimension_numbers = #tpu.dot_dimension_numbers<[1], [0], [0], [1], [0, 0, 1, 1], [], []>} : vector<8x8xf32>, vector<8x8xf32>, vector<8x8xf32> -> vector<8x8xf32>
    %cst_206 = arith.constant dense<0xFF800000> : vector<8xf32>
    %582 = vector.multi_reduction <maximumf>, %581, %cst_206 [1] : vector<8x8xf32> to vector<8xf32>
    %583 = vector.shape_cast %582 : vector<8xf32> to vector<8x1xf32>
    %584 = vector.broadcast %583 : vector<8x1xf32> to vector<8x8xf32>
    %585 = arith.subf %581, %584 : vector<8x8xf32>
    %586 = math.exp %585 : vector<8x8xf32>
    %cst_207 = arith.constant dense<0.000000e+00> : vector<8xf32>
    %587 = vector.multi_reduction <add>, %586, %cst_207 [1] : vector<8x8xf32> to vector<8xf32>
    %588 = vector.shape_cast %587 : vector<8xf32> to vector<8x1xf32>
    %589 = tpu.reciprocal %588 {approx = true} : vector<8x1xf32> -> vector<8x1xf32>
    %590 = vector.broadcast %589 : vector<8x1xf32> to vector<8x8xf32>
    %591 = arith.mulf %586, %590 : vector<8x8xf32>
    %592 = vector.extract_strided_slice %528 {offsets = [0, 24], sizes = [8, 8], strides = [1, 1]} : vector<8x32xf32> to vector<8x8xf32>
    %cst_208 = arith.constant dense<0.000000e+00> : vector<8x8xf32>
    %593 = tpu.matmul %591, %592, %cst_208 {dimension_numbers = #tpu.dot_dimension_numbers<[1], [0], [0], [1], [0, 0, 1, 1], [], []>} : vector<8x8xf32>, vector<8x8xf32>, vector<8x8xf32> -> vector<8x8xf32>
    %594 = tpu.concatenate %545, %561, %577, %593 in 1 : vector<8x8xf32>, vector<8x8xf32>, vector<8x8xf32>, vector<8x8xf32> -> vector<8x32xf32>
    %595 = vector.extract_strided_slice %525 {offsets = [8, 0], sizes = [8, 32], strides = [1, 1]} : vector<16x32xf32> to vector<8x32xf32>
    %596 = vector.extract_strided_slice %526 {offsets = [8, 0], sizes = [8, 32], strides = [1, 1]} : vector<16x32xf32> to vector<8x32xf32>
    %597 = vector.extract_strided_slice %524 {offsets = [8, 0], sizes = [8, 32], strides = [1, 1]} : vector<16x32xf32> to vector<8x32xf32>
    %598 = vector.extract_strided_slice %597 {offsets = [0, 0], sizes = [8, 8], strides = [1, 1]} : vector<8x32xf32> to vector<8x8xf32>
    %599 = vector.extract_strided_slice %595 {offsets = [0, 0], sizes = [8, 8], strides = [1, 1]} : vector<8x32xf32> to vector<8x8xf32>
    %600 = tpu.transpose %599, [1, 0] : vector<8x8xf32> -> vector<8x8xf32>
    %cst_209 = arith.constant dense<0.000000e+00> : vector<8x8xf32>
    %601 = tpu.matmul %598, %600, %cst_209 {dimension_numbers = #tpu.dot_dimension_numbers<[1], [0], [0], [1], [0, 0, 1, 1], [], []>} : vector<8x8xf32>, vector<8x8xf32>, vector<8x8xf32> -> vector<8x8xf32>
    %cst_210 = arith.constant dense<0xFF800000> : vector<8xf32>
    %602 = vector.multi_reduction <maximumf>, %601, %cst_210 [1] : vector<8x8xf32> to vector<8xf32>
    %603 = vector.shape_cast %602 : vector<8xf32> to vector<8x1xf32>
    %604 = vector.broadcast %603 : vector<8x1xf32> to vector<8x8xf32>
    %605 = arith.subf %601, %604 : vector<8x8xf32>
    %606 = math.exp %605 : vector<8x8xf32>
    %cst_211 = arith.constant dense<0.000000e+00> : vector<8xf32>
    %607 = vector.multi_reduction <add>, %606, %cst_211 [1] : vector<8x8xf32> to vector<8xf32>
    %608 = vector.shape_cast %607 : vector<8xf32> to vector<8x1xf32>
    %609 = tpu.reciprocal %608 {approx = true} : vector<8x1xf32> -> vector<8x1xf32>
    %610 = vector.broadcast %609 : vector<8x1xf32> to vector<8x8xf32>
    %611 = arith.mulf %606, %610 : vector<8x8xf32>
    %612 = vector.extract_strided_slice %596 {offsets = [0, 0], sizes = [8, 8], strides = [1, 1]} : vector<8x32xf32> to vector<8x8xf32>
    %cst_212 = arith.constant dense<0.000000e+00> : vector<8x8xf32>
    %613 = tpu.matmul %611, %612, %cst_212 {dimension_numbers = #tpu.dot_dimension_numbers<[1], [0], [0], [1], [0, 0, 1, 1], [], []>} : vector<8x8xf32>, vector<8x8xf32>, vector<8x8xf32> -> vector<8x8xf32>
    %614 = vector.extract_strided_slice %597 {offsets = [0, 8], sizes = [8, 8], strides = [1, 1]} : vector<8x32xf32> to vector<8x8xf32>
    %615 = vector.extract_strided_slice %595 {offsets = [0, 8], sizes = [8, 8], strides = [1, 1]} : vector<8x32xf32> to vector<8x8xf32>
    %616 = tpu.transpose %615, [1, 0] : vector<8x8xf32> -> vector<8x8xf32>
    %cst_213 = arith.constant dense<0.000000e+00> : vector<8x8xf32>
    %617 = tpu.matmul %614, %616, %cst_213 {dimension_numbers = #tpu.dot_dimension_numbers<[1], [0], [0], [1], [0, 0, 1, 1], [], []>} : vector<8x8xf32>, vector<8x8xf32>, vector<8x8xf32> -> vector<8x8xf32>
    %cst_214 = arith.constant dense<0xFF800000> : vector<8xf32>
    %618 = vector.multi_reduction <maximumf>, %617, %cst_214 [1] : vector<8x8xf32> to vector<8xf32>
    %619 = vector.shape_cast %618 : vector<8xf32> to vector<8x1xf32>
    %620 = vector.broadcast %619 : vector<8x1xf32> to vector<8x8xf32>
    %621 = arith.subf %617, %620 : vector<8x8xf32>
    %622 = math.exp %621 : vector<8x8xf32>
    %cst_215 = arith.constant dense<0.000000e+00> : vector<8xf32>
    %623 = vector.multi_reduction <add>, %622, %cst_215 [1] : vector<8x8xf32> to vector<8xf32>
    %624 = vector.shape_cast %623 : vector<8xf32> to vector<8x1xf32>
    %625 = tpu.reciprocal %624 {approx = true} : vector<8x1xf32> -> vector<8x1xf32>
    %626 = vector.broadcast %625 : vector<8x1xf32> to vector<8x8xf32>
    %627 = arith.mulf %622, %626 : vector<8x8xf32>
    %628 = vector.extract_strided_slice %596 {offsets = [0, 8], sizes = [8, 8], strides = [1, 1]} : vector<8x32xf32> to vector<8x8xf32>
    %cst_216 = arith.constant dense<0.000000e+00> : vector<8x8xf32>
    %629 = tpu.matmul %627, %628, %cst_216 {dimension_numbers = #tpu.dot_dimension_numbers<[1], [0], [0], [1], [0, 0, 1, 1], [], []>} : vector<8x8xf32>, vector<8x8xf32>, vector<8x8xf32> -> vector<8x8xf32>
    %630 = vector.extract_strided_slice %597 {offsets = [0, 16], sizes = [8, 8], strides = [1, 1]} : vector<8x32xf32> to vector<8x8xf32>
    %631 = vector.extract_strided_slice %595 {offsets = [0, 16], sizes = [8, 8], strides = [1, 1]} : vector<8x32xf32> to vector<8x8xf32>
    %632 = tpu.transpose %631, [1, 0] : vector<8x8xf32> -> vector<8x8xf32>
    %cst_217 = arith.constant dense<0.000000e+00> : vector<8x8xf32>
    %633 = tpu.matmul %630, %632, %cst_217 {dimension_numbers = #tpu.dot_dimension_numbers<[1], [0], [0], [1], [0, 0, 1, 1], [], []>} : vector<8x8xf32>, vector<8x8xf32>, vector<8x8xf32> -> vector<8x8xf32>
    %cst_218 = arith.constant dense<0xFF800000> : vector<8xf32>
    %634 = vector.multi_reduction <maximumf>, %633, %cst_218 [1] : vector<8x8xf32> to vector<8xf32>
    %635 = vector.shape_cast %634 : vector<8xf32> to vector<8x1xf32>
    %636 = vector.broadcast %635 : vector<8x1xf32> to vector<8x8xf32>
    %637 = arith.subf %633, %636 : vector<8x8xf32>
    %638 = math.exp %637 : vector<8x8xf32>
    %cst_219 = arith.constant dense<0.000000e+00> : vector<8xf32>
    %639 = vector.multi_reduction <add>, %638, %cst_219 [1] : vector<8x8xf32> to vector<8xf32>
    %640 = vector.shape_cast %639 : vector<8xf32> to vector<8x1xf32>
    %641 = tpu.reciprocal %640 {approx = true} : vector<8x1xf32> -> vector<8x1xf32>
    %642 = vector.broadcast %641 : vector<8x1xf32> to vector<8x8xf32>
    %643 = arith.mulf %638, %642 : vector<8x8xf32>
    %644 = vector.extract_strided_slice %596 {offsets = [0, 16], sizes = [8, 8], strides = [1, 1]} : vector<8x32xf32> to vector<8x8xf32>
    %cst_220 = arith.constant dense<0.000000e+00> : vector<8x8xf32>
    %645 = tpu.matmul %643, %644, %cst_220 {dimension_numbers = #tpu.dot_dimension_numbers<[1], [0], [0], [1], [0, 0, 1, 1], [], []>} : vector<8x8xf32>, vector<8x8xf32>, vector<8x8xf32> -> vector<8x8xf32>
    %646 = vector.extract_strided_slice %597 {offsets = [0, 24], sizes = [8, 8], strides = [1, 1]} : vector<8x32xf32> to vector<8x8xf32>
    %647 = vector.extract_strided_slice %595 {offsets = [0, 24], sizes = [8, 8], strides = [1, 1]} : vector<8x32xf32> to vector<8x8xf32>
    %648 = tpu.transpose %647, [1, 0] : vector<8x8xf32> -> vector<8x8xf32>
    %cst_221 = arith.constant dense<0.000000e+00> : vector<8x8xf32>
    %649 = tpu.matmul %646, %648, %cst_221 {dimension_numbers = #tpu.dot_dimension_numbers<[1], [0], [0], [1], [0, 0, 1, 1], [], []>} : vector<8x8xf32>, vector<8x8xf32>, vector<8x8xf32> -> vector<8x8xf32>
    %cst_222 = arith.constant dense<0xFF800000> : vector<8xf32>
    %650 = vector.multi_reduction <maximumf>, %649, %cst_222 [1] : vector<8x8xf32> to vector<8xf32>
    %651 = vector.shape_cast %650 : vector<8xf32> to vector<8x1xf32>
    %652 = vector.broadcast %651 : vector<8x1xf32> to vector<8x8xf32>
    %653 = arith.subf %649, %652 : vector<8x8xf32>
    %654 = math.exp %653 : vector<8x8xf32>
    %cst_223 = arith.constant dense<0.000000e+00> : vector<8xf32>
    %655 = vector.multi_reduction <add>, %654, %cst_223 [1] : vector<8x8xf32> to vector<8xf32>
    %656 = vector.shape_cast %655 : vector<8xf32> to vector<8x1xf32>
    %657 = tpu.reciprocal %656 {approx = true} : vector<8x1xf32> -> vector<8x1xf32>
    %658 = vector.broadcast %657 : vector<8x1xf32> to vector<8x8xf32>
    %659 = arith.mulf %654, %658 : vector<8x8xf32>
    %660 = vector.extract_strided_slice %596 {offsets = [0, 24], sizes = [8, 8], strides = [1, 1]} : vector<8x32xf32> to vector<8x8xf32>
    %cst_224 = arith.constant dense<0.000000e+00> : vector<8x8xf32>
    %661 = tpu.matmul %659, %660, %cst_224 {dimension_numbers = #tpu.dot_dimension_numbers<[1], [0], [0], [1], [0, 0, 1, 1], [], []>} : vector<8x8xf32>, vector<8x8xf32>, vector<8x8xf32> -> vector<8x8xf32>
    %662 = tpu.concatenate %613, %629, %645, %661 in 1 : vector<8x8xf32>, vector<8x8xf32>, vector<8x8xf32>, vector<8x8xf32> -> vector<8x32xf32>
    %663 = tpu.concatenate %594, %662 in 0 : vector<8x32xf32>, vector<8x32xf32> -> vector<16x32xf32>
    %c1_225 = arith.constant 1 : index
    %c0_226 = arith.constant 0 : index
    %c0_227 = arith.constant 0 : index
    %664 = vector.load %arg22[%c1_225, %c0_226, %c0_227] : memref<2x32x32xf32, #tpu.memory_space<vmem>>, vector<1x32x32xf32>
    %665 = vector.shape_cast %664 : vector<1x32x32xf32> to vector<32x32xf32>
    %cst_228 = arith.constant dense<0.000000e+00> : vector<16x32xf32>
    %666 = tpu.matmul %663, %665, %cst_228 {dimension_numbers = #tpu.dot_dimension_numbers<[1], [0], [0], [1], [0, 0, 1, 1], [], []>} : vector<16x32xf32>, vector<32x32xf32>, vector<16x32xf32> -> vector<16x32xf32>
    %667 = arith.addf %490, %666 : vector<16x32xf32>
    %c1_229 = arith.constant 1 : index
    %c0_230 = arith.constant 0 : index
    %c0_231 = arith.constant 0 : index
    %668 = vector.load %arg23[%c1_229, %c0_230, %c0_231] : memref<2x1x32xf32, #tpu.memory_space<vmem>>, vector<1x1x32xf32>
    %669 = vector.shape_cast %668 : vector<1x1x32xf32> to vector<1x32xf32>
    %670 = vector.broadcast %669 : vector<1x32xf32> to vector<16x32xf32>
    %671 = arith.addf %667, %670 : vector<16x32xf32>
    %c1_232 = arith.constant 1 : index
    %c0_233 = arith.constant 0 : index
    %c0_234 = arith.constant 0 : index
    %672 = vector.load %arg24[%c1_232, %c0_233, %c0_234] : memref<2x1x32xf32, #tpu.memory_space<vmem>>, vector<1x1x32xf32>
    %673 = vector.shape_cast %672 : vector<1x1x32xf32> to vector<1x32xf32>
    %c1_235 = arith.constant 1 : index
    %c0_236 = arith.constant 0 : index
    %c0_237 = arith.constant 0 : index
    %674 = vector.load %arg25[%c1_235, %c0_236, %c0_237] : memref<2x1x32xf32, #tpu.memory_space<vmem>>, vector<1x1x32xf32>
    %675 = vector.shape_cast %674 : vector<1x1x32xf32> to vector<1x32xf32>
    %c1_238 = arith.constant 1 : index
    %c0_239 = arith.constant 0 : index
    %c0_240 = arith.constant 0 : index
    %676 = vector.load %arg26[%c1_238, %c0_239, %c0_240] : memref<2x32x256xf32, #tpu.memory_space<vmem>>, vector<1x32x256xf32>
    %677 = vector.shape_cast %676 : vector<1x32x256xf32> to vector<32x256xf32>
    %c1_241 = arith.constant 1 : index
    %c0_242 = arith.constant 0 : index
    %c0_243 = arith.constant 0 : index
    %678 = vector.load %arg27[%c1_241, %c0_242, %c0_243] : memref<2x1x256xf32, #tpu.memory_space<vmem>>, vector<1x1x256xf32>
    %679 = vector.shape_cast %678 : vector<1x1x256xf32> to vector<1x256xf32>
    %c1_244 = arith.constant 1 : index
    %c0_245 = arith.constant 0 : index
    %c0_246 = arith.constant 0 : index
    %680 = vector.load %arg28[%c1_244, %c0_245, %c0_246] : memref<2x128x32xf32, #tpu.memory_space<vmem>>, vector<1x128x32xf32>
    %681 = vector.shape_cast %680 : vector<1x128x32xf32> to vector<128x32xf32>
    %c1_247 = arith.constant 1 : index
    %c0_248 = arith.constant 0 : index
    %c0_249 = arith.constant 0 : index
    %682 = vector.load %arg29[%c1_247, %c0_248, %c0_249] : memref<2x1x32xf32, #tpu.memory_space<vmem>>, vector<1x1x32xf32>
    %683 = vector.shape_cast %682 : vector<1x1x32xf32> to vector<1x32xf32>
    %cst_250 = arith.constant dense<0.000000e+00> : vector<16xf32>
    %684 = vector.multi_reduction <add>, %671, %cst_250 [1] : vector<16x32xf32> to vector<16xf32>
    %685 = vector.shape_cast %684 : vector<16xf32> to vector<16x1xf32>
    %cst_251 = arith.constant 3.200000e+01 : f32
    %686 = vector.broadcast %cst_251 : f32 to vector<16x1xf32>
    %687 = arith.divf %685, %686 : vector<16x1xf32>
    %688 = vector.broadcast %687 : vector<16x1xf32> to vector<16x32xf32>
    %689 = arith.subf %671, %688 : vector<16x32xf32>
    %690 = arith.mulf %689, %689 : vector<16x32xf32>
    %cst_252 = arith.constant dense<0.000000e+00> : vector<16xf32>
    %691 = vector.multi_reduction <add>, %690, %cst_252 [1] : vector<16x32xf32> to vector<16xf32>
    %692 = vector.shape_cast %691 : vector<16xf32> to vector<16x1xf32>
    %cst_253 = arith.constant 3.200000e+01 : f32
    %693 = vector.broadcast %cst_253 : f32 to vector<16x1xf32>
    %694 = arith.divf %692, %693 : vector<16x1xf32>
    %695 = vector.broadcast %687 : vector<16x1xf32> to vector<16x32xf32>
    %696 = arith.subf %671, %695 : vector<16x32xf32>
    %cst_254 = arith.constant 9.99999974E-6 : f32
    %697 = vector.broadcast %cst_254 : f32 to vector<16x1xf32>
    %698 = arith.addf %694, %697 : vector<16x1xf32>
    %699 = math.rsqrt %698 : vector<16x1xf32>
    %700 = vector.broadcast %699 : vector<16x1xf32> to vector<16x32xf32>
    %701 = arith.mulf %696, %700 : vector<16x32xf32>
    %702 = vector.broadcast %673 : vector<1x32xf32> to vector<16x32xf32>
    %703 = arith.mulf %701, %702 : vector<16x32xf32>
    %704 = vector.broadcast %675 : vector<1x32xf32> to vector<16x32xf32>
    %705 = arith.addf %703, %704 : vector<16x32xf32>
    %cst_255 = arith.constant dense<0.000000e+00> : vector<16x256xf32>
    %706 = tpu.matmul %705, %677, %cst_255 {dimension_numbers = #tpu.dot_dimension_numbers<[1], [0], [0], [1], [0, 0, 1, 1], [], []>} : vector<16x32xf32>, vector<32x256xf32>, vector<16x256xf32> -> vector<16x256xf32>
    %707 = vector.broadcast %679 : vector<1x256xf32> to vector<16x256xf32>
    %708 = arith.addf %706, %707 : vector<16x256xf32>
    %709 = vector.extract_strided_slice %708 {offsets = [0, 0], sizes = [16, 128], strides = [1, 1]} : vector<16x256xf32> to vector<16x128xf32>
    %710 = vector.extract_strided_slice %708 {offsets = [0, 128], sizes = [16, 128], strides = [1, 1]} : vector<16x256xf32> to vector<16x128xf32>
    %cst_256 = arith.constant 5.000000e-01 : f32
    %711 = vector.broadcast %cst_256 : f32 to vector<16x128xf32>
    %712 = arith.mulf %711, %710 : vector<16x128xf32>
    %cst_257 = arith.constant 4.471500e-02 : f32
    %713 = vector.broadcast %cst_257 : f32 to vector<16x128xf32>
    %714 = arith.mulf %713, %710 : vector<16x128xf32>
    %715 = arith.mulf %714, %710 : vector<16x128xf32>
    %716 = arith.mulf %715, %710 : vector<16x128xf32>
    %717 = arith.addf %710, %716 : vector<16x128xf32>
    %cst_258 = arith.constant 0.797884583 : f32
    %718 = vector.broadcast %cst_258 : f32 to vector<16x128xf32>
    %719 = arith.mulf %718, %717 : vector<16x128xf32>
    %720 = math.tanh %719 : vector<16x128xf32>
    %cst_259 = arith.constant 1.000000e+00 : f32
    %721 = vector.broadcast %cst_259 : f32 to vector<16x128xf32>
    %722 = arith.addf %721, %720 : vector<16x128xf32>
    %723 = arith.mulf %712, %722 : vector<16x128xf32>
    %724 = arith.mulf %709, %723 : vector<16x128xf32>
    %cst_260 = arith.constant dense<0.000000e+00> : vector<16x32xf32>
    %725 = tpu.matmul %724, %681, %cst_260 {dimension_numbers = #tpu.dot_dimension_numbers<[1], [0], [0], [1], [0, 0, 1, 1], [], []>} : vector<16x128xf32>, vector<128x32xf32>, vector<16x32xf32> -> vector<16x32xf32>
    %726 = vector.broadcast %683 : vector<1x32xf32> to vector<16x32xf32>
    %727 = arith.addf %725, %726 : vector<16x32xf32>
    %728 = arith.addf %671, %727 : vector<16x32xf32>
    %c0_261 = arith.constant 0 : index
    %c0_262 = arith.constant 0 : index
    %729 = vector.load %arg30[%c0_261, %c0_262] : memref<16x32xf32, #tpu.memory_space<vmem>>, vector<16x32xf32>
    tpu.vector_store %arg30[%c0_261, %c0_262], %728 {strides = array<i32>} : memref<16x32xf32, #tpu.memory_space<vmem>>, vector<16x32xf32>,
    return
  }
}

</mosaic_0001>

<bundles_post_ra>
// kernel: prompt_translator_forward.1
= control target key start
LH: loop header
LB: loop body
LE: loop exit
PB: predicated region body
PF: predicated region fallthrough
CT: control target
= control target key end

     0   :  { %s7259_s6 = smov 1   ;;  %s7260_s10 = smov 2   ;;  %s8223_s0 = inlined_call_operand.smem [shape: u32[31], index: -1, kind: input, shape index: {}] }
   0x1   :  { %s7329_s5 = sld [smem:[%s8223_s0]]   ;;  %s7261_s14 = smov 3  }
   0x2   :  { %s7334_s9 = sld [smem:[%s8223_s0 + %s7259_s6]]   ;;  %s7262_s18 = smov 4  }
   0x3   :  { %s7339_s13 = sld [smem:[%s8223_s0 + %s7260_s10]]   ;;  %s7263_s22 = smov 5  }
   0x4   :  { %s7344_s17 = sld [smem:[%s8223_s0 + %s7261_s14]]   ;;  %s7264_s26 = smov 6  }
   0x5   :  { %s7349_s21 = sld [smem:[%s8223_s0 + %s7262_s18]]   ;;  %s7265_s30 = smov 7  }
   0x6   :  { %s7354_s25 = sld [smem:[%s8223_s0 + %s7263_s22]]   ;;  %s7266_s4 = smov 8  }
   0x7   :  { %s7359_s29 = sld [smem:[%s8223_s0 + %s7264_s26]]   ;;  %s7267_s10 = smov 9  }
   0x8   :  { %s7364_s3 = sld [smem:[%s8223_s0 + %s7265_s30]]   ;;  %s7268_s15 = smov 10  }
   0x9   :  { %s7369_s8 = sld [smem:[%s8223_s0 + %s7266_s4]]   ;;  %s7269_s20 = smov 11  }
   0xa   :  { %s7374_s14 = sld [smem:[%s8223_s0 + %s7267_s10]]   ;;  %s7270_s26 = smov 12  }
   0xb   :  { %s7379_s19 = sld [smem:[%s8223_s0 + %s7268_s15]]   ;;  %s7271_s1 = smov 13  }
   0xc   :  { %s7384_s24 = sld [smem:[%s8223_s0 + %s7269_s20]]   ;;  %s7272_s7 = smov 14  }
   0xd   :  { %8237 = sst [smem:[#allocation32_spill]] %s7359_s29  ;;  %s7273_s15 = smov 15  }
   0xe   :  { %s7389_s30 = sld [smem:[%s8223_s0 + %s7270_s26]]   ;;  %s7274_s22 = smov 16  }
   0xf   :  { %8238 = sst [smem:[#allocation33_spill]] %s7369_s8  ;;  %s7275_s28 = smov 17  }
  0x10   :  { %s7394_s6 = sld [smem:[%s8223_s0 + %s7271_s1]]  }
  0x11   :  { %8239 = sst [smem:[#allocation34_spill]] %s7379_s19 }
  0x12   :  { %s7399_s12 = sld [smem:[%s8223_s0 + %s7272_s7]]   ;;  %s7276_s7 = smov 18  }
  0x13   :  { %s7404_s20 = sld [smem:[%s8223_s0 + %s7273_s15]]   ;;  %s7277_s15 = smov 19  }
  0x14   :  { %s7409_s27 = sld [smem:[%s8223_s0 + %s7274_s22]]   ;;  %s7278_s22 = smov 20  }
  0x15   :  { %s7414_s4 = sld [smem:[%s8223_s0 + %s7275_s28]]   ;;  %s7279_s28 = smov 21  }
  0x16   :  { %s7424_s19 = sld [smem:[%s8223_s0 + %s7277_s15]]   ;;  %s7281_s15 = smov 23  }
  0x17   :  { %s7434_s8 = sld [smem:[%s8223_s0 + %s7279_s28]]   ;;  %s7283_s28 = smov 25  }
  0x18   :  { %8240 = sst [smem:[#allocation35_spill]] %s7399_s12 }
  0x19   :  { %s7419_s12 = sld [smem:[%s8223_s0 + %s7276_s7]]   ;;  %s7280_s7 = smov 22  }
  0x1a   :  { %8241 = sst [smem:[#allocation36_spill]] %s7409_s27 }
  0x1b   :  { %s7429_s27 = sld [smem:[%s8223_s0 + %s7278_s22]]   ;;  %s7282_s22 = smov 24  }
  0x1c   :  { %8243 = sst [smem:[#allocation38_spill]] %s7424_s19 }
  0x1d   :  { %8245 = sst [smem:[#allocation40_spill]] %s7434_s8 }
  0x1e   :  { %s7444_s19 = sld [smem:[%s8223_s0 + %s7281_s15]]   ;;  %s7285_s15 = smov 27  }
  0x1f   :  { %8242 = sst [smem:[#allocation37_spill]] %s7419_s12 }
  0x20   :  { %s7439_s12 = sld [smem:[%s8223_s0 + %s7280_s7]]   ;;  %s7284_s7 = smov 26  }
  0x21   :  { %8244 = sst [smem:[#allocation39_spill]] %s7429_s27 }
  0x22   :  { %s7449_s27 = sld [smem:[%s8223_s0 + %s7282_s22]]   ;;  %s7286_s22 = smov 28  }
  0x23   :  { %s7454_s8 = sld [smem:[%s8223_s0 + %s7283_s28]]   ;;  %s7287_s28 = smov 29  }
  0x24   :  { %s7464_s29 = sld [smem:[%s8223_s0 + %s7285_s15]]  }
  0x26   :  { %8246 = sst [smem:[#allocation41_spill]] %s7439_s12 }
  0x27   :  { %s7459_s12 = sld [smem:[%s8223_s0 + %s7284_s7]]   ;;  %s7288_s7 = smov 30  }
  0x28   :  { %8247 = sst [smem:[#allocation42_spill]] %s7449_s27 }
  0x29   :  { %8248 = sst [smem:[#allocation43_spill]] %s7454_s8 }
  0x2a   :  { %s7469_s27 = sld [smem:[%s8223_s0 + %s7286_s22]]  }
  0x2b   :  { %s7474_s8 = sld [smem:[%s8223_s0 + %s7287_s28]]  }
  0x2d   :  { %8249 = sst [smem:[#allocation44_spill]] %s7459_s12 }
  0x2e   :  { %s7479_s12 = sld [smem:[%s8223_s0 + %s7288_s7]]  }
  0x2f   :  { %66 = vsyncpa [#allocation3], 0 }
  0x30   :  { %67 = vsyncpa [#allocation5], 0 }
  0x31   :  { %68 = vsyncpa [#allocation8], 0 }
  0x32   :  { %69 = vsyncpa [#allocation11], 0 }
  0x33   :  { %70 = vsyncpa [#allocation14], 0 }
  0x34   :  { %71 = vsyncpa [#allocation17], 0 }
  0x35   :  { %72 = vsyncpa [#allocation20], 0 }
  0x36   :  { %73 = vsyncpa [#allocation23], 0  ;;  %s7289_s15 = smov [#allocation4]   ;;  %s7290_s18 = smov [#allocation7]  }
  0x37   :  { %s94_s16 = sshll.u32 %s7289_s15, 4  ;;  %s114_s22 = sshll.u32 %s7290_s18, 4  ;;  %s95_s16 = int_to_ptr.vmem [resolvable:$true] %s94_s16  ;;  %s115_s22 = int_to_ptr.vmem [resolvable:$true] %s114_s22 }
  0x38   :  { %s6971_s23 = scalar_lea.vmem %s95_s16, 16  ;;  %s6975_s26 = scalar_lea.vmem %s95_s16, 32 }
  0x39   :  { %p6972_p0 = scmp.ne.s32.totalorder %s95_s16, %s6971_s23  ;;  %p6976_p1 = scmp.lt.s32.totalorder %s95_s16, %s95_s16 }
  0x3a   :  { %p6977_p2 = scmp.lt.s32.totalorder %s6975_s26, %s6971_s23 }
  0x3c   :  { %p6978_p3 = por %p6977_p2, %p6976_p1 }
  0x3e   :  { %p6979_p4 = pnand %p6978_p3, %p6972_p0 }
  0x40   :  { %6982 = shalt.err (!%p6979_p4)
}
  0x41   :  { %97 = dma.hbm_to_vmem [thread:$0]  %s7339_s13, 16, %s95_s16, [#allocation5]  }
  0x42   :  { %s6991_s0 = scalar_lea.vmem %s115_s22, 16  ;;  %s6995_s28 = scalar_lea.vmem %s115_s22, 32 }
  0x43   :  { %p6992_p5 = scmp.ne.s32.totalorder %s115_s22, %s6991_s0  ;;  %p6996_p6 = scmp.lt.s32.totalorder %s115_s22, %s115_s22 }
  0x44   :  { %p6997_p7 = scmp.lt.s32.totalorder %s6995_s28, %s6991_s0 }
  0x46   :  { %p6998_p8 = por %p6997_p7, %p6996_p6 }
  0x48   :  { %p6999_p9 = pnand %p6998_p8, %p6992_p5 }
  0x4a   :  { %7002 = shalt.err (!%p6999_p9)
}
  0x4b   :  { %117 = dma.hbm_to_vmem [thread:$0]  %s7349_s21, 16, %s115_s22, [#allocation8]  }
  0x4c   :  { %s7291_s1 = smov [#allocation10]   ;;  %s7292_s7 = smov [#allocation13]  }
  0x4d   :  { %s136_s2 = sshll.u32 %s7291_s1, 4  ;;  %s160_s10 = sshll.u32 %s7292_s7, 4  ;;  %s137_s2 = int_to_ptr.vmem [resolvable:$true] %s136_s2  ;;  %s161_s10 = int_to_ptr.vmem [resolvable:$true] %s160_s10 }
  0x4e   :  { %s7011_s11 = scalar_lea.vmem %s137_s2, 16  ;;  %s7015_s15 = scalar_lea.vmem %s137_s2, 32 }
  0x4f   :  { %p7012_p10 = scmp.ne.s32.totalorder %s137_s2, %s7011_s11  ;;  %p7016_p11 = scmp.lt.s32.totalorder %s137_s2, %s137_s2 }
  0x50   :  { %p7017_p12 = scmp.lt.s32.totalorder %s7015_s15, %s7011_s11 }
  0x52   :  { %p7018_p13 = por %p7017_p12, %p7016_p11 }
  0x54   :  { %p7019_p0 = pnand %p7018_p13, %p7012_p10 }
  0x56   :  { %7022 = shalt.err (!%p7019_p0)
}
  0x57   :  { %139 = dma.hbm_to_vmem [thread:$0]  %s7364_s3, 16, %s137_s2, [#allocation11]  }
  0x58   :  { %s7031_s13 = scalar_lea.vmem %s161_s10, 16  ;;  %s7035_s16 = scalar_lea.vmem %s161_s10, 32 }
  0x59   :  { %p7032_p1 = scmp.ne.s32.totalorder %s161_s10, %s7031_s13  ;;  %p7036_p2 = scmp.lt.s32.totalorder %s161_s10, %s161_s10 }
  0x5a   :  { %p7037_p3 = scmp.lt.s32.totalorder %s7035_s16, %s7031_s13 }
  0x5c   :  { %p7038_p4 = por %p7037_p3, %p7036_p2 }
  0x5e   :  { %p7039_p5 = pnand %p7038_p4, %p7032_p1 }
  0x60   :  { %7042 = shalt.err (!%p7039_p5)
}
  0x61   :  { %163 = dma.hbm_to_vmem [thread:$0]  %s7384_s24, 16, %s161_s10, [#allocation14]  }
  0x62   :  { %s7293_s21 = smov [#allocation16]   ;;  %s7294_s22 = smov [#allocation19]  }
  0x63   :  { %s180_s18 = sshll.u32 %s7293_s21, 4  ;;  %s204_s23 = sshll.u32 %s7294_s22, 4  ;;  %s181_s18 = int_to_ptr.vmem [resolvable:$true] %s180_s18  ;;  %s205_s23 = int_to_ptr.vmem [resolvable:$true] %s204_s23 }
  0x64   :  { %s7051_s26 = scalar_lea.vmem %s181_s18, 16  ;;  %s7055_s0 = scalar_lea.vmem %s181_s18, 32 }
  0x65   :  { %p7052_p6 = scmp.ne.s32.totalorder %s181_s18, %s7051_s26  ;;  %p7056_p7 = scmp.lt.s32.totalorder %s181_s18, %s181_s18 }
  0x66   :  { %p7057_p8 = scmp.lt.s32.totalorder %s7055_s0, %s7051_s26 }
  0x68   :  { %p7058_p9 = por %p7057_p8, %p7056_p7 }
  0x6a   :  { %p7059_p10 = pnand %p7058_p9, %p7052_p6 }
  0x6c   :  { %7062 = shalt.err (!%p7059_p10)
}
  0x6d   :  { %183 = dma.hbm_to_vmem [thread:$0]  %s7394_s6, 16, %s181_s18, [#allocation17]  }
  0x6e   :  { %s7071_s3 = scalar_lea.vmem %s205_s23, 16  ;;  %s7075_s28 = scalar_lea.vmem %s205_s23, 32 }
  0x6f   :  { %p7072_p11 = scmp.ne.s32.totalorder %s205_s23, %s7071_s3  ;;  %p7076_p12 = scmp.lt.s32.totalorder %s205_s23, %s205_s23 }
  0x70   :  { %p7077_p13 = scmp.lt.s32.totalorder %s7075_s28, %s7071_s3 }
  0x72   :  { %p7078_p0 = por %p7077_p13, %p7076_p12 }
  0x74   :  { %p7079_p1 = pnand %p7078_p0, %p7072_p11 }
  0x76   :  { %7082 = shalt.err (!%p7079_p1)
}
  0x77   :  { %207 = dma.hbm_to_vmem [thread:$0]  %s7414_s4, 16, %s205_s23, [#allocation20]  }
  0x78   :  { %s7295_s24 = smov [#allocation2]  }
  0x79   :  { %s79_s1 = sshll.u32 %s7295_s24, 4  ;;  %s80_s1 = int_to_ptr.vmem [resolvable:$true] %s79_s1 }
  0x7a   :  { %s7091_s2 = scalar_lea.vmem %s80_s1, 256  ;;  %p7096_p3 = scmp.lt.s32.totalorder %s80_s1, %s80_s1 }
  0x7b   :  { %p7092_p2 = scmp.ne.s32.totalorder %s80_s1, %s7091_s2  ;;  %p7097_p4 = scmp.lt.s32.totalorder %s7091_s2, %s7091_s2 }
  0x7d   :  { %p7098_p5 = por %p7097_p4, %p7096_p3 }
  0x7f   :  { %p7099_p6 = pnand %p7098_p5, %p7092_p2 }
  0x81   :  { %7102 = shalt.err (!%p7099_p6)
}
  0x82   :  { %s7296_s6 = smov 128   ;;  %s7297_s7 = smov 8  }
  0x83   :  { %85 = dma.hbm_to_vmem [thread:$0]  %s7329_s5, 256, %s80_s1, [#allocation3], %s7296_s6, %s7296_s6, %s7297_s7  }
  0x84   :  { %s7298_s10 = smov [#allocation6]   ;;  %s7299_s15 = smov [#allocation9]  }
  0x85   :  { %s104_s11 = sshll.u32 %s7298_s10, 4  ;;  %s124_s4 = sshll.u32 %s7299_s15, 4  ;;  %s105_s11 = int_to_ptr.vmem [resolvable:$true] %s104_s11  ;;  %s125_s4 = int_to_ptr.vmem [resolvable:$true] %s124_s4 }
  0x86   :  { %s7111_s13 = scalar_lea.vmem %s105_s11, 16  ;;  %s7115_s16 = scalar_lea.vmem %s105_s11, 32 }
  0x87   :  { %p7112_p7 = scmp.ne.s32.totalorder %s105_s11, %s7111_s13  ;;  %p7116_p8 = scmp.lt.s32.totalorder %s105_s11, %s105_s11 }
  0x88   :  { %p7117_p9 = scmp.lt.s32.totalorder %s7115_s16, %s7111_s13 }
  0x8a   :  { %p7118_p10 = por %p7117_p9, %p7116_p8 }
  0x8c   :  { %p7119_p11 = pnand %p7118_p10, %p7112_p7 }
  0x8e   :  { %7122 = shalt.err (!%p7119_p11)
}
  0x8f   :  { %107 = dma.hbm_to_vmem [thread:$0]  %s7344_s17, 16, %s105_s11, [#allocation5]  }
  0x90   :  { %s7131_s21 = scalar_lea.vmem %s125_s4, 16  ;;  %s7135_s18 = scalar_lea.vmem %s125_s4, 32 }
  0x91   :  { %p7132_p12 = scmp.ne.s32.totalorder %s125_s4, %s7131_s21  ;;  %p7136_p13 = scmp.lt.s32.totalorder %s125_s4, %s125_s4 }
  0x92   :  { %p7137_p0 = scmp.lt.s32.totalorder %s7135_s18, %s7131_s21 }
  0x94   :  { %p7138_p1 = por %p7137_p0, %p7136_p13 }
  0x96   :  { %p7139_p2 = pnand %p7138_p1, %p7132_p12 }
  0x98   :  { %7142 = shalt.err (!%p7139_p2)
}
  0x99   :  { %127 = dma.hbm_to_vmem [thread:$0]  %s7354_s25, 16, %s125_s4, [#allocation8]  }
  0x9a   :  { %s7300_s5 = smov [#allocation12]   ;;  %s7301_s23 = smov [#allocation15]  }
  0x9b   :  { %s148_s22 = sshll.u32 %s7300_s5, 4  ;;  %s170_s26 = sshll.u32 %s7301_s23, 4  ;;  %s149_s22 = int_to_ptr.vmem [resolvable:$true] %s148_s22  ;;  %s171_s26 = int_to_ptr.vmem [resolvable:$true] %s170_s26 }
  0x9c   :  { %s7151_s0 = scalar_lea.vmem %s149_s22, 16  ;;  %s7155_s3 = scalar_lea.vmem %s149_s22, 32 }
  0x9d   :  { %p7152_p3 = scmp.ne.s32.totalorder %s149_s22, %s7151_s0  ;;  %p7156_p4 = scmp.lt.s32.totalorder %s149_s22, %s149_s22 }
  0x9e   :  { %p7157_p5 = scmp.lt.s32.totalorder %s7155_s3, %s7151_s0 }
  0xa0   :  { %p7158_p6 = por %p7157_p5, %p7156_p4 }
  0xa2   :  { %p7159_p7 = pnand %p7158_p6, %p7152_p3 }
  0xa4   :  { %7162 = shalt.err (!%p7159_p7)
}
  0xa5   :  { %151 = dma.hbm_to_vmem [thread:$0]  %s7374_s14, 16, %s149_s22, [#allocation11]  }
  0xa6   :  { %s7171_s17 = scalar_lea.vmem %s171_s26, 16  ;;  %s7175_s28 = scalar_lea.vmem %s171_s26, 32 }
  0xa7   :  { %p7172_p8 = scmp.ne.s32.totalorder %s171_s26, %s7171_s17  ;;  %p7176_p9 = scmp.lt.s32.totalorder %s171_s26, %s171_s26 }
  0xa8   :  { %p7177_p10 = scmp.lt.s32.totalorder %s7175_s28, %s7171_s17 }
  0xaa   :  { %p7178_p11 = por %p7177_p10, %p7176_p9 }
  0xac   :  { %p7179_p12 = pnand %p7178_p11, %p7172_p8 }
  0xae   :  { %7182 = shalt.err (!%p7179_p12)
}
  0xaf   :  { %173 = dma.hbm_to_vmem [thread:$0]  %s7389_s30, 16, %s171_s26, [#allocation14]  }
  0xb0   :  { %s7302_s25 = smov [#allocation18]   ;;  %s7303_s1 = smov [#allocation21]  }
  0xb1   :  { %s192_s24 = sshll.u32 %s7302_s25, 4  ;;  %s223_s2 = sshll.u32 %s7303_s1, 4  ;;  %s193_s24 = int_to_ptr.vmem [resolvable:$true] %s192_s24  ;;  %s224_s2 = int_to_ptr.vmem [resolvable:$true] %s223_s2 }
  0xb2   :  { %s7191_s6 = scalar_lea.vmem %s193_s24, 32  ;;  %p7196_p0 = scmp.lt.s32.totalorder %s193_s24, %s193_s24 }
  0xb3   :  { %p7192_p13 = scmp.ne.s32.totalorder %s193_s24, %s7191_s6  ;;  %p7197_p1 = scmp.lt.s32.totalorder %s7191_s6, %s7191_s6 }
  0xb5   :  { %p7198_p2 = por %p7197_p1, %p7196_p0 }
  0xb7   :  { %p7199_p3 = pnand %p7198_p2, %p7192_p13 }
  0xb9   :  { %7202 = shalt.err (!%p7199_p3)
}
  0xba   :  { %195 = dma.hbm_to_vmem [thread:$0]  %s7404_s20, 32, %s193_s24, [#allocation17]  }
  0xbb   :  { %s7211_s14 = scalar_lea.vmem %s224_s2, 32  ;;  %p7216_p5 = scmp.lt.s32.totalorder %s224_s2, %s224_s2 }
  0xbc   :  { %p7212_p4 = scmp.ne.s32.totalorder %s224_s2, %s7211_s14  ;;  %p7217_p6 = scmp.lt.s32.totalorder %s7211_s14, %s7211_s14 }
  0xbe   :  { %p7218_p7 = por %p7217_p6, %p7216_p5 }
  0xc0   :  { %p7219_p8 = pnand %p7218_p7, %p7212_p4 }
  0xc2   :  { %7222 = shalt.err (!%p7219_p8)
}
  0xc3   :  { %s7304_s30 = smov 16   ;;  %s7305_s10 = smov 1  }
  0xc4   :  { %229 = dma.hbm_to_vmem [thread:$0]  %s7444_s19, 32, %s224_s2, [#allocation20], %s7304_s30, %s7304_s30, %s7305_s10  }
  0xc5   :  { %s7306_s11 = smov [#allocation22]  }
  0xc6   :  { %s245_s15 = sshll.u32 %s7306_s11, 4  ;;  %s246_s15 = int_to_ptr.vmem [resolvable:$true] %s245_s15 }
  0xc7   :  { %s7231_s4 = scalar_lea.vmem %s246_s15, 32  ;;  %p7236_p10 = scmp.lt.s32.totalorder %s246_s15, %s246_s15 }
  0xc8   :  { %p7232_p9 = scmp.ne.s32.totalorder %s246_s15, %s7231_s4  ;;  %p7237_p11 = scmp.lt.s32.totalorder %s7231_s4, %s7231_s4 }
  0xca   :  { %p7238_p12 = por %p7237_p11, %p7236_p10 }
  0xcc   :  { %p7239_p13 = pnand %p7238_p12, %p7232_p9 }
  0xce   :  { %7242 = shalt.err (!%p7239_p13)
}
  0xcf   :  { %251 = dma.hbm_to_vmem [thread:$0]  %s7474_s8, 32, %s246_s15, [#allocation23], %s7304_s30, %s7304_s30, %s7305_s10  }
  0xd0   :  { %7243 = dma.done.wait [#allocation3], 256  }
  0xd1   :  { %7244 = vsyncadd [#allocation3], 4294967040 }
  0xd2   :  { %7245 = dma.done.wait [#allocation5], 32  }
  0xd3   :  { %7246 = vsyncadd [#allocation5], 4294967264 }
  0xd4   :  { %7247 = dma.done.wait [#allocation8], 32  }
  0xd5   :  { %7248 = vsyncadd [#allocation8], 4294967264 }
  0xd6   :  { %7249 = dma.done.wait [#allocation11], 32  }
  0xd7   :  { %7250 = vsyncadd [#allocation11], 4294967264 }
  0xd8   :  { %7251 = dma.done.wait [#allocation14], 32  }
  0xd9   :  { %7252 = vsyncadd [#allocation14], 4294967264 }
  0xda   :  { %7253 = dma.done.wait [#allocation17], 48  }
  0xdb   :  { %7254 = vsyncadd [#allocation17], 4294967248 }
  0xdc   :  { %7255 = dma.done.wait [#allocation20], 48  }
  0xdd   :  { %7256 = vsyncadd [#allocation20], 4294967248 }
  0xde   :  { %7257 = dma.done.wait [#allocation23], 32  }
  0xdf   :  { %7258 = vsyncadd [#allocation23], 4294967264  ;;  %vm297_vm0 = vcmask 261120   ;;  %vm330_vm1 = vcmask 392192   ;;  %v294_v0 = vld [vmem:[%s7334_s9] sm:$0xff]  ;;  %v327_v1 = vld [vmem:[#allocation2 + $0x8] sm:$0xff] }
  0xe0   :  { %v326_v2 = vld [vmem:[#allocation2] sm:$0xff]  ;;  %v298_v3 = vsel %vm297_vm0, %v294_v0, 0.0  ;;  %v334_v4 = vsel %vm330_vm1, %v327_v1, 0.0  ;;  %s8250_s8 = sld [smem:[#allocation32_spill]]  ;;  %v7307_v22 = vmov 0.0   ;;  %vm7308_vm2 = vmmov 0  }
  0xe1   :  { %299 = vadd.xlane.f32.xlu0 %v298_v3  ;;  %335 = vadd.xlane.f32.xlu1 %v334_v4  ;;  %v331_v5 = vsel %vm330_vm1, %v326_v2, 0.0  ;;  %s8251_s9 = sld [smem:[#allocation33_spill]]  ;;  %v5995_v37 = vld [vmem:[#allocation4] ss:$0 sm:$0xff]  ;;  %v5996_v39 = vld [vmem:[#allocation6] ss:$0 sm:$0xff] }
  0xe2   :  { %6341 = vmatprep.subr.mxu0 %v7307_v22  ;;  %6349 = vmatprep.mubr.msk.f32.mxu0 %vm7308_vm2, %v7307_v22  ;;  %v5997_v43 = vld [vmem:[#allocation7] ss:$0 sm:$0xff]  ;;  %v5998_v47 = vld [vmem:[#allocation9] ss:$0 sm:$0xff]  ;;  %v5999_v57 = vld [vmem:[#allocation10] ss:$0 sm:$0xff] }
  0xe3   :  { %6377 = vmatprep.subr.mxu1 %v7307_v22  ;;  %6379 = vmatprep.mubr.msk.f32.mxu1 %vm7308_vm2, %v7307_v22  ;;  %s7309_s19 = smov 120   ;;  %v6001_v62 = vld [vmem:[#allocation12] ss:$0 sm:$0xff]  ;;  %vm552_vm3 = vcmask 64512   ;;  %s7310_s20 = smov 112   ;;  %vm1224_vm4 = vcmask 130048  }
  0xe4   :  { %s7311_s13 = smov 104   ;;  %s7312_s16 = smov 88   ;;  %vm1226_vm5 = vcmask 195584  }
  0xe5   :  { %332 = vadd.xlane.f32.xlu0 %v331_v5  ;;  %s7313_s21 = smov 80   ;;  %s7314_s18 = smov 96  }
  0xe6   :  { %v377_v21 = vld [vmem:[%s8250_s8 + $0x18] sm:$0xff]  ;;  %v376_v23 = vld [vmem:[%s8250_s8 + $0x10] sm:$0xff]  ;;  %v375_v24 = vld [vmem:[%s8250_s8 + $0x8] sm:$0xff]  ;;  %s7315_s5 = smov 72   ;;  %s8252_s22 = sld [smem:[#allocation34_spill]] }
  0xe7   :  { %6342 = vmatpush3.msra.mxu0 %v377_v21  ;;  %v374_v25 = vld [vmem:[%s8250_s8] sm:$0xff]  ;;  %v463_v26 = vld [vmem:[%s8251_s9 + $0x28] sm:$0xff]  ;;  %v461_v48 = vld [vmem:[%s8251_s9 + $0x18] sm:$0xff]  ;;  %s7316_s23 = smov 24   ;;  %s8253_s26 = sld [smem:[#allocation35_spill]] }
  0xe8   :  { %6343 = vmatprep.subr.mxu0 %v7307_v22  ;;  %v462_v45 = vld [vmem:[%s8251_s9 + $0x20] sm:$0xff]  ;;  %v460_v52 = vld [vmem:[%s8251_s9 + $0x10] sm:$0xff]  ;;  %v459_v53 = vld [vmem:[%s8251_s9 + $0x8] sm:$0xff]  ;;  %s8254_s0 = sld [smem:[#allocation36_spill]]  ;;  %s7317_s24 = smov 64  }
  0xe9   :  { %6344 = vmatpush3.msra.mxu0 %v376_v23  ;;  %v458_v55 = vld [vmem:[%s8251_s9] sm:$0xff]  ;;  %s8255_s3 = sld [smem:[#allocation39_spill]]  ;;  %s7318_s1 = smov 56  }
  0xea   :  { %6345 = vmatprep.subr.mxu0 %v7307_v22  ;;  %s8256_s17 = sld [smem:[#allocation37_spill]]  ;;  %s7319_s2 = smov 48  }
  0xeb   :  { %6346 = vmatpush3.msra.mxu0 %v375_v24  ;;  %s8257_s28 = sld [smem:[#allocation38_spill]]  ;;  %s7320_s6 = smov 40  }
  0xec   :  { %6347 = vmatprep.subr.mxu0 %v7307_v22  ;;  %s8258_s25 = sld [smem:[#allocation40_spill]] }
  0xed   :  { %6348 = vmatpush3.msra.mxu0 %v374_v25  ;;  %s8259_s14 = sld [smem:[#allocation41_spill]] }
  0xee   :  { %6352 = vmatprep.subr.mxu0 %v463_v26  ;;  %s8260_s10 = sld [smem:[#allocation44_spill]] }
  0xef   :  { %s8261_s11 = sld [smem:[#allocation42_spill]] }
  0xf0   :  { %s8262_s15 = sld [smem:[#allocation43_spill]] }
 0x16a   :  { %v300_v6 = vpop.xlane.xlu0 %299  ;;  %v336_v7 = vpop.xlane.xlu1 %335 }
 0x16b   :  { %v302_v8 = vmul.f32 0.03125, %v300_v6  ;;  %v339_v9 = vmul.f32 0.020833334, %v336_v7 }
 0x16d   :  { %v303_v10 = vsub.f32 %v294_v0, %v302_v8  ;;  %v341_v11 = vsub.f32 %v327_v1, %v339_v9 }
 0x16e   :  { %v333_v12 = vpop.xlane.xlu0 %332 }
 0x16f   :  { %v338_v13 = vmul.f32 0.020833334, %v333_v12  ;;  %v304_v14 = vmul.f32 %v303_v10, %v303_v10  ;;  %v343_v15 = vmul.f32 %v341_v11, %v341_v11 }
 0x171   :  { %v340_v16 = vsub.f32 %v326_v2, %v338_v13  ;;  %v305_v17 = vsel %vm297_vm0, %v304_v14, 0.0  ;;  %v347_v18 = vsel %vm330_vm1, %v343_v15, 0.0 }
 0x172   :  { %306 = vadd.xlane.f32.xlu1 %v305_v17 }
 0x173   :  { %v342_v19 = vmul.f32 %v340_v16, %v340_v16 }
 0x175   :  { %v344_v20 = vsel %vm330_vm1, %v342_v19, 0.0 }
 0x176   :  { %348 = vadd.xlane.f32.xlu1 %v347_v18  ;;  %345 = vadd.xlane.f32.xlu0 %v344_v20 }
 0x1fb   :  { %v307_v27 = vpop.xlane.xlu1 %306 }
 0x1fc   :  { %v308_v28 = vmul.f32 0.03125, %v307_v27 }
 0x1fe   :  { %v309_v29 = vadd.f32 1e-05, %v308_v28 }
 0x1ff   :  { %v349_v30 = vpop.xlane.xlu1 %348  ;;  %v346_v31 = vpop.xlane.xlu0 %345 }
 0x200   :  { %6829 = vrsqrt.f32 %v309_v29  ;;  %v351_v32 = vmul.f32 0.020833334, %v349_v30  ;;  %v350_v33 = vmul.f32 0.020833334, %v346_v31 }
 0x202   :  { %v353_v34 = vadd.f32 1e-05, %v351_v32  ;;  %v352_v35 = vadd.f32 1e-05, %v350_v33 }
 0x204   :  { %6831 = vrsqrt.f32 %v352_v35 }
 0x205   :  { %6833 = vrsqrt.f32 %v353_v34 }
 0x20d   :  { %v6830_v36 = vpop.eup %6829 }
 0x20e   :  { %v311_v38 = vmul.f32 %v6830_v36, %v303_v10 }
 0x210   :  { %v318_v40 = vmul.f32 %v5995_v37, %v311_v38 }
 0x211   :  { %v6832_v41 = vpop.eup %6831 }
 0x212   :  { %v325_v42 = vadd.f32 %v5996_v39, %v318_v40  ;;  %v6834_v44 = vpop.eup %6833  ;;  %v356_v46 = vmul.f32 %v6832_v41, %v340_v16 }
 0x213   :  { %v357_v50 = vmul.f32 %v6834_v44, %v341_v11 }
 0x214   :  { %6350 = vmatmul.mubr.msk.f32.vlgmr.msra.gmra.mxu0 %vm297_vm0, %v325_v42  ;;  %v364_v49 = vmul.f32 %v5997_v43, %v356_v46 }
 0x215   :  { %6353 = vmatpush3.msra.mxu0 %v463_v26  ;;  %v365_v54 = vmul.f32 %v5997_v43, %v357_v50 }
 0x216   :  { %6354 = vmatprep.subr.mxu0 %v462_v45  ;;  %v372_v51 = vadd.f32 %v5998_v47, %v364_v49 }
 0x217   :  { %6355 = vmatpush3.msra.mxu0 %v462_v45  ;;  %v373_v56 = vadd.f32 %v5998_v47, %v365_v54 }
 0x218   :  { %6356 = vmatprep.subr.mxu0 %v461_v48  ;;  %6364 = vmatprep.mubr.msk.f32.mxu0 %vm330_vm1, %v372_v51 }
 0x219   :  { %6357 = vmatpush3.msra.mxu0 %v461_v48 }
 0x21a   :  { %6358 = vmatprep.subr.mxu0 %v460_v52 }
 0x21b   :  { %6359 = vmatpush3.msra.mxu0 %v460_v52 }
 0x21c   :  { %6360 = vmatprep.subr.mxu0 %v459_v53 }
 0x21d   :  { %6361 = vmatpush3.msra.mxu0 %v459_v53 }
 0x21e   :  { %6362 = vmatprep.subr.mxu0 %v458_v55 }
 0x21f   :  { %6363 = vmatpush3.msra.mxu0 %v458_v55 }
 0x220   :  { %6365 = vmatmul.mubr.msk.f32.vlgmr.msra.gmra.mxu0 %vm330_vm1, %v373_v56  ;;  %6367 = vmatprep.subr.mxu0 %v7307_v22 }
 0x221   :  { %6369 = vmatprep.mubr.msk.f32.mxu0 %vm7308_vm2, %v7307_v22 }
 0x2d4   :  { %v454_v58 = vpop.f32.mrf.mxu0 }
 0x2d5   :  { %v455_v59 = vadd.f32 %v5999_v57, %v454_v58 }
 0x2d6   :  { %v6351_v60 = vpop.f32.mrf.mxu0 }
 0x2d7   :  { %716 = vrot.lane.b32.xlu1 %v455_v59, %s7309_s19 }
 0x2e0   :  { %v6366_v61 = vpop.f32.mrf.mxu0 }
 0x2e1   :  { %v7548_v1 = vadd.f32 %v6366_v61, %v6001_v62 }
 0x2e2   :  { %v543_v63 = vpop.f32.mrf.mxu0 }
 0x2e3   :  { %v7533_v0 = vadd.f32 %v6001_v62, %v543_v63 }
 0x2e5   :  { %883 = vrot.lane.b32.xlu1 %v7533_v0, %s7310_s20  ;;  %718 = vrot.lane.b32.xlu0 %v7533_v0, %s7309_s19 }
 0x2e6   :  { %6368 = vmatpush3.xpose.msk.msra.mxu0 %vm552_vm3, %v7533_v0 }
 0x2e7   :  { %6372 = vmatprep.subr.mxu0 %v7307_v22 }
 0x2e9   :  { %6370 = vmatmul.mubr.msk.f32.vlgmr.msra.gmra.mxu0 %vm552_vm3, %v455_v59  ;;  %881 = vrot.lane.b32.xlu1 %v455_v59, %s7310_s20 }
 0x2ea   :  { %1048 = vrot.lane.b32.xlu0 %v7533_v0, %s7311_s13  ;;  %6374 = vmatprep.mubr.msk.f32.mxu0 %vm7308_vm2, %v7307_v22 }
 0x2ed   :  { %1046 = vrot.lane.b32.xlu1 %v455_v59, %s7311_s13 }
 0x2ee   :  { %1388 = vrot.lane.b32.xlu0 %v7548_v1, %s7309_s19 }
 0x2f1   :  { %1549 = vrot.lane.b32.xlu1 %v7548_v1, %s7310_s20 }
 0x2f2   :  { %1710 = vrot.lane.b32.xlu0 %v7548_v1, %s7311_s13 }
 0x349   :  { %v717_v2 = vpop.permute.xlu1 %716 }
 0x357   :  { %v884_v3 = vpop.permute.xlu1 %883  ;;  %v719_v4 = vpop.permute.xlu0 %718 }
 0x358   :  { %6378 = vmatpush3.xpose.msk.msra.mxu1 %vm552_vm3, %v719_v4 }
 0x359   :  { %6387 = vmatprep.subr.mxu1 %v7307_v22 }
 0x35b   :  { %6380 = vmatmul.mubr.msk.f32.vlgmr.msra.gmra.mxu1 %vm552_vm3, %v717_v2  ;;  %v882_v5 = vpop.permute.xlu1 %881 }
 0x35c   :  { %6388 = vmatpush3.xpose.msk.msra.mxu1 %vm552_vm3, %v884_v3  ;;  %6389 = vmatprep.mubr.msk.f32.mxu1 %vm7308_vm2, %v7307_v22  ;;  %v1049_v6 = vpop.permute.xlu0 %1048 }
 0x35d   :  { %6397 = vmatprep.subr.mxu1 %v7307_v22 }
 0x35f   :  { %6390 = vmatmul.mubr.msk.f32.vlgmr.msra.gmra.mxu1 %vm552_vm3, %v882_v5  ;;  %v1047_v7 = vpop.permute.xlu1 %1046 }
 0x360   :  { %6398 = vmatpush3.xpose.msk.msra.mxu1 %vm552_vm3, %v1049_v6  ;;  %6399 = vmatprep.mubr.msk.f32.mxu1 %vm7308_vm2, %v7307_v22  ;;  %v1389_v8 = vpop.permute.xlu0 %1388 }
 0x361   :  { %6407 = vmatprep.subr.mxu1 %v7307_v22 }
 0x363   :  { %6400 = vmatmul.mubr.msk.f32.vlgmr.msra.gmra.mxu1 %vm552_vm3, %v1047_v7  ;;  %v1550_v9 = vpop.permute.xlu1 %1549 }
 0x364   :  { %6408 = vmatpush3.xpose.msk.msra.mxu1 %vm552_vm3, %v7548_v1  ;;  %6409 = vmatprep.mubr.msk.f32.mxu1 %vm7308_vm2, %v7307_v22  ;;  %v1711_v10 = vpop.permute.xlu0 %1710 }
 0x365   :  { %6417 = vmatprep.subr.mxu1 %v7307_v22 }
 0x367   :  { %6410 = vmatmul.mubr.msk.f32.vlgmr.msra.gmra.mxu1 %vm552_vm3, %v455_v59 }
 0x368   :  { %6418 = vmatpush3.xpose.msk.msra.mxu1 %vm552_vm3, %v1389_v8  ;;  %6419 = vmatprep.mubr.msk.f32.mxu1 %vm7308_vm2, %v7307_v22 }
 0x369   :  { %6427 = vmatprep.subr.mxu1 %v7307_v22 }
 0x36b   :  { %6420 = vmatmul.mubr.msk.f32.vlgmr.msra.gmra.mxu1 %vm552_vm3, %v717_v2 }
 0x36c   :  { %6428 = vmatpush3.xpose.msk.msra.mxu1 %vm552_vm3, %v1550_v9  ;;  %6429 = vmatprep.mubr.msk.f32.mxu1 %vm7308_vm2, %v7307_v22 }
 0x36d   :  { %6437 = vmatprep.subr.mxu1 %v7307_v22 }
 0x36f   :  { %6430 = vmatmul.mubr.msk.f32.vlgmr.msra.gmra.mxu1 %vm552_vm3, %v882_v5 }
 0x370   :  { %6438 = vmatpush3.xpose.msk.msra.mxu1 %vm552_vm3, %v1711_v10  ;;  %6439 = vmatprep.mubr.msk.f32.mxu1 %vm7308_vm2, %v7307_v22 }
 0x373   :  { %6440 = vmatmul.mubr.msk.f32.vlgmr.msra.gmra.mxu1 %vm552_vm3, %v1047_v7 }
 0x3a9   :  { %v625_v11 = vpop.f32.mrf.mxu0 }
 0x3aa   :  { %v629_v12 = vsel %vm552_vm3, %v625_v11, -inf }
 0x3ab   :  { %630 = vmax.xlane.f32.xlu1 %v629_v12  ;;  %v6371_v13 = vpop.f32.mrf.mxu0 }
 0x41b   :  { %v790_v14 = vpop.f32.mrf.mxu1 }
 0x41c   :  { %v794_v15 = vsel %vm552_vm3, %v790_v14, -inf }
 0x41d   :  { %795 = vmax.xlane.f32.xlu0 %v794_v15  ;;  %v6381_v16 = vpop.f32.mrf.mxu1 }
 0x41f   :  { %v955_v17 = vpop.f32.mrf.mxu1 }
 0x420   :  { %v959_v18 = vsel %vm552_vm3, %v955_v17, -inf }
 0x421   :  { %960 = vmax.xlane.f32.xlu0 %v959_v18  ;;  %v6391_v19 = vpop.f32.mrf.mxu1 }
 0x423   :  { %v7593_v20 = vpop.f32.mrf.mxu1 }
 0x424   :  { %v1124_v21 = vsel %vm552_vm3, %v7593_v20, -inf }
 0x425   :  { %1125 = vmax.xlane.f32.xlu0 %v1124_v21  ;;  %v6401_v23 = vpop.f32.mrf.mxu1 }
 0x427   :  { %v1297_v24 = vpop.f32.mrf.mxu1 }
 0x428   :  { %v1301_v25 = vsel %vm552_vm3, %v1297_v24, -inf }
 0x429   :  { %v6411_v26 = vpop.f32.mrf.mxu1  ;;  %1302 = vmax.xlane.f32.xlu1 %v1301_v25 }
 0x42b   :  { %v7598_v27 = vpop.f32.mrf.mxu1 }
 0x42c   :  { %v1462_v28 = vsel %vm552_vm3, %v7598_v27, -inf }
 0x42d   :  { %1463 = vmax.xlane.f32.xlu0 %v1462_v28  ;;  %v6421_v29 = vpop.f32.mrf.mxu1 }
 0x42f   :  { %v1619_v30 = vpop.f32.mrf.mxu1 }
 0x430   :  { %v1623_v31 = vsel %vm552_vm3, %v1619_v30, -inf }
 0x431   :  { %v6431_v32 = vpop.f32.mrf.mxu1  ;;  %1624 = vmax.xlane.f32.xlu1 %v1623_v31 }
 0x433   :  { %v1780_v33 = vpop.f32.mrf.mxu1 }
 0x434   :  { %v1784_v34 = vsel %vm552_vm3, %v1780_v33, -inf  ;;  %v631_v36 = vpop.xlane.xlu1 %630 }
 0x435   :  { %1785 = vmax.xlane.f32.xlu0 %v1784_v34  ;;  %v6441_v35 = vpop.f32.mrf.mxu1  ;;  %v632_v37 = vsub.f32 %v625_v11, %v631_v36 }
 0x437   :  { %v633_v38 = vmul.f32 1.442695, %v632_v37 }
 0x439   :  { %6835 = vpow2.f32 %v633_v38 }
 0x442   :  { %805 = vrot.lane.b32.xlu1 %v7533_v0, %s7312_s16 }
 0x446   :  { %970 = vrot.lane.b32.xlu1 %v7533_v0, %s7313_s21  ;;  %v7610_v39 = vpop.eup %6835 }
 0x447   :  { %v635_v40 = vsel %vm552_vm3, %v7610_v39, 0.0 }
 0x44b   :  { %640 = vrot.lane.b32.xlu0 %v7533_v0, %s7314_s18 }
 0x46a   :  { %636 = vadd.xlane.f32.xlu1 %v635_v40 }
 0x47b   :  { %1312 = vrot.lane.b32.xlu1 %v7548_v1, %s7314_s18 }
 0x4a6   :  { %v796_v41 = vpop.xlane.xlu0 %795 }
 0x4a7   :  { %v797_v42 = vsub.f32 %v790_v14, %v796_v41 }
 0x4a9   :  { %v798_v43 = vmul.f32 1.442695, %v797_v42 }
 0x4aa   :  { %v961_v44 = vpop.xlane.xlu0 %960 }
 0x4ab   :  { %6837 = vpow2.f32 %v798_v43  ;;  %v962_v45 = vsub.f32 %v955_v17, %v961_v44 }
 0x4ad   :  { %v963_v46 = vmul.f32 1.442695, %v962_v45 }
 0x4ae   :  { %v1126_v50 = vpop.xlane.xlu0 %1125 }
 0x4af   :  { %6839 = vpow2.f32 %v963_v46  ;;  %v1127_v7 = vsub.f32 %v7593_v20, %v1126_v50 }
 0x4b1   :  { %v1128_v8 = vmul.f32 1.442695, %v1127_v7 }
 0x4b2   :  { %v1303_v47 = vpop.xlane.xlu1 %1302 }
 0x4b3   :  { %v1304_v48 = vsub.f32 %v1297_v24, %v1303_v47 }
 0x4b5   :  { %v1305_v49 = vmul.f32 1.442695, %v1304_v48 }
 0x4b6   :  { %v1464_v53 = vpop.xlane.xlu0 %1463 }
 0x4b7   :  { %6841 = vpow2.f32 %v1305_v49  ;;  %v1465_v9 = vsub.f32 %v7598_v27, %v1464_v53 }
 0x4b8   :  { %v6838_v51 = vpop.eup %6837 }
 0x4b9   :  { %v800_v52 = vsel %vm552_vm3, %v6838_v51, 0.0  ;;  %v1466_v10 = vmul.f32 1.442695, %v1465_v9 }
 0x4ba   :  { %801 = vadd.xlane.f32.xlu0 %v800_v52  ;;  %v1625_v54 = vpop.xlane.xlu1 %1624  ;;  %v1888_v52 = vld [vmem:[%s8252_s22 + $0x10] sm:$0xff] }
 0x4bb   :  { %v1626_v55 = vsub.f32 %v1619_v30, %v1625_v54  ;;  %v1887_v54 = vld [vmem:[%s8252_s22 + $0x8] sm:$0xff] }
 0x4bc   :  { %v6840_v56 = vpop.eup %6839 }
 0x4bd   :  { %v1627_v57 = vmul.f32 1.442695, %v1626_v55  ;;  %v965_v58 = vsel %vm552_vm3, %v6840_v56, 0.0  ;;  %v1886_v55 = vld [vmem:[%s8252_s22] sm:$0xff] }
 0x4be   :  { %v1786_v59 = vpop.xlane.xlu0 %1785  ;;  %966 = vadd.xlane.f32.xlu1 %v965_v58  ;;  %v806_v11 = vpop.permute.xlu1 %805 }
 0x4bf   :  { %6843 = vpow2.f32 %v1627_v57  ;;  %v1787_v60 = vsub.f32 %v1780_v33, %v1786_v59 }
 0x4c1   :  { %v1788_v61 = vmul.f32 1.442695, %v1787_v60 }
 0x4c2   :  { %v641_v62 = vpop.permute.xlu0 %640  ;;  %v971_v14 = vpop.permute.xlu1 %970 }
 0x4c3   :  { %6845 = vpow2.f32 %v1788_v61  ;;  %6373 = vmatpush3.msra.mxu0 %v641_v62 }
 0x4c4   :  { %v7618_v63 = vpop.eup %6841  ;;  %6382 = vmatprep.subr.mxu0 %v7307_v22  ;;  %6847 = vpow2.f32 %v1128_v8 }
 0x4c5   :  { %v1307_v2 = vsel %vm552_vm3, %v7618_v63, 0.0  ;;  %6849 = vpow2.f32 %v1466_v10 }
 0x4c6   :  { %1308 = vadd.xlane.f32.xlu1 %v1307_v2 }
 0x4cc   :  { %v7623_v3 = vpop.eup %6843 }
 0x4cd   :  { %v1629_v4 = vsel %vm552_vm3, %v7623_v3, 0.0 }
 0x4ce   :  { %1630 = vadd.xlane.f32.xlu1 %v1629_v4 }
 0x4d0   :  { %v7627_v5 = vpop.eup %6845  ;;  %1135 = vrot.lane.b32.xlu0 %v7533_v0, %s7315_s5 }
 0x4d1   :  { %v1790_v6 = vsel %vm552_vm3, %v7627_v5, 0.0  ;;  %v6848_v12 = vpop.eup %6847 }
 0x4d2   :  { %1791 = vadd.xlane.f32.xlu1 %v1790_v6  ;;  %v1130_v13 = vsel %vm552_vm3, %v6848_v12, 0.0  ;;  %v6850_v0 = vpop.eup %6849 }
 0x4d3   :  { %v1468_v15 = vsel %vm552_vm3, %v6850_v0, 0.0 }
 0x4e3   :  { %1634 = vrot.lane.b32.xlu1 %v7548_v1, %s7313_s21 }
 0x4ef   :  { %1131 = vadd.xlane.f32.xlu0 %v1130_v13 }
 0x4f3   :  { %1469 = vadd.xlane.f32.xlu0 %v1468_v15  ;;  %v637_v16 = vpop.xlane.xlu1 %636 }
 0x4f4   :  { %6851 = vrcp.f32 %v637_v16 }
 0x4f7   :  { %v1313_v19 = vpop.permute.xlu1 %1312 }
 0x501   :  { %v6852_v17 = vpop.eup %6851 }
 0x502   :  { %v639_v18 = vmul.f32 %v6852_v17, %v7610_v39 }
 0x504   :  { %6375 = vmatmul.mubr.msk.f32.vlgmr.msra.gmra.mxu0 %vm552_vm3, %v639_v18 }
 0x505   :  { %6383 = vmatpush3.msra.mxu0 %v806_v11  ;;  %6384 = vmatprep.mubr.msk.f32.mxu0 %vm7308_vm2, %v7307_v22 }
 0x506   :  { %6392 = vmatprep.subr.mxu0 %v7307_v22 }
 0x509   :  { %1473 = vrot.lane.b32.xlu0 %v7548_v1, %s7312_s16 }
 0x50d   :  { %1795 = vrot.lane.b32.xlu0 %v7548_v1, %s7315_s5 }
 0x543   :  { %v802_v20 = vpop.xlane.xlu0 %801 }
 0x544   :  { %6853 = vrcp.f32 %v802_v20 }
 0x547   :  { %v967_v21 = vpop.xlane.xlu1 %966  ;;  %v1136_v27 = vpop.permute.xlu0 %1135 }
 0x548   :  { %6855 = vrcp.f32 %v967_v21 }
 0x54f   :  { %v1309_v1 = vpop.xlane.xlu1 %1308 }
 0x551   :  { %v6854_v23 = vpop.eup %6853 }
 0x552   :  { %v804_v24 = vmul.f32 %v6854_v23, %v6838_v51  ;;  %v1889_v51 = vld [vmem:[%s8252_s22 + $0x18] sm:$0xff] }
 0x553   :  { %6447 = vmatprep.subr.mxu1 %v1889_v51 }
 0x554   :  { %6385 = vmatmul.mubr.msk.f32.vlgmr.msra.gmra.mxu0 %vm552_vm3, %v804_v24  ;;  %6448 = vmatpush3.msra.mxu1 %v1889_v51 }
 0x555   :  { %v6856_v25 = vpop.eup %6855  ;;  %6393 = vmatpush3.msra.mxu0 %v971_v14  ;;  %6394 = vmatprep.mubr.msk.f32.mxu0 %vm7308_vm2, %v7307_v22  ;;  %v6028_v14 = vld [vmem:[#allocation13] ss:$0 sm:$0xff] }
 0x556   :  { %6402 = vmatprep.subr.mxu0 %v7307_v22  ;;  %v969_v26 = vmul.f32 %v6856_v25, %v6840_v56  ;;  %6449 = vmatprep.subr.mxu1 %v1888_v52 }
 0x557   :  { %v1631_v30 = vpop.xlane.xlu1 %1630  ;;  %6450 = vmatpush3.msra.mxu1 %v1888_v52 }
 0x558   :  { %6395 = vmatmul.mubr.msk.f32.vlgmr.msra.gmra.mxu0 %vm552_vm3, %v969_v26  ;;  %6451 = vmatprep.subr.mxu1 %v1887_v54 }
 0x559   :  { %6403 = vmatpush3.msra.mxu0 %v1136_v27  ;;  %6404 = vmatprep.mubr.msk.f32.mxu0 %vm7308_vm2, %v7307_v22 }
 0x55a   :  { %6412 = vmatprep.subr.mxu0 %v7307_v22  ;;  %6452 = vmatpush3.msra.mxu1 %v1887_v54 }
 0x55b   :  { %v1792_v31 = vpop.xlane.xlu1 %1791  ;;  %6453 = vmatprep.subr.mxu1 %v1886_v55 }
 0x55c   :  { %6454 = vmatpush3.msra.mxu1 %v1886_v55  ;;  %v2004_v55 = vld [vmem:[%s8254_s0 + $0x78] sm:$0xff] }
 0x55d   :  { %6458 = vmatprep.subr.mxu1 %v2004_v55 }
 0x55f   :  { %v1635_v40 = vpop.permute.xlu1 %1634 }
 0x578   :  { %v1132_v28 = vpop.xlane.xlu0 %1131 }
 0x579   :  { %6857 = vrcp.f32 %v1132_v28 }
 0x57a   :  { %6859 = vrcp.f32 %v1309_v1 }
 0x57c   :  { %v1470_v29 = vpop.xlane.xlu0 %1469 }
 0x57d   :  { %6861 = vrcp.f32 %v1470_v29 }
 0x57e   :  { %6863 = vrcp.f32 %v1631_v30 }
 0x57f   :  { %6865 = vrcp.f32 %v1792_v31  ;;  %v1987_v31 = vld [vmem:[%s8253_s26 + $0x38] sm:$0xff] }
 0x580   :  { %v1474_v37 = vpop.permute.xlu0 %1473 }
 0x584   :  { %v1796_v43 = vpop.permute.xlu0 %1795 }
 0x586   :  { %v6858_v32 = vpop.eup %6857 }
 0x587   :  { %v1134_v33 = vmul.f32 %v6858_v32, %v6848_v12  ;;  %v6860_v34 = vpop.eup %6859  ;;  %v1986_v32 = vld [vmem:[%s8253_s26 + $0x30] sm:$0xff] }
 0x588   :  { %v1311_v35 = vmul.f32 %v6860_v34, %v7618_v63  ;;  %v1984_v34 = vld [vmem:[%s8253_s26 + $0x20] sm:$0xff] }
 0x589   :  { %6405 = vmatmul.mubr.msk.f32.vlgmr.msra.gmra.mxu0 %vm552_vm3, %v1134_v33  ;;  %v1985_v33 = vld [vmem:[%s8253_s26 + $0x28] sm:$0xff] }
 0x58a   :  { %6413 = vmatpush3.msra.mxu0 %v1313_v19  ;;  %6414 = vmatprep.mubr.msk.f32.mxu0 %vm7308_vm2, %v7307_v22  ;;  %v6862_v36 = vpop.eup %6861 }
 0x58b   :  { %6422 = vmatprep.subr.mxu0 %v7307_v22  ;;  %v1472_v38 = vmul.f32 %v6862_v36, %v6850_v0  ;;  %v6864_v39 = vpop.eup %6863  ;;  %v1982_v36 = vld [vmem:[%s8253_s26 + $0x10] sm:$0xff] }
 0x58c   :  { %v1633_v41 = vmul.f32 %v6864_v39, %v7623_v3  ;;  %v6866_v42 = vpop.eup %6865 }
 0x58d   :  { %6415 = vmatmul.mubr.msk.f32.vlgmr.msra.gmra.mxu0 %vm552_vm3, %v1311_v35  ;;  %v1794_v44 = vmul.f32 %v6866_v42, %v7627_v5  ;;  %v1983_v35 = vld [vmem:[%s8253_s26 + $0x18] sm:$0xff] }
 0x58e   :  { %6423 = vmatpush3.msra.mxu0 %v1474_v37  ;;  %6424 = vmatprep.mubr.msk.f32.mxu0 %vm7308_vm2, %v7307_v22  ;;  %v1981_v37 = vld [vmem:[%s8253_s26 + $0x8] sm:$0xff] }
 0x58f   :  { %6432 = vmatprep.subr.mxu0 %v7307_v22 }
 0x591   :  { %6425 = vmatmul.mubr.msk.f32.vlgmr.msra.gmra.mxu0 %vm552_vm3, %v1472_v38  ;;  %v1980_v38 = vld [vmem:[%s8253_s26] sm:$0xff] }
 0x592   :  { %6433 = vmatpush3.msra.mxu0 %v1635_v40  ;;  %6434 = vmatprep.mubr.msk.f32.mxu0 %vm7308_vm2, %v7307_v22 }
 0x593   :  { %6442 = vmatprep.subr.mxu0 %v7307_v22 }
 0x595   :  { %6435 = vmatmul.mubr.msk.f32.vlgmr.msra.gmra.mxu0 %vm552_vm3, %v1633_v41 }
 0x596   :  { %6443 = vmatpush3.msra.mxu0 %v1796_v43  ;;  %6444 = vmatprep.mubr.msk.f32.mxu0 %vm7308_vm2, %v7307_v22 }
 0x597   :  { %2089 = vmatprep.subr.mxu0 %v1987_v31 }
 0x599   :  { %6445 = vmatmul.mubr.msk.f32.vlgmr.msra.gmra.mxu0 %vm552_vm3, %v1794_v44 }
 0x59a   :  { %2129 = vmatprep.mubr.f32.mxu0 %v7307_v22  ;;  %2090 = vmatpush1.msra.mxu0 %v1986_v32 }
 0x59b   :  { %2091 = vmatprep.subr.mxu0 %v1985_v33 }
 0x59c   :  { %2092 = vmatpush1.msra.mxu0 %v1984_v34 }
 0x59d   :  { %2093 = vmatprep.subr.mxu0 %v1983_v35 }
 0x59e   :  { %2094 = vmatpush1.msra.mxu0 %v1982_v36 }
 0x59f   :  { %2095 = vmatprep.subr.mxu0 %v1981_v37 }
 0x5a0   :  { %2096 = vmatpush1.msra.mxu0 %v1980_v38 }
 0x5c4   :  { %v712_v45 = vpop.f32.mrf.mxu0 }
 0x5c6   :  { %v6376_v46 = vpop.f32.mrf.mxu0 }
 0x5c7   :  { %v6031_v46 = vld [vmem:[#allocation15] ss:$0 sm:$0xff] }
 0x614   :  { %v877_v47 = vpop.f32.mrf.mxu0 }
 0x615   :  { %1212 = vrot.lane.b32.xlu1 %v877_v47, %s7297_s7 }
 0x616   :  { %v6386_v48 = vpop.f32.mrf.mxu0 }
 0x617   :  { %v6032_v48 = vld [vmem:[#allocation16] ss:$0 sm:$0xff] }
 0x618   :  { %v1042_v49 = vpop.f32.mrf.mxu0 }
 0x619   :  { %1216 = vrot.lane.b32.xlu0 %v1042_v49, %s7304_s30 }
 0x61a   :  { %v6396_v50 = vpop.f32.mrf.mxu0 }
 0x649   :  { %v1207_v53 = vpop.f32.mrf.mxu0 }
 0x64a   :  { %1220 = vrot.lane.b32.xlu0 %v1207_v53, %s7316_s23 }
 0x64b   :  { %v6406_v56 = vpop.f32.mrf.mxu0 }
 0x64c   :  { %v2003_v56 = vld [vmem:[%s8254_s0 + $0x70] sm:$0xff] }
 0x64d   :  { %v1384_v57 = vpop.f32.mrf.mxu0 }
 0x64f   :  { %v6416_v58 = vpop.f32.mrf.mxu0 }
 0x650   :  { %v2001_v58 = vld [vmem:[%s8254_s0 + $0x60] sm:$0xff] }
 0x651   :  { %v1545_v59 = vpop.f32.mrf.mxu0 }
 0x652   :  { %1872 = vrot.lane.b32.xlu1 %v1545_v59, %s7297_s7  ;;  %v2000_v59 = vld [vmem:[%s8254_s0 + $0x58] sm:$0xff] }
 0x653   :  { %v6426_v60 = vpop.f32.mrf.mxu0 }
 0x654   :  { %v1999_v60 = vld [vmem:[%s8254_s0 + $0x50] sm:$0xff] }
 0x655   :  { %v1706_v61 = vpop.f32.mrf.mxu0 }
 0x656   :  { %1876 = vrot.lane.b32.xlu1 %v1706_v61, %s7304_s30  ;;  %v1998_v61 = vld [vmem:[%s8254_s0 + $0x48] sm:$0xff] }
 0x657   :  { %v6436_v62 = vpop.f32.mrf.mxu0 }
 0x658   :  { %v1997_v62 = vld [vmem:[%s8254_s0 + $0x40] sm:$0xff] }
 0x659   :  { %v1867_v63 = vpop.f32.mrf.mxu0 }
 0x65a   :  { %1880 = vrot.lane.b32.xlu0 %v1867_v63, %s7316_s23  ;;  %v1996_v63 = vld [vmem:[%s8254_s0 + $0x38] sm:$0xff] }
 0x65b   :  { %v6446_v2 = vpop.f32.mrf.mxu0 }
 0x65c   :  { %v1995_v2 = vld [vmem:[%s8254_s0 + $0x30] sm:$0xff] }
 0x687   :  { %v1213_v3 = vpop.permute.xlu1 %1212 }
 0x688   :  { %v1223_v5 = vsel %vm552_vm3, %v712_v45, %v1213_v3  ;;  %v1994_v3 = vld [vmem:[%s8254_s0 + $0x28] sm:$0xff] }
 0x68b   :  { %v1217_v4 = vpop.permute.xlu0 %1216 }
 0x68c   :  { %v1225_v6 = vsel %vm1224_vm4, %v1223_v5, %v1217_v4  ;;  %v1993_v4 = vld [vmem:[%s8254_s0 + $0x20] sm:$0xff]  ;;  %v1992_v5 = vld [vmem:[%s8254_s0 + $0x18] sm:$0xff] }
 0x6bc   :  { %v1221_v7 = vpop.permute.xlu0 %1220 }
 0x6bd   :  { %v1227_v8 = vsel %vm1226_vm5, %v1225_v6, %v1221_v7  ;;  %v1991_v6 = vld [vmem:[%s8254_s0 + $0x10] sm:$0xff]  ;;  %v1990_v7 = vld [vmem:[%s8254_s0 + $0x8] sm:$0xff] }
 0x6be   :  { %6455 = vmatprep.mubr.msk.f32.mxu1 %vm297_vm0, %v1227_v8  ;;  %v1989_v8 = vld [vmem:[%s8254_s0] sm:$0xff] }
 0x6c4   :  { %v1873_v9 = vpop.permute.xlu1 %1872 }
 0x6c5   :  { %v1883_v11 = vsel %vm552_vm3, %v1384_v57, %v1873_v9  ;;  %v2002_v57 = vld [vmem:[%s8254_s0 + $0x68] sm:$0xff]  ;;  %v2049_v9 = vlaneseq }
 0x6c8   :  { %v1877_v10 = vpop.permute.xlu1 %1876 }
 0x6c9   :  { %v1884_v12 = vsel %vm1224_vm4, %v1883_v11, %v1877_v10  ;;  %v2050_v10 = vshrl.u32 %v2049_v9, 7 }
 0x6cb   :  { %v7734_v11 = vsub.s32 1, %v2050_v10  ;;  %v7737_v31 = vsub.s32 0, %v2050_v10 }
 0x6cc   :  { %v1881_v13 = vpop.permute.xlu0 %1880 }
 0x6cd   :  { %v1885_v0 = vsel %vm1226_vm5, %v1884_v12, %v1881_v13  ;;  %v1988_v12 = vld [vmem:[#allocation18] sm:$0x3] }
 0x6ce   :  { %6456 = vmatmul.mubr.msk.f32.vlgmr.msra.gmra.mxu1 %vm297_vm0, %v1885_v0  ;;  %v2056_v13 = vrot.slane %v1988_v12, %v7734_v11  ;;  %v2052_v32 = vrot.slane %v1988_v12, %v7737_v31  ;;  %v6036_v12 = vld [vmem:[%s8256_s17] ss:$0 sm:$0xff] }
 0x6cf   :  { %6459 = vmatpush3.msra.mxu1 %v2004_v55 }
 0x6d0   :  { %6460 = vmatprep.subr.mxu1 %v2003_v56 }
 0x6d1   :  { %6461 = vmatpush3.msra.mxu1 %v2003_v56 }
 0x6d2   :  { %6462 = vmatprep.subr.mxu1 %v2002_v57 }
 0x6d3   :  { %6463 = vmatpush3.msra.mxu1 %v2002_v57 }
 0x6d4   :  { %6464 = vmatprep.subr.mxu1 %v2001_v58 }
 0x6d5   :  { %6465 = vmatpush3.msra.mxu1 %v2001_v58 }
 0x6d6   :  { %6466 = vmatprep.subr.mxu1 %v2000_v59 }
 0x6d7   :  { %6467 = vmatpush3.msra.mxu1 %v2000_v59 }
 0x6d8   :  { %6468 = vmatprep.subr.mxu1 %v1999_v60 }
 0x6d9   :  { %6469 = vmatpush3.msra.mxu1 %v1999_v60 }
 0x6da   :  { %6470 = vmatprep.subr.mxu1 %v1998_v61 }
 0x6db   :  { %6471 = vmatpush3.msra.mxu1 %v1998_v61 }
 0x6dc   :  { %6472 = vmatprep.subr.mxu1 %v1997_v62 }
 0x6dd   :  { %6473 = vmatpush3.msra.mxu1 %v1997_v62  ;;  %v2292_v62 = vld [vmem:[%s8255_s3 + $0x18] sm:$0xff] }
 0x6de   :  { %6474 = vmatprep.subr.mxu1 %v1996_v63  ;;  %6493 = vmatprep.subr.mxu0 %v2292_v62 }
 0x6df   :  { %6475 = vmatpush3.msra.mxu1 %v1996_v63  ;;  %v2291_v63 = vld [vmem:[%s8255_s3 + $0x10] sm:$0xff] }
 0x6e0   :  { %6476 = vmatprep.subr.mxu1 %v1995_v2 }
 0x6e1   :  { %6477 = vmatpush3.msra.mxu1 %v1995_v2  ;;  %v2290_v2 = vld [vmem:[%s8255_s3 + $0x8] sm:$0xff] }
 0x6e2   :  { %6478 = vmatprep.subr.mxu1 %v1994_v3 }
 0x6e3   :  { %6479 = vmatpush3.msra.mxu1 %v1994_v3  ;;  %v2289_v3 = vld [vmem:[%s8255_s3] sm:$0xff] }
 0x6e4   :  { %6480 = vmatprep.subr.mxu1 %v1993_v4 }
 0x6e5   :  { %6481 = vmatpush3.msra.mxu1 %v1993_v4 }
 0x6e6   :  { %6482 = vmatprep.subr.mxu1 %v1992_v5 }
 0x6e7   :  { %6483 = vmatpush3.msra.mxu1 %v1992_v5 }
 0x6e8   :  { %6484 = vmatprep.subr.mxu1 %v1991_v6 }
 0x6e9   :  { %6485 = vmatpush3.msra.mxu1 %v1991_v6 }
 0x6ea   :  { %6486 = vmatprep.subr.mxu1 %v1990_v7 }
 0x6eb   :  { %6487 = vmatpush3.msra.mxu1 %v1990_v7 }
 0x6ec   :  { %6488 = vmatprep.subr.mxu1 %v1989_v8 }
 0x6ed   :  { %6489 = vmatpush3.msra.mxu1 %v1989_v8 }
 0x6ee   :  { %6534 = vmatprep.subr.mxu1 %v7307_v22 }
 0x78e   :  { %v6457_v15 = vpop.f32.mrf.mxu1 }
 0x78f   :  { %v7694_v16 = vadd.f32 %v6457_v15, %v6028_v14 }
 0x790   :  { %v1969_v17 = vpop.f32.mrf.mxu1 }
 0x791   :  { %v7696_v18 = vadd.f32 %v6028_v14, %v1969_v17  ;;  %v2009_v19 = vsel %vm297_vm0, %v7694_v16, 0.0 }
 0x792   :  { %2010 = vadd.xlane.f32.xlu0 %v2009_v19 }
 0x793   :  { %v2006_v20 = vsel %vm297_vm0, %v7696_v18, 0.0 }
 0x794   :  { %2007 = vadd.xlane.f32.xlu1 %v2006_v20 }
 0x81b   :  { %v2011_v21 = vpop.xlane.xlu0 %2010 }
 0x81c   :  { %v2013_v23 = vmul.f32 0.03125, %v2011_v21 }
 0x81d   :  { %v2008_v24 = vpop.xlane.xlu1 %2007 }
 0x81e   :  { %v2012_v25 = vmul.f32 0.03125, %v2008_v24  ;;  %v2015_v26 = vsub.f32 %v7694_v16, %v2013_v23 }
 0x820   :  { %v2014_v27 = vsub.f32 %v7696_v18, %v2012_v25  ;;  %v2017_v29 = vmul.f32 %v2015_v26, %v2015_v26 }
 0x822   :  { %v2016_v1 = vmul.f32 %v2014_v27, %v2014_v27  ;;  %v2021_v30 = vsel %vm297_vm0, %v2017_v29, 0.0 }
 0x824   :  { %v2018_v28 = vsel %vm297_vm0, %v2016_v1, 0.0 }
 0x825   :  { %2019 = vadd.xlane.f32.xlu0 %v2018_v28 }
 0x829   :  { %2022 = vadd.xlane.f32.xlu0 %v2021_v30 }
 0x8ae   :  { %v2020_v39 = vpop.xlane.xlu0 %2019 }
 0x8af   :  { %v2024_v40 = vmul.f32 0.03125, %v2020_v39 }
 0x8b1   :  { %v2026_v41 = vadd.f32 1e-05, %v2024_v40 }
 0x8b2   :  { %v2023_v42 = vpop.xlane.xlu0 %2022 }
 0x8b3   :  { %6867 = vrsqrt.f32 %v2026_v41  ;;  %v2025_v43 = vmul.f32 0.03125, %v2023_v42 }
 0x8b5   :  { %v2027_v44 = vadd.f32 1e-05, %v2025_v43 }
 0x8b7   :  { %6869 = vrsqrt.f32 %v2027_v44 }
 0x8c0   :  { %v6868_v45 = vpop.eup %6867 }
 0x8c1   :  { %v2030_v47 = vmul.f32 %v6868_v45, %v2014_v27  ;;  %v6035_v45 = vld [vmem:[#allocation19] ss:$0 sm:$0xff] }
 0x8c3   :  { %v2038_v49 = vmul.f32 %v6031_v46, %v2030_v47 }
 0x8c4   :  { %v6870_v50 = vpop.eup %6869 }
 0x8c5   :  { %v2046_v51 = vadd.f32 %v6032_v48, %v2038_v49  ;;  %v2031_v52 = vmul.f32 %v6870_v50, %v2015_v26 }
 0x8c7   :  { %6033 = vmatmul.mubr.msk.f32.vlgmr.msra.gmra.mxu0 %vm297_vm0, %v2046_v51  ;;  %v2039_v53 = vmul.f32 %v6031_v46, %v2031_v52 }
 0x8c8   :  { %2135 = vmatprep.mubr.f32.mxu0 %v7307_v22  ;;  %6494 = vmatpush3.msra.mxu0 %v2292_v62 }
 0x8c9   :  { %v2047_v54 = vadd.f32 %v6032_v48, %v2039_v53  ;;  %6495 = vmatprep.subr.mxu0 %v2291_v63 }
 0x8ca   :  { %6496 = vmatpush3.msra.mxu0 %v2291_v63 }
 0x8cb   :  { %6034 = vmatmul.mubr.msk.f32.gmra.mxu0 %vm297_vm0, %v2047_v54  ;;  %6497 = vmatprep.subr.mxu0 %v2290_v2 }
 0x8cc   :  { %6498 = vmatpush3.msra.mxu0 %v2290_v2 }
 0x8cd   :  { %6499 = vmatprep.subr.mxu0 %v2289_v3 }
 0x8ce   :  { %6500 = vmatpush3.msra.mxu0 %v2289_v3 }
 0x8cf   :  { %6504 = vmatprep.subr.mxu0 %v7307_v22 }
 0x987   :  { %v2131_v0 = vpop.f32.mrf.mxu0 }
 0x988   :  { %v2132_v36 = vadd.f32 %v2131_v0, %v2052_v32 }
 0x989   :  { %v2133_v14 = vpop.f32.mrf.mxu0 }
 0x98a   :  { %v2134_v15 = vadd.f32 %v2133_v14, %v2056_v13 }
 0x98b   :  { %v2137_v17 = vpop.f32.mrf.mxu0 }
 0x98c   :  { %v2144_v19 = vmul.f32 0.044715, %v2134_v15  ;;  %v2142_v34 = vmul.f32 0.5, %v2134_v15  ;;  %v2138_v42 = vadd.f32 %v2137_v17, %v2052_v32  ;;  %v6037_v17 = vld [vmem:[%s8257_s28] ss:$0 sm:$0xff] }
 0x98d   :  { %v2139_v20 = vpop.f32.mrf.mxu0 }
 0x98e   :  { %v2146_v21 = vmul.f32 %v2144_v19, %v2134_v15  ;;  %v2140_v23 = vadd.f32 %v2139_v20, %v2056_v13 }
 0x990   :  { %v2148_v24 = vmul.f32 %v2146_v21, %v2134_v15  ;;  %v2145_v25 = vmul.f32 0.044715, %v2140_v23  ;;  %v2143_v40 = vmul.f32 0.5, %v2140_v23 }
 0x992   :  { %v2147_v26 = vmul.f32 %v2145_v25, %v2140_v23  ;;  %v2150_v27 = vadd.f32 %v2148_v24, %v2134_v15 }
 0x994   :  { %v2149_v1 = vmul.f32 %v2147_v26, %v2140_v23  ;;  %v2152_v28 = vmul.f32 0.7978846, %v2150_v27 }
 0x996   :  { %v2151_v29 = vadd.f32 %v2149_v1, %v2140_v23  ;;  %6871 = vtanh.f32 %v2152_v28  ;;  %v6038_v23 = vld [vmem:[%s8258_s25] ss:$0 sm:$0xff] }
 0x998   :  { %v2153_v30 = vmul.f32 0.7978846, %v2151_v29 }
 0x99a   :  { %6873 = vtanh.f32 %v2153_v30 }
 0x9a3   :  { %v6872_v33 = vpop.eup %6871 }
 0x9a4   :  { %v2156_v35 = vadd.f32 1.0, %v6872_v33 }
 0x9a6   :  { %v2158_v37 = vmul.f32 %v2156_v35, %v2142_v34 }
 0x9a7   :  { %v6874_v38 = vpop.eup %6873 }
 0x9a8   :  { %v2160_v39 = vmul.f32 %v2158_v37, %v2132_v36  ;;  %v2157_v41 = vadd.f32 1.0, %v6874_v38 }
 0x9aa   :  { %6490 = vmatprep.mubr.f32.mxu1 %v2160_v39  ;;  %v2159_v43 = vmul.f32 %v2157_v41, %v2143_v40 }
 0x9ac   :  { %v2161_v44 = vmul.f32 %v2159_v43, %v2138_v42 }
 0x9ae   :  { %6491 = vmatmul.mubr.f32.vlgmr.msra.gmra.mxu1 %v2161_v44 }
 0x9af   :  { %6536 = vmatprep.mubr.msk.f32.mxu1 %vm7308_vm2, %v7307_v22 }
 0xa6e   :  { %v6492_v46 = vpop.f32.mrf.mxu1 }
 0xa6f   :  { %v2240_v47 = vadd.f32 %v6492_v46, %v6035_v45 }
 0xa70   :  { %v2234_v48 = vpop.f32.mrf.mxu1 }
 0xa71   :  { %v7743_v49 = vadd.f32 %v2240_v47, %v7694_v16  ;;  %v2235_v50 = vadd.f32 %v6035_v45, %v2234_v48 }
 0xa73   :  { %v7746_v51 = vadd.f32 %v2235_v50, %v7696_v18  ;;  %v2250_v52 = vsel %vm297_vm0, %v7743_v49, 0.0 }
 0xa74   :  { %2251 = vadd.xlane.f32.xlu0 %v2250_v52 }
 0xa75   :  { %v2247_v53 = vsel %vm297_vm0, %v7746_v51, 0.0 }
 0xa76   :  { %2248 = vadd.xlane.f32.xlu1 %v2247_v53 }
 0xafd   :  { %v2252_v54 = vpop.xlane.xlu0 %2251 }
 0xafe   :  { %v2254_v55 = vmul.f32 0.03125, %v2252_v54 }
 0xaff   :  { %v2249_v56 = vpop.xlane.xlu1 %2248 }
 0xb00   :  { %v2256_v16 = vsub.f32 %v7743_v49, %v2254_v55  ;;  %v2253_v57 = vmul.f32 0.03125, %v2249_v56 }
 0xb02   :  { %v2255_v18 = vsub.f32 %v7746_v51, %v2253_v57  ;;  %v2258_v58 = vmul.f32 %v2256_v16, %v2256_v16 }
 0xb04   :  { %v2262_v59 = vsel %vm297_vm0, %v2258_v58, 0.0  ;;  %v2257_v60 = vmul.f32 %v2255_v18, %v2255_v18 }
 0xb05   :  { %2263 = vadd.xlane.f32.xlu0 %v2262_v59 }
 0xb06   :  { %v2259_v61 = vsel %vm297_vm0, %v2257_v60, 0.0 }
 0xb07   :  { %2260 = vadd.xlane.f32.xlu1 %v2259_v61 }
 0xb8e   :  { %v2264_v4 = vpop.xlane.xlu0 %2263 }
 0xb8f   :  { %v2266_v5 = vmul.f32 0.03125, %v2264_v4 }
 0xb90   :  { %v2261_v6 = vpop.xlane.xlu1 %2260 }
 0xb91   :  { %v2268_v7 = vadd.f32 1e-05, %v2266_v5  ;;  %v2265_v8 = vmul.f32 0.03125, %v2261_v6 }
 0xb93   :  { %6875 = vrsqrt.f32 %v2268_v7  ;;  %v2267_v9 = vadd.f32 1e-05, %v2265_v8 }
 0xb95   :  { %6877 = vrsqrt.f32 %v2267_v9 }
 0xba0   :  { %v6876_v10 = vpop.eup %6875 }
 0xba1   :  { %v2272_v13 = vmul.f32 %v6876_v10, %v2256_v16 }
 0xba2   :  { %v6878_v0 = vpop.eup %6877 }
 0xba3   :  { %v2271_v14 = vmul.f32 %v6878_v0, %v2255_v18  ;;  %v2280_v15 = vmul.f32 %v6036_v12, %v2272_v13 }
 0xba5   :  { %v2279_v19 = vmul.f32 %v6036_v12, %v2271_v14  ;;  %v2288_v21 = vadd.f32 %v6037_v17, %v2280_v15 }
 0xba7   :  { %v2287_v20 = vadd.f32 %v6037_v17, %v2279_v19 }
 0xba9   :  { %6501 = vmatprep.mubr.msk.f32.mxu0 %vm297_vm0, %v2287_v20 }
 0xbaa   :  { %6502 = vmatmul.mubr.msk.f32.vlgmr.msra.gmra.mxu0 %vm297_vm0, %v2288_v21 }
 0xbab   :  { %6506 = vmatprep.mubr.msk.f32.mxu0 %vm7308_vm2, %v7307_v22 }
 0xc6a   :  { %v6503_v24 = vpop.f32.mrf.mxu0 }
 0xc6b   :  { %v7768_v25 = vadd.f32 %v6503_v24, %v6038_v23 }
 0xc6c   :  { %v2372_v26 = vpop.f32.mrf.mxu0 }
 0xc6d   :  { %v7770_v27 = vadd.f32 %v6038_v23, %v2372_v26 }
 0xc6f   :  { %2382 = vrot.lane.b32.xlu1 %v7770_v27, %s7314_s18 }
 0xc73   :  { %2547 = vrot.lane.b32.xlu1 %v7770_v27, %s7312_s16 }
 0xc77   :  { %2545 = vrot.lane.b32.xlu1 %v7770_v27, %s7309_s19 }
 0xce1   :  { %v2383_v1 = vpop.permute.xlu1 %2382 }
 0xce2   :  { %6505 = vmatpush3.xpose.msk.msra.mxu0 %vm552_vm3, %v2383_v1 }
 0xce3   :  { %6509 = vmatprep.subr.mxu0 %v7307_v22 }
 0xce5   :  { %6507 = vmatmul.mubr.msk.f32.vlgmr.msra.gmra.mxu0 %vm552_vm3, %v7770_v27  ;;  %v2548_v40 = vpop.permute.xlu1 %2547 }
 0xce6   :  { %6511 = vmatprep.mubr.msk.f32.mxu0 %vm7308_vm2, %v7307_v22 }
 0xce9   :  { %v2546_v42 = vpop.permute.xlu1 %2545 }
 0xda5   :  { %v2454_v28 = vpop.f32.mrf.mxu0 }
 0xda6   :  { %v2458_v29 = vsel %vm552_vm3, %v2454_v28, -inf }
 0xda7   :  { %2459 = vmax.xlane.f32.xlu0 %v2458_v29  ;;  %v6508_v30 = vpop.f32.mrf.mxu0 }
 0xe30   :  { %v2460_v32 = vpop.xlane.xlu0 %2459 }
 0xe31   :  { %v2461_v33 = vsub.f32 %v2454_v28, %v2460_v32 }
 0xe33   :  { %v2462_v34 = vmul.f32 1.442695, %v2461_v33 }
 0xe35   :  { %6879 = vpow2.f32 %v2462_v34 }
 0xe42   :  { %v6880_v35 = vpop.eup %6879 }
 0xe43   :  { %v2464_v36 = vsel %vm552_vm3, %v6880_v35, 0.0 }
 0xe44   :  { %2465 = vadd.xlane.f32.xlu0 %v2464_v36 }
 0xe5a   :  { %2469 = vrot.lane.b32.xlu0 %v7770_v27, %s7317_s24 }
 0xecd   :  { %v2466_v37 = vpop.xlane.xlu0 %2465 }
 0xece   :  { %6881 = vrcp.f32 %v2466_v37 }
 0xed1   :  { %v2470_v38 = vpop.permute.xlu0 %2469 }
 0xed2   :  { %6510 = vmatpush3.msra.mxu0 %v2470_v38 }
 0xed3   :  { %6514 = vmatprep.subr.mxu0 %v7307_v22 }
 0xedb   :  { %v6882_v39 = vpop.eup %6881 }
 0xedc   :  { %v2468_v41 = vmul.f32 %v6882_v39, %v6880_v35 }
 0xede   :  { %6512 = vmatmul.mubr.msk.f32.vlgmr.msra.gmra.mxu0 %vm552_vm3, %v2468_v41 }
 0xedf   :  { %6515 = vmatpush3.xpose.msk.msra.mxu0 %vm552_vm3, %v2548_v40  ;;  %6516 = vmatprep.mubr.msk.f32.mxu0 %vm7308_vm2, %v7307_v22 }
 0xee0   :  { %6519 = vmatprep.subr.mxu0 %v7307_v22 }
 0xee2   :  { %6517 = vmatmul.mubr.msk.f32.vlgmr.msra.gmra.mxu0 %vm552_vm3, %v2546_v42 }
 0xee3   :  { %6521 = vmatprep.mubr.msk.f32.mxu0 %vm7308_vm2, %v7307_v22 }
 0xf9e   :  { %v7797_v43 = vpop.f32.mrf.mxu0 }
 0xfa0   :  { %v6513_v44 = vpop.f32.mrf.mxu0 }
 0xfa2   :  { %v2619_v45 = vpop.f32.mrf.mxu0 }
 0xfa3   :  { %v2623_v46 = vsel %vm552_vm3, %v2619_v45, -inf }
 0xfa4   :  { %2624 = vmax.xlane.f32.xlu1 %v2623_v46  ;;  %v6518_v47 = vpop.f32.mrf.mxu0 }
 0xfb5   :  { %2634 = vrot.lane.b32.xlu1 %v7770_v27, %s7318_s1 }
 0xfb9   :  { %2710 = vrot.lane.b32.xlu1 %v7770_v27, %s7310_s20 }
 0xfbd   :  { %2877 = vrot.lane.b32.xlu1 %v7770_v27, %s7315_s5 }
 0xfc1   :  { %2875 = vrot.lane.b32.xlu1 %v7770_v27, %s7311_s13 }
 0xfc5   :  { %3221 = vrot.lane.b32.xlu1 %v7768_v25, %s7312_s16 }
 0xfc9   :  { %3386 = vrot.lane.b32.xlu1 %v7768_v25, %s7313_s21 }
 0xfcd   :  { %3551 = vrot.lane.b32.xlu1 %v7768_v25, %s7315_s5 }
0x102d   :  { %v2625_v48 = vpop.xlane.xlu1 %2624 }
0x102e   :  { %v2626_v50 = vsub.f32 %v2619_v45, %v2625_v48 }
0x1030   :  { %v2627_v52 = vmul.f32 1.442695, %v2626_v50 }
0x1031   :  { %v2635_v53 = vpop.permute.xlu1 %2634 }
0x1032   :  { %6883 = vpow2.f32 %v2627_v52  ;;  %6520 = vmatpush3.msra.mxu0 %v2635_v53 }
0x1033   :  { %6524 = vmatprep.subr.mxu0 %v7307_v22 }
0x1035   :  { %v2711_v54 = vpop.permute.xlu1 %2710 }
0x1039   :  { %v2878_v55 = vpop.permute.xlu1 %2877 }
0x103a   :  { %6535 = vmatpush3.xpose.msk.msra.mxu1 %vm552_vm3, %v2878_v55 }
0x103b   :  { %6544 = vmatprep.subr.mxu1 %v7307_v22 }
0x103d   :  { %v2876_v56 = vpop.permute.xlu1 %2875 }
0x103e   :  { %6537 = vmatmul.mubr.msk.f32.vlgmr.msra.gmra.mxu1 %vm552_vm3, %v2876_v56 }
0x103f   :  { %v6884_v16 = vpop.eup %6883  ;;  %6546 = vmatprep.mubr.msk.f32.mxu1 %vm7308_vm2, %v7307_v22 }
0x1040   :  { %v2629_v57 = vsel %vm552_vm3, %v6884_v16, 0.0 }
0x1041   :  { %2630 = vadd.xlane.f32.xlu0 %v2629_v57  ;;  %v3222_v59 = vpop.permute.xlu1 %3221 }
0x1045   :  { %v3387_v63 = vpop.permute.xlu1 %3386 }
0x1049   :  { %v3552_v4 = vpop.permute.xlu1 %3551 }
0x1057   :  { %2712 = vrot.lane.b32.xlu0 %v7770_v27, %s7313_s21 }
0x105b   :  { %3056 = vrot.lane.b32.xlu0 %v7768_v25, %s7314_s18 }
0x105f   :  { %3219 = vrot.lane.b32.xlu0 %v7768_v25, %s7309_s19 }
0x1063   :  { %3384 = vrot.lane.b32.xlu0 %v7768_v25, %s7310_s20 }
0x1067   :  { %3549 = vrot.lane.b32.xlu0 %v7768_v25, %s7311_s13 }
0x10ca   :  { %v2631_v18 = vpop.xlane.xlu0 %2630 }
0x10cb   :  { %6885 = vrcp.f32 %v2631_v18 }
0x10ce   :  { %v2713_v58 = vpop.permute.xlu0 %2712 }
0x10d2   :  { %v3057_v60 = vpop.permute.xlu0 %3056 }
0x10d3   :  { %6545 = vmatpush3.xpose.msk.msra.mxu1 %vm552_vm3, %v3057_v60 }
0x10d4   :  { %6554 = vmatprep.subr.mxu1 %v7307_v22 }
0x10d6   :  { %v3220_v61 = vpop.permute.xlu0 %3219  ;;  %6547 = vmatmul.mubr.msk.f32.vlgmr.msra.gmra.mxu1 %vm552_vm3, %v7768_v25 }
0x10d7   :  { %6555 = vmatpush3.xpose.msk.msra.mxu1 %vm552_vm3, %v3222_v59  ;;  %6556 = vmatprep.mubr.msk.f32.mxu1 %vm7308_vm2, %v7307_v22 }
0x10d8   :  { %v6886_v62 = vpop.eup %6885  ;;  %6564 = vmatprep.subr.mxu1 %v7307_v22 }
0x10d9   :  { %v2633_v2 = vmul.f32 %v6886_v62, %v6884_v16 }
0x10da   :  { %6557 = vmatmul.mubr.msk.f32.vlgmr.msra.gmra.mxu1 %vm552_vm3, %v3220_v61  ;;  %v3385_v3 = vpop.permute.xlu0 %3384 }
0x10db   :  { %6522 = vmatmul.mubr.msk.f32.vlgmr.msra.gmra.mxu0 %vm552_vm3, %v2633_v2  ;;  %6565 = vmatpush3.xpose.msk.msra.mxu1 %vm552_vm3, %v3387_v63 }
0x10dc   :  { %6525 = vmatpush3.xpose.msk.msra.mxu0 %vm552_vm3, %v2713_v58  ;;  %6566 = vmatprep.mubr.msk.f32.mxu1 %vm7308_vm2, %v7307_v22 }
0x10dd   :  { %6526 = vmatprep.mubr.msk.f32.mxu0 %vm7308_vm2, %v7307_v22  ;;  %6574 = vmatprep.subr.mxu1 %v7307_v22 }
0x10de   :  { %6567 = vmatmul.mubr.msk.f32.vlgmr.msra.gmra.mxu1 %vm552_vm3, %v3385_v3  ;;  %6529 = vmatprep.subr.mxu0 %v7307_v22  ;;  %v3550_v5 = vpop.permute.xlu0 %3549 }
0x10df   :  { %6527 = vmatmul.mubr.msk.f32.vlgmr.msra.gmra.mxu0 %vm552_vm3, %v2711_v54  ;;  %6575 = vmatpush3.xpose.msk.msra.mxu1 %vm552_vm3, %v3552_v4 }
0x10e0   :  { %6576 = vmatprep.mubr.msk.f32.mxu1 %vm7308_vm2, %v7307_v22  ;;  %6531 = vmatprep.mubr.msk.f32.mxu0 %vm7308_vm2, %v7307_v22 }
0x10e2   :  { %6577 = vmatmul.mubr.msk.f32.vlgmr.msra.gmra.mxu1 %vm552_vm3, %v3550_v5 }
0x10fe   :  { %v2949_v6 = vpop.f32.mrf.mxu1 }
0x10ff   :  { %v2953_v7 = vsel %vm552_vm3, %v2949_v6, -inf }
0x1100   :  { %2954 = vmax.xlane.f32.xlu0 %v2953_v7  ;;  %v6538_v8 = vpop.f32.mrf.mxu1 }
0x1189   :  { %v2955_v9 = vpop.xlane.xlu0 %2954 }
0x118a   :  { %v2956_v10 = vsub.f32 %v2949_v6, %v2955_v9 }
0x118c   :  { %v2957_v12 = vmul.f32 1.442695, %v2956_v10 }
0x118e   :  { %6887 = vpow2.f32 %v2957_v12 }
0x1196   :  { %v3128_v13 = vpop.f32.mrf.mxu1 }
0x1197   :  { %v3132_v0 = vsel %vm552_vm3, %v3128_v13, -inf }
0x1198   :  { %3133 = vmax.xlane.f32.xlu0 %v3132_v0  ;;  %v6548_v14 = vpop.f32.mrf.mxu1 }
0x119a   :  { %v3293_v15 = vpop.f32.mrf.mxu1 }
0x119b   :  { %v2706_v17 = vpop.f32.mrf.mxu0  ;;  %v3297_v19 = vsel %vm552_vm3, %v3293_v15, -inf  ;;  %v7862_v32 = vpop.eup %6887 }
0x119c   :  { %3298 = vmax.xlane.f32.xlu0 %v3297_v19  ;;  %v6558_v20 = vpop.f32.mrf.mxu1  ;;  %v2959_v35 = vsel %vm552_vm3, %v7862_v32, 0.0 }
0x119d   :  { %v6523_v21 = vpop.f32.mrf.mxu0 }
0x119e   :  { %v3458_v23 = vpop.f32.mrf.mxu1 }
0x119f   :  { %v2784_v24 = vpop.f32.mrf.mxu0  ;;  %v3462_v34 = vsel %vm552_vm3, %v3458_v23, -inf }
0x11a0   :  { %v6568_v26 = vpop.f32.mrf.mxu1  ;;  %v2788_v1 = vsel %vm552_vm3, %v2784_v24, -inf }
0x11a1   :  { %2789 = vmax.xlane.f32.xlu1 %v2788_v1  ;;  %v6528_v28 = vpop.f32.mrf.mxu0  ;;  %v3732_v1 = vld [vmem:[%s8259_s14 + $0x18] sm:$0xff] }
0x11a2   :  { %v3623_v29 = vpop.f32.mrf.mxu1  ;;  %v3731_v28 = vld [vmem:[%s8259_s14 + $0x10] sm:$0xff]  ;;  %6584 = vmatprep.subr.mxu1 %v3732_v1 }
0x11a3   :  { %v3627_v30 = vsel %vm552_vm3, %v3623_v29, -inf  ;;  %6585 = vmatpush3.msra.mxu1 %v3732_v1  ;;  %v6068_v1 = vld [vmem:[%s8261_s11] ss:$0 sm:$0xff] }
0x11a4   :  { %3628 = vmax.xlane.f32.xlu0 %v3627_v30  ;;  %v6578_v33 = vpop.f32.mrf.mxu1  ;;  %6586 = vmatprep.subr.mxu1 %v3731_v28 }
0x11a5   :  { %3463 = vmax.xlane.f32.xlu1 %v3462_v34  ;;  %6587 = vmatpush3.msra.mxu1 %v3731_v28  ;;  %v3729_v33 = vld [vmem:[%s8259_s14] sm:$0xff] }
0x11a8   :  { %2960 = vadd.xlane.f32.xlu0 %v2959_v35 }
0x1221   :  { %v3134_v36 = vpop.xlane.xlu0 %3133 }
0x1222   :  { %v3135_v37 = vsub.f32 %v3128_v13, %v3134_v36 }
0x1224   :  { %v3136_v38 = vmul.f32 1.442695, %v3135_v37 }
0x1225   :  { %v3299_v39 = vpop.xlane.xlu0 %3298 }
0x1226   :  { %6889 = vpow2.f32 %v3136_v38  ;;  %v3300_v40 = vsub.f32 %v3293_v15, %v3299_v39 }
0x1228   :  { %v3301_v41 = vmul.f32 1.442695, %v3300_v40 }
0x122a   :  { %6891 = vpow2.f32 %v3301_v41  ;;  %v2790_v42 = vpop.xlane.xlu1 %2789 }
0x122b   :  { %v2791_v58 = vsub.f32 %v2784_v24, %v2790_v42 }
0x122d   :  { %v3629_v44 = vpop.xlane.xlu0 %3628  ;;  %v2792_v59 = vmul.f32 1.442695, %v2791_v58 }
0x122e   :  { %v3630_v45 = vsub.f32 %v3623_v29, %v3629_v44  ;;  %v3464_v46 = vpop.xlane.xlu1 %3463 }
0x122f   :  { %v3465_v47 = vsub.f32 %v3458_v23, %v3464_v46 }
0x1230   :  { %v3631_v48 = vmul.f32 1.442695, %v3630_v45 }
0x1231   :  { %v3466_v50 = vmul.f32 1.442695, %v3465_v47  ;;  %v2961_v2 = vpop.xlane.xlu0 %2960 }
0x1232   :  { %6893 = vpow2.f32 %v3631_v48 }
0x1233   :  { %v6890_v52 = vpop.eup %6889  ;;  %6895 = vpow2.f32 %v3466_v50 }
0x1234   :  { %v3138_v53 = vsel %vm552_vm3, %v6890_v52, 0.0  ;;  %6897 = vpow2.f32 %v2792_v59 }
0x1235   :  { %3139 = vadd.xlane.f32.xlu1 %v3138_v53 }
0x1237   :  { %v6892_v54 = vpop.eup %6891 }
0x1238   :  { %v3303_v55 = vsel %vm552_vm3, %v6892_v54, 0.0 }
0x1239   :  { %3304 = vadd.xlane.f32.xlu0 %v3303_v55 }
0x123f   :  { %v7869_v56 = vpop.eup %6893 }
0x1240   :  { %v7871_v16 = vpop.eup %6895  ;;  %v3633_v57 = vsel %vm552_vm3, %v7869_v56, 0.0 }
0x1241   :  { %3634 = vadd.xlane.f32.xlu0 %v3633_v57  ;;  %v3468_v18 = vsel %vm552_vm3, %v7871_v16, 0.0  ;;  %v6898_v60 = vpop.eup %6897 }
0x1242   :  { %3469 = vadd.xlane.f32.xlu1 %v3468_v18  ;;  %v2794_v61 = vsel %vm552_vm3, %v6898_v60, 0.0 }
0x1253   :  { %2799 = vrot.lane.b32.xlu1 %v7770_v27, %s7319_s2 }
0x1257   :  { %2964 = vrot.lane.b32.xlu0 %v7770_v27, %s7320_s6 }
0x125b   :  { %3638 = vrot.lane.b32.xlu0 %v7768_v25, %s7320_s6 }
0x1277   :  { %2795 = vadd.xlane.f32.xlu1 %v2794_v61 }
0x1288   :  { %3143 = vrot.lane.b32.xlu1 %v7768_v25, %s7317_s24 }
0x128c   :  { %3308 = vrot.lane.b32.xlu1 %v7768_v25, %s7318_s1 }
0x1290   :  { %3473 = vrot.lane.b32.xlu1 %v7768_v25, %s7319_s2 }
0x1294   :  { %3041 = vrot.lane.b32.xlu1 %v2706_v17, %s7297_s7 }
0x12be   :  { %v3140_v27 = vpop.xlane.xlu1 %3139 }
0x12c2   :  { %v3305_v4 = vpop.xlane.xlu0 %3304 }
0x12ca   :  { %v3635_v5 = vpop.xlane.xlu0 %3634 }
0x12cb   :  { %v3470_v62 = vpop.xlane.xlu1 %3469 }
0x12ce   :  { %v2965_v8 = vpop.permute.xlu0 %2964 }
0x12cf   :  { %v2800_v63 = vpop.permute.xlu1 %2799 }
0x12d0   :  { %6530 = vmatpush3.msra.mxu0 %v2800_v63 }
0x12d1   :  { %6539 = vmatprep.subr.mxu0 %v7307_v22 }
0x12d2   :  { %v3639_v23 = vpop.permute.xlu0 %3638 }
0x1300   :  { %v2796_v3 = vpop.xlane.xlu1 %2795 }
0x1301   :  { %6899 = vrcp.f32 %v2796_v3 }
0x1302   :  { %6901 = vrcp.f32 %v2961_v2 }
0x1303   :  { %6903 = vrcp.f32 %v3140_v27 }
0x1304   :  { %6905 = vrcp.f32 %v3305_v4  ;;  %v3144_v9 = vpop.permute.xlu1 %3143 }
0x1305   :  { %6907 = vrcp.f32 %v3470_v62 }
0x1306   :  { %6909 = vrcp.f32 %v3635_v5 }
0x1308   :  { %v3309_v13 = vpop.permute.xlu1 %3308 }
0x130c   :  { %v3474_v19 = vpop.permute.xlu1 %3473 }
0x130e   :  { %v6900_v6 = vpop.eup %6899 }
0x130f   :  { %v2798_v7 = vmul.f32 %v6900_v6, %v6898_v60  ;;  %v6902_v25 = vpop.eup %6901 }
0x1310   :  { %v2963_v10 = vmul.f32 %v6902_v25, %v7862_v32  ;;  %v6904_v12 = vpop.eup %6903  ;;  %v3730_v32 = vld [vmem:[%s8259_s14 + $0x8] sm:$0xff]  ;;  %v3042_v44 = vpop.permute.xlu1 %3041 }
0x1311   :  { %6532 = vmatmul.mubr.msk.f32.vlgmr.msra.gmra.mxu0 %vm552_vm3, %v2798_v7  ;;  %v3142_v0 = vmul.f32 %v6904_v12, %v6890_v52  ;;  %v6906_v14 = vpop.eup %6905  ;;  %6588 = vmatprep.subr.mxu1 %v3730_v32  ;;  %v3052_v46 = vsel %vm552_vm3, %v7797_v43, %v3042_v44  ;;  %v6067_v43 = vld [vmem:[#allocation21] ss:$0 sm:$0xff]  ;;  %v3845_v44 = vld [vmem:[%s7469_s27 + $0x48] sm:$0xff] }
0x1312   :  { %6540 = vmatpush3.msra.mxu0 %v2965_v8  ;;  %6541 = vmatprep.mubr.msk.f32.mxu0 %vm7308_vm2, %v7307_v22  ;;  %v3307_v15 = vmul.f32 %v6906_v14, %v6892_v54  ;;  %v6908_v17 = vpop.eup %6907  ;;  %v3834_v8 = vld [vmem:[%s8260_s10 + $0x38] sm:$0xff]  ;;  %v3831_v12 = vld [vmem:[%s8260_s10 + $0x20] sm:$0xff]  ;;  %v3828_v14 = vld [vmem:[%s8260_s10 + $0x8] sm:$0xff] }
0x1313   :  { %6549 = vmatprep.subr.mxu0 %v7307_v22  ;;  %v3472_v20 = vmul.f32 %v6908_v17, %v7871_v16  ;;  %v6910_v21 = vpop.eup %6909  ;;  %6589 = vmatpush3.msra.mxu1 %v3730_v32 }
0x1314   :  { %v3637_v24 = vmul.f32 %v6910_v21, %v7869_v56  ;;  %6590 = vmatprep.subr.mxu1 %v3729_v33 }
0x1315   :  { %6542 = vmatmul.mubr.msk.f32.vlgmr.msra.gmra.mxu0 %vm552_vm3, %v2963_v10  ;;  %6591 = vmatpush3.msra.mxu1 %v3729_v33  ;;  %v3832_v10 = vld [vmem:[%s8260_s10 + $0x28] sm:$0xff] }
0x1316   :  { %6550 = vmatpush3.msra.mxu0 %v3144_v9  ;;  %6551 = vmatprep.mubr.msk.f32.mxu0 %vm7308_vm2, %v7307_v22  ;;  %v3833_v9 = vld [vmem:[%s8260_s10 + $0x30] sm:$0xff] }
0x1317   :  { %6559 = vmatprep.subr.mxu0 %v7307_v22 }
0x1319   :  { %6552 = vmatmul.mubr.msk.f32.vlgmr.msra.gmra.mxu0 %vm552_vm3, %v3142_v0  ;;  %v3829_v0 = vld [vmem:[%s8260_s10 + $0x10] sm:$0xff] }
0x131a   :  { %6560 = vmatpush3.msra.mxu0 %v3309_v13  ;;  %6561 = vmatprep.mubr.msk.f32.mxu0 %vm7308_vm2, %v7307_v22  ;;  %v3830_v13 = vld [vmem:[%s8260_s10 + $0x18] sm:$0xff] }
0x131b   :  { %6569 = vmatprep.subr.mxu0 %v7307_v22 }
0x131d   :  { %6562 = vmatmul.mubr.msk.f32.vlgmr.msra.gmra.mxu0 %vm552_vm3, %v3307_v15  ;;  %v3827_v15 = vld [vmem:[%s8260_s10] sm:$0xff] }
0x131e   :  { %6570 = vmatpush3.msra.mxu0 %v3474_v19  ;;  %6571 = vmatprep.mubr.msk.f32.mxu0 %vm7308_vm2, %v7307_v22 }
0x131f   :  { %6579 = vmatprep.subr.mxu0 %v7307_v22 }
0x1321   :  { %6572 = vmatmul.mubr.msk.f32.vlgmr.msra.gmra.mxu0 %vm552_vm3, %v3472_v20 }
0x1322   :  { %6580 = vmatpush3.msra.mxu0 %v3639_v23  ;;  %6581 = vmatprep.mubr.msk.f32.mxu0 %vm7308_vm2, %v7307_v22 }
0x1323   :  { %3936 = vmatprep.subr.mxu0 %v3834_v8 }
0x1325   :  { %6582 = vmatmul.mubr.msk.f32.vlgmr.msra.gmra.mxu0 %vm552_vm3, %v3637_v24 }
0x1326   :  { %3976 = vmatprep.mubr.f32.mxu0 %v7307_v22  ;;  %3937 = vmatpush1.msra.mxu0 %v3833_v9 }
0x1327   :  { %3938 = vmatprep.subr.mxu0 %v3832_v10 }
0x1328   :  { %3939 = vmatpush1.msra.mxu0 %v3831_v12 }
0x1329   :  { %3940 = vmatprep.subr.mxu0 %v3830_v13 }
0x132a   :  { %3941 = vmatpush1.msra.mxu0 %v3829_v0 }
0x132b   :  { %3942 = vmatprep.subr.mxu0 %v3828_v14 }
0x132c   :  { %3943 = vmatpush1.msra.mxu0 %v3827_v15 }
0x13d1   :  { %v2871_v26 = vpop.f32.mrf.mxu0 }
0x13d2   :  { %3045 = vrot.lane.b32.xlu0 %v2871_v26, %s7304_s30 }
0x13d3   :  { %v6533_v29 = vpop.f32.mrf.mxu0 }
0x13d4   :  { %v6069_v29 = vld [vmem:[%s8262_s15] ss:$0 sm:$0xff] }
0x13d5   :  { %v3036_v30 = vpop.f32.mrf.mxu0 }
0x13d6   :  { %3049 = vrot.lane.b32.xlu0 %v3036_v30, %s7316_s23 }
0x13d7   :  { %v6543_v34 = vpop.f32.mrf.mxu0 }
0x13d9   :  { %v3215_v35 = vpop.f32.mrf.mxu0 }
0x13db   :  { %v6553_v36 = vpop.f32.mrf.mxu0 }
0x13dd   :  { %v3380_v37 = vpop.f32.mrf.mxu0 }
0x13de   :  { %3715 = vrot.lane.b32.xlu1 %v3380_v37, %s7297_s7  ;;  %v3851_v37 = vld [vmem:[%s7469_s27 + $0x78] sm:$0xff] }
0x13df   :  { %v6563_v38 = vpop.f32.mrf.mxu0  ;;  %6595 = vmatprep.subr.mxu1 %v3851_v37 }
0x13e0   :  { %v3850_v38 = vld [vmem:[%s7469_s27 + $0x70] sm:$0xff] }
0x13e1   :  { %v3545_v39 = vpop.f32.mrf.mxu0 }
0x13e2   :  { %3719 = vrot.lane.b32.xlu1 %v3545_v39, %s7304_s30  ;;  %v3849_v39 = vld [vmem:[%s7469_s27 + $0x68] sm:$0xff] }
0x13e3   :  { %v6573_v40 = vpop.f32.mrf.mxu0 }
0x13e4   :  { %v3848_v40 = vld [vmem:[%s7469_s27 + $0x60] sm:$0xff] }
0x13e5   :  { %v3710_v41 = vpop.f32.mrf.mxu0 }
0x13e6   :  { %3723 = vrot.lane.b32.xlu0 %v3710_v41, %s7316_s23  ;;  %v3847_v41 = vld [vmem:[%s7469_s27 + $0x58] sm:$0xff] }
0x13e7   :  { %v6583_v42 = vpop.f32.mrf.mxu0 }
0x13e8   :  { %v3846_v42 = vld [vmem:[%s7469_s27 + $0x50] sm:$0xff] }
0x1444   :  { %v3046_v45 = vpop.permute.xlu0 %3045 }
0x1445   :  { %v3053_v47 = vsel %vm1224_vm4, %v3052_v46, %v3046_v45  ;;  %v3844_v45 = vld [vmem:[%s7469_s27 + $0x40] sm:$0xff]  ;;  %v3843_v46 = vld [vmem:[%s7469_s27 + $0x38] sm:$0xff] }
0x1448   :  { %v3050_v48 = vpop.permute.xlu0 %3049 }
0x1449   :  { %v3054_v50 = vsel %vm1226_vm5, %v3053_v47, %v3050_v48  ;;  %v3842_v47 = vld [vmem:[%s7469_s27 + $0x30] sm:$0xff]  ;;  %v3841_v48 = vld [vmem:[%s7469_s27 + $0x28] sm:$0xff] }
0x144a   :  { %6592 = vmatprep.mubr.msk.f32.mxu1 %vm297_vm0, %v3054_v50  ;;  %v3840_v50 = vld [vmem:[%s7469_s27 + $0x20] sm:$0xff] }
0x1450   :  { %v3716_v52 = vpop.permute.xlu1 %3715 }
0x1451   :  { %v3726_v54 = vsel %vm552_vm3, %v3215_v35, %v3716_v52  ;;  %v3839_v52 = vld [vmem:[%s7469_s27 + $0x18] sm:$0xff] }
0x1454   :  { %v3720_v53 = vpop.permute.xlu1 %3719 }
0x1455   :  { %v3727_v55 = vsel %vm1224_vm4, %v3726_v54, %v3720_v53  ;;  %v3838_v53 = vld [vmem:[%s7469_s27 + $0x10] sm:$0xff]  ;;  %v3837_v54 = vld [vmem:[%s7469_s27 + $0x8] sm:$0xff] }
0x1458   :  { %v3724_v56 = vpop.permute.xlu0 %3723 }
0x1459   :  { %v3728_v16 = vsel %vm1226_vm5, %v3727_v55, %v3724_v56  ;;  %v3836_v55 = vld [vmem:[%s7469_s27] sm:$0xff] }
0x145a   :  { %6593 = vmatmul.mubr.msk.f32.vlgmr.msra.gmra.mxu1 %vm297_vm0, %v3728_v16  ;;  %v3835_v56 = vld [vmem:[%s7464_s29] sm:$0x3] }
0x145b   :  { %6596 = vmatpush3.msra.mxu1 %v3851_v37  ;;  %v3903_v16 = vrot.slane %v3835_v56, %v7734_v11 }
0x145c   :  { %6597 = vmatprep.subr.mxu1 %v3850_v38 }
0x145d   :  { %6598 = vmatpush3.msra.mxu1 %v3850_v38 }
0x145e   :  { %6599 = vmatprep.subr.mxu1 %v3849_v39 }
0x145f   :  { %6600 = vmatpush3.msra.mxu1 %v3849_v39 }
0x1460   :  { %6601 = vmatprep.subr.mxu1 %v3848_v40 }
0x1461   :  { %6602 = vmatpush3.msra.mxu1 %v3848_v40 }
0x1462   :  { %6603 = vmatprep.subr.mxu1 %v3847_v41 }
0x1463   :  { %6604 = vmatpush3.msra.mxu1 %v3847_v41 }
0x1464   :  { %6605 = vmatprep.subr.mxu1 %v3846_v42 }
0x1465   :  { %6606 = vmatpush3.msra.mxu1 %v3846_v42  ;;  %v6080_v42 = vld [vmem:[%s8255_s3 + $0x38] sm:$0xff] }
0x1466   :  { %6607 = vmatprep.subr.mxu1 %v3845_v44  ;;  %6630 = vmatprep.subr.mxu0 %v6080_v42 }
0x1467   :  { %6608 = vmatpush3.msra.mxu1 %v3845_v44  ;;  %v6079_v44 = vld [vmem:[%s8255_s3 + $0x30] sm:$0xff] }
0x1468   :  { %6609 = vmatprep.subr.mxu1 %v3844_v45 }
0x1469   :  { %6610 = vmatpush3.msra.mxu1 %v3844_v45  ;;  %v6078_v45 = vld [vmem:[%s8255_s3 + $0x28] sm:$0xff] }
0x146a   :  { %6611 = vmatprep.subr.mxu1 %v3843_v46 }
0x146b   :  { %6612 = vmatpush3.msra.mxu1 %v3843_v46  ;;  %v6077_v46 = vld [vmem:[%s8255_s3 + $0x20] sm:$0xff] }
0x146c   :  { %6613 = vmatprep.subr.mxu1 %v3842_v47 }
0x146d   :  { %6614 = vmatpush3.msra.mxu1 %v3842_v47 }
0x146e   :  { %6615 = vmatprep.subr.mxu1 %v3841_v48 }
0x146f   :  { %6616 = vmatpush3.msra.mxu1 %v3841_v48 }
0x1470   :  { %6617 = vmatprep.subr.mxu1 %v3840_v50 }
0x1471   :  { %6618 = vmatpush3.msra.mxu1 %v3840_v50 }
0x1472   :  { %6619 = vmatprep.subr.mxu1 %v3839_v52 }
0x1473   :  { %6620 = vmatpush3.msra.mxu1 %v3839_v52 }
0x1474   :  { %6621 = vmatprep.subr.mxu1 %v3838_v53 }
0x1475   :  { %6622 = vmatpush3.msra.mxu1 %v3838_v53 }
0x1476   :  { %6623 = vmatprep.subr.mxu1 %v3837_v54 }
0x1477   :  { %6624 = vmatpush3.msra.mxu1 %v3837_v54 }
0x1478   :  { %6625 = vmatprep.subr.mxu1 %v3836_v55 }
0x1479   :  { %6626 = vmatpush3.msra.mxu1 %v3836_v55 }
0x147a   :  { %6671 = vmatprep.subr.mxu1 %v7307_v22 }
0x151a   :  { %v6594_v57 = vpop.f32.mrf.mxu1 }
0x151b   :  { %v3815_v18 = vadd.f32 %v6594_v57, %v7743_v49 }
0x151c   :  { %v3805_v58 = vpop.f32.mrf.mxu1 }
0x151d   :  { %v7935_v59 = vadd.f32 %v6067_v43, %v3815_v18  ;;  %v3814_v60 = vadd.f32 %v3805_v58, %v7746_v51 }
0x151f   :  { %v7938_v61 = vadd.f32 %v6067_v43, %v3814_v60  ;;  %v3856_v27 = vsel %vm297_vm0, %v7935_v59, 0.0 }
0x1520   :  { %3857 = vadd.xlane.f32.xlu0 %v3856_v27 }
0x1521   :  { %v3853_v62 = vsel %vm297_vm0, %v7938_v61, 0.0 }
0x1522   :  { %3854 = vadd.xlane.f32.xlu1 %v3853_v62 }
0x15a9   :  { %v3858_v63 = vpop.xlane.xlu0 %3857 }
0x15aa   :  { %v3860_v49 = vmul.f32 0.03125, %v3858_v63 }
0x15ab   :  { %v3855_v2 = vpop.xlane.xlu1 %3854 }
0x15ac   :  { %v3859_v3 = vmul.f32 0.03125, %v3855_v2  ;;  %v3862_v51 = vsub.f32 %v7935_v59, %v3860_v49 }
0x15ae   :  { %v3861_v4 = vsub.f32 %v7938_v61, %v3859_v3  ;;  %v3864_v7 = vmul.f32 %v3862_v51, %v3862_v51 }
0x15b0   :  { %v3863_v5 = vmul.f32 %v3861_v4, %v3861_v4  ;;  %v3868_v25 = vsel %vm297_vm0, %v3864_v7, 0.0 }
0x15b2   :  { %v3865_v6 = vsel %vm297_vm0, %v3863_v5, 0.0 }
0x15b3   :  { %3866 = vadd.xlane.f32.xlu0 %v3865_v6 }
0x15b7   :  { %3869 = vadd.xlane.f32.xlu0 %v3868_v25  ;;  %v3899_v25 = vrot.slane %v3835_v56, %v7737_v31  ;;  %v6075_v56 = vld [vmem:[%s8256_s17 + $0x1] ss:$0 sm:$0xff] }
0x163c   :  { %v3867_v17 = vpop.xlane.xlu0 %3866 }
0x163d   :  { %v3871_v19 = vmul.f32 0.03125, %v3867_v17 }
0x163f   :  { %v3873_v20 = vadd.f32 1e-05, %v3871_v19 }
0x1640   :  { %v3870_v21 = vpop.xlane.xlu0 %3869 }
0x1641   :  { %6911 = vrsqrt.f32 %v3873_v20  ;;  %v3872_v23 = vmul.f32 0.03125, %v3870_v21 }
0x1643   :  { %v3874_v24 = vadd.f32 1e-05, %v3872_v23  ;;  %v6072_v23 = vld [vmem:[#allocation22] ss:$0 sm:$0xff] }
0x1645   :  { %6913 = vrsqrt.f32 %v3874_v24 }
0x164e   :  { %v6912_v26 = vpop.eup %6911 }
0x164f   :  { %v3877_v28 = vmul.f32 %v6912_v26, %v3861_v4 }
0x1651   :  { %v3885_v30 = vmul.f32 %v6068_v1, %v3877_v28 }
0x1652   :  { %v6914_v32 = vpop.eup %6913 }
0x1653   :  { %v3893_v33 = vadd.f32 %v6069_v29, %v3885_v30  ;;  %v3878_v34 = vmul.f32 %v6914_v32, %v3862_v51 }
0x1655   :  { %6070 = vmatmul.mubr.msk.f32.vlgmr.msra.gmra.mxu0 %vm297_vm0, %v3893_v33  ;;  %v3886_v35 = vmul.f32 %v6068_v1, %v3878_v34 }
0x1656   :  { %3982 = vmatprep.mubr.f32.mxu0 %v7307_v22  ;;  %6631 = vmatpush3.msra.mxu0 %v6080_v42 }
0x1657   :  { %v3894_v36 = vadd.f32 %v6069_v29, %v3886_v35  ;;  %6632 = vmatprep.subr.mxu0 %v6079_v44 }
0x1658   :  { %6633 = vmatpush3.msra.mxu0 %v6079_v44 }
0x1659   :  { %6071 = vmatmul.mubr.msk.f32.gmra.mxu0 %vm297_vm0, %v3894_v36  ;;  %6634 = vmatprep.subr.mxu0 %v6078_v45 }
0x165a   :  { %6635 = vmatpush3.msra.mxu0 %v6078_v45 }
0x165b   :  { %6636 = vmatprep.subr.mxu0 %v6077_v46 }
0x165c   :  { %6637 = vmatpush3.msra.mxu0 %v6077_v46 }
0x165d   :  { %6641 = vmatprep.subr.mxu0 %v7307_v22 }
0x1715   :  { %v3978_v57 = vpop.f32.mrf.mxu0 }
0x1716   :  { %v3979_v12 = vadd.f32 %v3978_v57, %v3899_v25 }
0x1717   :  { %v3980_v43 = vpop.f32.mrf.mxu0 }
0x1718   :  { %v3981_v18 = vadd.f32 %v3980_v43, %v3903_v16 }
0x1719   :  { %v3984_v58 = vpop.f32.mrf.mxu0 }
0x171a   :  { %v3991_v60 = vmul.f32 0.044715, %v3981_v18  ;;  %v3989_v9 = vmul.f32 0.5, %v3981_v18  ;;  %v3985_v19 = vadd.f32 %v3984_v58, %v3899_v25  ;;  %v6076_v58 = vld [vmem:[%s8257_s28 + $0x1] ss:$0 sm:$0xff] }
0x171b   :  { %v3986_v27 = vpop.f32.mrf.mxu0 }
0x171c   :  { %v3993_v62 = vmul.f32 %v3991_v60, %v3981_v18  ;;  %v3987_v63 = vadd.f32 %v3986_v27, %v3903_v16 }
0x171e   :  { %v3995_v49 = vmul.f32 %v3993_v62, %v3981_v18  ;;  %v3992_v2 = vmul.f32 0.044715, %v3987_v63  ;;  %v3990_v15 = vmul.f32 0.5, %v3987_v63 }
0x1720   :  { %v3994_v3 = vmul.f32 %v3992_v2, %v3987_v63  ;;  %v3997_v51 = vadd.f32 %v3995_v49, %v3981_v18 }
0x1722   :  { %v3996_v4 = vmul.f32 %v3994_v3, %v3987_v63  ;;  %v3999_v5 = vmul.f32 0.7978846, %v3997_v51 }
0x1724   :  { %v3998_v6 = vadd.f32 %v3996_v4, %v3987_v63  ;;  %6915 = vtanh.f32 %v3999_v5  ;;  %v6082_v63 = vld [vmem:[%s8258_s25 + $0x1] ss:$0 sm:$0xff] }
0x1726   :  { %v4000_v7 = vmul.f32 0.7978846, %v3998_v6 }
0x1728   :  { %6917 = vtanh.f32 %v4000_v7 }
0x1731   :  { %v6916_v8 = vpop.eup %6915 }
0x1732   :  { %v4003_v10 = vadd.f32 1.0, %v6916_v8 }
0x1734   :  { %v4005_v13 = vmul.f32 %v4003_v10, %v3989_v9 }
0x1735   :  { %v6918_v0 = vpop.eup %6917 }
0x1736   :  { %v4007_v14 = vmul.f32 %v4005_v13, %v3979_v12  ;;  %v4004_v17 = vadd.f32 1.0, %v6918_v0 }
0x1738   :  { %6627 = vmatprep.mubr.f32.mxu1 %v4007_v14  ;;  %v4006_v20 = vmul.f32 %v4004_v17, %v3990_v15 }
0x173a   :  { %v4008_v21 = vmul.f32 %v4006_v20, %v3985_v19 }
0x173c   :  { %6628 = vmatmul.mubr.f32.vlgmr.msra.gmra.mxu1 %v4008_v21 }
0x173d   :  { %6673 = vmatprep.mubr.msk.f32.mxu1 %vm7308_vm2, %v7307_v22 }
0x17fc   :  { %v6629_v24 = vpop.f32.mrf.mxu1 }
0x17fd   :  { %v4087_v26 = vadd.f32 %v6629_v24, %v6072_v23 }
0x17fe   :  { %v4081_v1 = vpop.f32.mrf.mxu1 }
0x17ff   :  { %v7984_v28 = vadd.f32 %v4087_v26, %v7935_v59  ;;  %v4082_v29 = vadd.f32 %v6072_v23, %v4081_v1 }
0x1801   :  { %v7987_v30 = vadd.f32 %v4082_v29, %v7938_v61  ;;  %v4099_v32 = vsel %vm297_vm0, %v7984_v28, 0.0 }
0x1802   :  { %4100 = vadd.xlane.f32.xlu0 %v4099_v32 }
0x1803   :  { %v4096_v33 = vsel %vm297_vm0, %v7987_v30, 0.0 }
0x1804   :  { %4097 = vadd.xlane.f32.xlu1 %v4096_v33 }
0x188b   :  { %v4101_v34 = vpop.xlane.xlu0 %4100 }
0x188c   :  { %v4103_v35 = vmul.f32 0.03125, %v4101_v34 }
0x188d   :  { %v4098_v36 = vpop.xlane.xlu1 %4097 }
0x188e   :  { %v4105_v59 = vsub.f32 %v7984_v28, %v4103_v35  ;;  %v4102_v37 = vmul.f32 0.03125, %v4098_v36 }
0x1890   :  { %v4104_v61 = vsub.f32 %v7987_v30, %v4102_v37  ;;  %v4107_v38 = vmul.f32 %v4105_v59, %v4105_v59 }
0x1892   :  { %v4111_v39 = vsel %vm297_vm0, %v4107_v38, 0.0  ;;  %v4106_v40 = vmul.f32 %v4104_v61, %v4104_v61 }
0x1893   :  { %4112 = vadd.xlane.f32.xlu0 %v4111_v39 }
0x1894   :  { %v4108_v41 = vsel %vm297_vm0, %v4106_v40, 0.0 }
0x1895   :  { %4109 = vadd.xlane.f32.xlu1 %v4108_v41 }
0x191c   :  { %v4113_v47 = vpop.xlane.xlu0 %4112 }
0x191d   :  { %v4115_v48 = vmul.f32 0.03125, %v4113_v47 }
0x191e   :  { %v4110_v50 = vpop.xlane.xlu1 %4109 }
0x191f   :  { %v4117_v52 = vadd.f32 1e-05, %v4115_v48  ;;  %v4114_v53 = vmul.f32 0.03125, %v4110_v50 }
0x1921   :  { %6919 = vrsqrt.f32 %v4117_v52  ;;  %v4116_v54 = vadd.f32 1e-05, %v4114_v53 }
0x1923   :  { %6921 = vrsqrt.f32 %v4116_v54 }
0x192e   :  { %v6920_v55 = vpop.eup %6919 }
0x192f   :  { %v4121_v16 = vmul.f32 %v6920_v55, %v4105_v59 }
0x1930   :  { %v6922_v57 = vpop.eup %6921 }
0x1931   :  { %v4120_v43 = vmul.f32 %v6922_v57, %v4104_v61  ;;  %v4129_v18 = vmul.f32 %v6075_v56, %v4121_v16 }
0x1933   :  { %v4128_v60 = vmul.f32 %v6075_v56, %v4120_v43  ;;  %v4137_v62 = vadd.f32 %v6076_v58, %v4129_v18 }
0x1935   :  { %v4136_v27 = vadd.f32 %v6076_v58, %v4128_v60 }
0x1937   :  { %6638 = vmatprep.mubr.msk.f32.mxu0 %vm297_vm0, %v4136_v27 }
0x1938   :  { %6639 = vmatmul.mubr.msk.f32.vlgmr.msra.gmra.mxu0 %vm297_vm0, %v4137_v62 }
0x1939   :  { %6643 = vmatprep.mubr.msk.f32.mxu0 %vm7308_vm2, %v7307_v22 }
0x19f8   :  { %v6640_v49 = vpop.f32.mrf.mxu0 }
0x19f9   :  { %v8009_v2 = vadd.f32 %v6640_v49, %v6082_v63 }
0x19fa   :  { %v4223_v3 = vpop.f32.mrf.mxu0 }
0x19fb   :  { %v8011_v51 = vadd.f32 %v6082_v63, %v4223_v3 }
0x19fd   :  { %4233 = vrot.lane.b32.xlu1 %v8011_v51, %s7314_s18 }
0x1a01   :  { %4398 = vrot.lane.b32.xlu1 %v8011_v51, %s7312_s16 }
0x1a05   :  { %4396 = vrot.lane.b32.xlu1 %v8011_v51, %s7309_s19 }
0x1a6f   :  { %v4234_v4 = vpop.permute.xlu1 %4233 }
0x1a70   :  { %6642 = vmatpush3.xpose.msk.msra.mxu0 %vm552_vm3, %v4234_v4 }
0x1a71   :  { %6646 = vmatprep.subr.mxu0 %v7307_v22 }
0x1a73   :  { %6644 = vmatmul.mubr.msk.f32.vlgmr.msra.gmra.mxu0 %vm552_vm3, %v8011_v51  ;;  %v4399_v15 = vpop.permute.xlu1 %4398 }
0x1a74   :  { %6648 = vmatprep.mubr.msk.f32.mxu0 %vm7308_vm2, %v7307_v22 }
0x1a77   :  { %v4397_v19 = vpop.permute.xlu1 %4396 }
0x1b33   :  { %v4305_v5 = vpop.f32.mrf.mxu0 }
0x1b34   :  { %v4309_v6 = vsel %vm552_vm3, %v4305_v5, -inf }
0x1b35   :  { %4310 = vmax.xlane.f32.xlu0 %v4309_v6  ;;  %v6645_v7 = vpop.f32.mrf.mxu0 }
0x1bbe   :  { %v4311_v25 = vpop.xlane.xlu0 %4310 }
0x1bbf   :  { %v4312_v8 = vsub.f32 %v4305_v5, %v4311_v25 }
0x1bc1   :  { %v4313_v9 = vmul.f32 1.442695, %v4312_v8 }
0x1bc3   :  { %6923 = vpow2.f32 %v4313_v9 }
0x1bd0   :  { %v6924_v10 = vpop.eup %6923 }
0x1bd1   :  { %v4315_v12 = vsel %vm552_vm3, %v6924_v10, 0.0 }
0x1bd2   :  { %4316 = vadd.xlane.f32.xlu0 %v4315_v12 }
0x1be8   :  { %4320 = vrot.lane.b32.xlu0 %v8011_v51, %s7317_s24 }
0x1c5b   :  { %v4317_v13 = vpop.xlane.xlu0 %4316 }
0x1c5c   :  { %6925 = vrcp.f32 %v4317_v13 }
0x1c5f   :  { %v4321_v0 = vpop.permute.xlu0 %4320 }
0x1c60   :  { %6647 = vmatpush3.msra.mxu0 %v4321_v0 }
0x1c61   :  { %6651 = vmatprep.subr.mxu0 %v7307_v22 }
0x1c69   :  { %v6926_v14 = vpop.eup %6925 }
0x1c6a   :  { %v4319_v17 = vmul.f32 %v6926_v14, %v6924_v10 }
0x1c6c   :  { %6649 = vmatmul.mubr.msk.f32.vlgmr.msra.gmra.mxu0 %vm552_vm3, %v4319_v17 }
0x1c6d   :  { %6652 = vmatpush3.xpose.msk.msra.mxu0 %vm552_vm3, %v4399_v15  ;;  %6653 = vmatprep.mubr.msk.f32.mxu0 %vm7308_vm2, %v7307_v22 }
0x1c6e   :  { %6656 = vmatprep.subr.mxu0 %v7307_v22 }
0x1c70   :  { %6654 = vmatmul.mubr.msk.f32.vlgmr.msra.gmra.mxu0 %vm552_vm3, %v4397_v19 }
0x1c71   :  { %6658 = vmatprep.mubr.msk.f32.mxu0 %vm7308_vm2, %v7307_v22 }
0x1d2c   :  { %v8038_v20 = vpop.f32.mrf.mxu0 }
0x1d2e   :  { %v6650_v21 = vpop.f32.mrf.mxu0 }
0x1d30   :  { %v4470_v23 = vpop.f32.mrf.mxu0 }
0x1d31   :  { %v4474_v24 = vsel %vm552_vm3, %v4470_v23, -inf }
0x1d32   :  { %4475 = vmax.xlane.f32.xlu1 %v4474_v24  ;;  %v6655_v26 = vpop.f32.mrf.mxu0 }
0x1d43   :  { %4485 = vrot.lane.b32.xlu1 %v8011_v51, %s7318_s1 }
0x1d47   :  { %4561 = vrot.lane.b32.xlu1 %v8011_v51, %s7310_s20 }
0x1d4b   :  { %4728 = vrot.lane.b32.xlu1 %v8011_v51, %s7315_s5 }
0x1d4f   :  { %4726 = vrot.lane.b32.xlu1 %v8011_v51, %s7311_s13 }
0x1d53   :  { %5072 = vrot.lane.b32.xlu1 %v8009_v2, %s7312_s16 }
0x1d57   :  { %5237 = vrot.lane.b32.xlu1 %v8009_v2, %s7313_s21 }
0x1d5b   :  { %5402 = vrot.lane.b32.xlu1 %v8009_v2, %s7315_s5 }
0x1dbb   :  { %v4476_v1 = vpop.xlane.xlu1 %4475 }
0x1dbc   :  { %v4477_v29 = vsub.f32 %v4470_v23, %v4476_v1 }
0x1dbe   :  { %v4478_v32 = vmul.f32 1.442695, %v4477_v29 }
0x1dbf   :  { %v4486_v33 = vpop.permute.xlu1 %4485 }
0x1dc0   :  { %6927 = vpow2.f32 %v4478_v32  ;;  %6657 = vmatpush3.msra.mxu0 %v4486_v33 }
0x1dc1   :  { %6661 = vmatprep.subr.mxu0 %v7307_v22 }
0x1dc3   :  { %v4562_v34 = vpop.permute.xlu1 %4561 }
0x1dc7   :  { %v4729_v35 = vpop.permute.xlu1 %4728 }
0x1dc8   :  { %6672 = vmatpush3.xpose.msk.msra.mxu1 %vm552_vm3, %v4729_v35 }
0x1dc9   :  { %6681 = vmatprep.subr.mxu1 %v7307_v22 }
0x1dcb   :  { %v4727_v36 = vpop.permute.xlu1 %4726 }
0x1dcc   :  { %6674 = vmatmul.mubr.msk.f32.vlgmr.msra.gmra.mxu1 %vm552_vm3, %v4727_v36 }
0x1dcd   :  { %v6928_v59 = vpop.eup %6927  ;;  %6683 = vmatprep.mubr.msk.f32.mxu1 %vm7308_vm2, %v7307_v22 }
0x1dce   :  { %v4480_v37 = vsel %vm552_vm3, %v6928_v59, 0.0 }
0x1dcf   :  { %4481 = vadd.xlane.f32.xlu0 %v4480_v37  ;;  %v5073_v39 = vpop.permute.xlu1 %5072 }
0x1dd3   :  { %v5238_v44 = vpop.permute.xlu1 %5237 }
0x1dd7   :  { %v5403_v47 = vpop.permute.xlu1 %5402 }
0x1de5   :  { %4563 = vrot.lane.b32.xlu0 %v8011_v51, %s7313_s21 }
0x1de9   :  { %4907 = vrot.lane.b32.xlu0 %v8009_v2, %s7314_s18 }
0x1ded   :  { %5070 = vrot.lane.b32.xlu0 %v8009_v2, %s7309_s19 }
0x1df1   :  { %5235 = vrot.lane.b32.xlu0 %v8009_v2, %s7310_s20 }
0x1df5   :  { %5400 = vrot.lane.b32.xlu0 %v8009_v2, %s7311_s13 }
0x1e58   :  { %v4482_v61 = vpop.xlane.xlu0 %4481 }
0x1e59   :  { %6929 = vrcp.f32 %v4482_v61 }
0x1e5c   :  { %v4564_v38 = vpop.permute.xlu0 %4563 }
0x1e60   :  { %v4908_v40 = vpop.permute.xlu0 %4907 }
0x1e61   :  { %6682 = vmatpush3.xpose.msk.msra.mxu1 %vm552_vm3, %v4908_v40 }
0x1e62   :  { %6691 = vmatprep.subr.mxu1 %v7307_v22 }
0x1e64   :  { %v5071_v41 = vpop.permute.xlu0 %5070  ;;  %6684 = vmatmul.mubr.msk.f32.vlgmr.msra.gmra.mxu1 %vm552_vm3, %v8009_v2 }
0x1e65   :  { %6692 = vmatpush3.xpose.msk.msra.mxu1 %vm552_vm3, %v5073_v39  ;;  %6693 = vmatprep.mubr.msk.f32.mxu1 %vm7308_vm2, %v7307_v22 }
0x1e66   :  { %v6930_v42 = vpop.eup %6929  ;;  %6701 = vmatprep.subr.mxu1 %v7307_v22 }
0x1e67   :  { %v4484_v45 = vmul.f32 %v6930_v42, %v6928_v59 }
0x1e68   :  { %6694 = vmatmul.mubr.msk.f32.vlgmr.msra.gmra.mxu1 %vm552_vm3, %v5071_v41  ;;  %v5236_v46 = vpop.permute.xlu0 %5235 }
0x1e69   :  { %6659 = vmatmul.mubr.msk.f32.vlgmr.msra.gmra.mxu0 %vm552_vm3, %v4484_v45  ;;  %6702 = vmatpush3.xpose.msk.msra.mxu1 %vm552_vm3, %v5238_v44 }
0x1e6a   :  { %6662 = vmatpush3.xpose.msk.msra.mxu0 %vm552_vm3, %v4564_v38  ;;  %6703 = vmatprep.mubr.msk.f32.mxu1 %vm7308_vm2, %v7307_v22 }
0x1e6b   :  { %6663 = vmatprep.mubr.msk.f32.mxu0 %vm7308_vm2, %v7307_v22  ;;  %6711 = vmatprep.subr.mxu1 %v7307_v22 }
0x1e6c   :  { %6704 = vmatmul.mubr.msk.f32.vlgmr.msra.gmra.mxu1 %vm552_vm3, %v5236_v46  ;;  %6666 = vmatprep.subr.mxu0 %v7307_v22  ;;  %v5401_v48 = vpop.permute.xlu0 %5400 }
0x1e6d   :  { %6664 = vmatmul.mubr.msk.f32.vlgmr.msra.gmra.mxu0 %vm552_vm3, %v4562_v34  ;;  %6712 = vmatpush3.xpose.msk.msra.mxu1 %vm552_vm3, %v5403_v47 }
0x1e6e   :  { %6713 = vmatprep.mubr.msk.f32.mxu1 %vm7308_vm2, %v7307_v22  ;;  %6668 = vmatprep.mubr.msk.f32.mxu0 %vm7308_vm2, %v7307_v22 }
0x1e70   :  { %6714 = vmatmul.mubr.msk.f32.vlgmr.msra.gmra.mxu1 %vm552_vm3, %v5401_v48 }
0x1e8c   :  { %v4800_v50 = vpop.f32.mrf.mxu1 }
0x1e8d   :  { %v4804_v52 = vsel %vm552_vm3, %v4800_v50, -inf }
0x1e8e   :  { %4805 = vmax.xlane.f32.xlu0 %v4804_v52  ;;  %v6675_v53 = vpop.f32.mrf.mxu1 }
0x1f17   :  { %v4806_v54 = vpop.xlane.xlu0 %4805 }
0x1f18   :  { %v4807_v55 = vsub.f32 %v4800_v50, %v4806_v54 }
0x1f1a   :  { %v4808_v56 = vmul.f32 1.442695, %v4807_v55 }
0x1f1c   :  { %6931 = vpow2.f32 %v4808_v56 }
0x1f24   :  { %v4979_v16 = vpop.f32.mrf.mxu1 }
0x1f25   :  { %v4983_v57 = vsel %vm552_vm3, %v4979_v16, -inf }
0x1f26   :  { %4984 = vmax.xlane.f32.xlu0 %v4983_v57  ;;  %v6685_v43 = vpop.f32.mrf.mxu1 }
0x1f28   :  { %v5144_v18 = vpop.f32.mrf.mxu1 }
0x1f29   :  { %v4557_v58 = vpop.f32.mrf.mxu0  ;;  %v5148_v60 = vsel %vm552_vm3, %v5144_v18, -inf  ;;  %v8103_v25 = vpop.eup %6931 }
0x1f2a   :  { %5149 = vmax.xlane.f32.xlu0 %v5148_v60  ;;  %v6695_v27 = vpop.f32.mrf.mxu1  ;;  %v4810_v10 = vsel %vm552_vm3, %v8103_v25, 0.0 }
0x1f2b   :  { %v6660_v62 = vpop.f32.mrf.mxu0 }
0x1f2c   :  { %v5309_v63 = vpop.f32.mrf.mxu1 }
0x1f2d   :  { %v4635_v49 = vpop.f32.mrf.mxu0  ;;  %v5313_v9 = vsel %vm552_vm3, %v5309_v63, -inf }
0x1f2e   :  { %v6705_v3 = vpop.f32.mrf.mxu1  ;;  %v4639_v4 = vsel %vm552_vm3, %v4635_v49, -inf }
0x1f2f   :  { %4640 = vmax.xlane.f32.xlu1 %v4639_v4  ;;  %v6665_v5 = vpop.f32.mrf.mxu0  ;;  %v6112_v4 = vld [vmem:[%s8259_s14 + $0x38] sm:$0xff] }
0x1f30   :  { %v5474_v6 = vpop.f32.mrf.mxu1  ;;  %v6111_v5 = vld [vmem:[%s8259_s14 + $0x30] sm:$0xff]  ;;  %6721 = vmatprep.subr.mxu1 %v6112_v4 }
0x1f31   :  { %v5478_v7 = vsel %vm552_vm3, %v5474_v6, -inf  ;;  %6722 = vmatpush3.msra.mxu1 %v6112_v4  ;;  %v6143_v4 = vld [vmem:[%s8261_s11 + $0x1] ss:$0 sm:$0xff] }
0x1f32   :  { %5479 = vmax.xlane.f32.xlu0 %v5478_v7  ;;  %v6715_v8 = vpop.f32.mrf.mxu1  ;;  %6723 = vmatprep.subr.mxu1 %v6111_v5 }
0x1f33   :  { %5314 = vmax.xlane.f32.xlu1 %v5313_v9  ;;  %6724 = vmatpush3.msra.mxu1 %v6111_v5  ;;  %v6109_v8 = vld [vmem:[%s8259_s14 + $0x20] sm:$0xff] }
0x1f36   :  { %4811 = vadd.xlane.f32.xlu0 %v4810_v10 }
0x1faf   :  { %v4985_v12 = vpop.xlane.xlu0 %4984 }
0x1fb0   :  { %v4986_v13 = vsub.f32 %v4979_v16, %v4985_v12 }
0x1fb2   :  { %v4987_v0 = vmul.f32 1.442695, %v4986_v13 }
0x1fb3   :  { %v5150_v14 = vpop.xlane.xlu0 %5149 }
0x1fb4   :  { %6933 = vpow2.f32 %v4987_v0  ;;  %v5151_v15 = vsub.f32 %v5144_v18, %v5150_v14 }
0x1fb6   :  { %v5152_v17 = vmul.f32 1.442695, %v5151_v15 }
0x1fb8   :  { %6935 = vpow2.f32 %v5152_v17  ;;  %v4641_v19 = vpop.xlane.xlu1 %4640 }
0x1fb9   :  { %v4642_v38 = vsub.f32 %v4635_v49, %v4641_v19 }
0x1fbb   :  { %v5480_v21 = vpop.xlane.xlu0 %5479  ;;  %v4643_v39 = vmul.f32 1.442695, %v4642_v38 }
0x1fbc   :  { %v5481_v23 = vsub.f32 %v5474_v6, %v5480_v21  ;;  %v5315_v24 = vpop.xlane.xlu1 %5314 }
0x1fbd   :  { %v5316_v26 = vsub.f32 %v5309_v63, %v5315_v24 }
0x1fbe   :  { %v5482_v1 = vmul.f32 1.442695, %v5481_v23 }
0x1fbf   :  { %v5317_v29 = vmul.f32 1.442695, %v5316_v26  ;;  %v4812_v45 = vpop.xlane.xlu0 %4811 }
0x1fc0   :  { %6937 = vpow2.f32 %v5482_v1 }
0x1fc1   :  { %v6934_v32 = vpop.eup %6933  ;;  %6939 = vpow2.f32 %v5317_v29 }
0x1fc2   :  { %v4989_v33 = vsel %vm552_vm3, %v6934_v32, 0.0  ;;  %6941 = vpow2.f32 %v4643_v39 }
0x1fc3   :  { %4990 = vadd.xlane.f32.xlu1 %v4989_v33 }
0x1fc5   :  { %v6936_v34 = vpop.eup %6935 }
0x1fc6   :  { %v5154_v35 = vsel %vm552_vm3, %v6936_v34, 0.0 }
0x1fc7   :  { %5155 = vadd.xlane.f32.xlu0 %v5154_v35 }
0x1fcd   :  { %v8110_v36 = vpop.eup %6937 }
0x1fce   :  { %v6940_v59 = vpop.eup %6939  ;;  %v5484_v37 = vsel %vm552_vm3, %v8110_v36, 0.0 }
0x1fcf   :  { %5485 = vadd.xlane.f32.xlu0 %v5484_v37  ;;  %v5319_v61 = vsel %vm552_vm3, %v6940_v59, 0.0  ;;  %v6942_v40 = vpop.eup %6941 }
0x1fd0   :  { %5320 = vadd.xlane.f32.xlu1 %v5319_v61  ;;  %v4645_v41 = vsel %vm552_vm3, %v6942_v40, 0.0 }
0x1fe1   :  { %4650 = vrot.lane.b32.xlu1 %v8011_v51, %s7319_s2 }
0x1fe5   :  { %4815 = vrot.lane.b32.xlu0 %v8011_v51, %s7320_s6 }
0x1fe9   :  { %5489 = vrot.lane.b32.xlu0 %v8009_v2, %s7320_s6 }
0x2005   :  { %4646 = vadd.xlane.f32.xlu1 %v4645_v41 }
0x2016   :  { %4994 = vrot.lane.b32.xlu1 %v8009_v2, %s7317_s24 }
0x201a   :  { %5159 = vrot.lane.b32.xlu1 %v8009_v2, %s7318_s1 }
0x201e   :  { %5324 = vrot.lane.b32.xlu1 %v8009_v2, %s7319_s2 }
0x2022   :  { %4892 = vrot.lane.b32.xlu1 %v4557_v58, %s7297_s7 }
0x204c   :  { %v4991_v51 = vpop.xlane.xlu1 %4990 }
0x2050   :  { %v5156_v47 = vpop.xlane.xlu0 %5155 }
0x2058   :  { %v5486_v48 = vpop.xlane.xlu0 %5485 }
0x2059   :  { %v5321_v42 = vpop.xlane.xlu1 %5320 }
0x205c   :  { %v4816_v53 = vpop.permute.xlu0 %4815 }
0x205d   :  { %v4651_v44 = vpop.permute.xlu1 %4650 }
0x205e   :  { %6667 = vmatpush3.msra.mxu0 %v4651_v44 }
0x205f   :  { %6676 = vmatprep.subr.mxu0 %v7307_v22 }
0x2060   :  { %v5490_v63 = vpop.permute.xlu0 %5489 }
0x208e   :  { %v4647_v46 = vpop.xlane.xlu1 %4646 }
0x208f   :  { %6943 = vrcp.f32 %v4647_v46 }
0x2090   :  { %6945 = vrcp.f32 %v4812_v45 }
0x2091   :  { %6947 = vrcp.f32 %v4991_v51 }
0x2092   :  { %6949 = vrcp.f32 %v5156_v47  ;;  %v4995_v54 = vpop.permute.xlu1 %4994 }
0x2093   :  { %6951 = vrcp.f32 %v5321_v42 }
0x2094   :  { %6953 = vrcp.f32 %v5486_v48 }
0x2096   :  { %v5160_v16 = vpop.permute.xlu1 %5159 }
0x209a   :  { %v5325_v60 = vpop.permute.xlu1 %5324 }
0x209c   :  { %v6944_v50 = vpop.eup %6943 }
0x209d   :  { %v4649_v52 = vmul.f32 %v6944_v50, %v6942_v40  ;;  %v6946_v2 = vpop.eup %6945 }
0x209e   :  { %v4814_v55 = vmul.f32 %v6946_v2, %v8103_v25  ;;  %v6948_v56 = vpop.eup %6947  ;;  %v6110_v25 = vld [vmem:[%s8259_s14 + $0x28] sm:$0xff]  ;;  %v4893_v21 = vpop.permute.xlu1 %4892 }
0x209f   :  { %6669 = vmatmul.mubr.msk.f32.vlgmr.msra.gmra.mxu0 %vm552_vm3, %v4649_v52  ;;  %v4993_v57 = vmul.f32 %v6948_v56, %v6934_v32  ;;  %v6950_v43 = vpop.eup %6949  ;;  %6725 = vmatprep.subr.mxu1 %v6110_v25  ;;  %v4903_v24 = vsel %vm552_vm3, %v8038_v20, %v4893_v21  ;;  %v6115_v20 = vld [vmem:[#allocation21 + $0x1] ss:$0 sm:$0xff] }
0x20a0   :  { %6677 = vmatpush3.msra.mxu0 %v4816_v53  ;;  %6678 = vmatprep.mubr.msk.f32.mxu0 %vm7308_vm2, %v7307_v22  ;;  %v5158_v18 = vmul.f32 %v6950_v43, %v6936_v34  ;;  %v6952_v58 = vpop.eup %6951  ;;  %v6125_v53 = vld [vmem:[%s8260_s10 + $0x78] sm:$0xff]  ;;  %v6122_v56 = vld [vmem:[%s8260_s10 + $0x60] sm:$0xff]  ;;  %v6119_v43 = vld [vmem:[%s8260_s10 + $0x48] sm:$0xff] }
0x20a1   :  { %6686 = vmatprep.subr.mxu0 %v7307_v22  ;;  %v5323_v27 = vmul.f32 %v6952_v58, %v6940_v59  ;;  %v6954_v62 = vpop.eup %6953  ;;  %6726 = vmatpush3.msra.mxu1 %v6110_v25  ;;  %v6135_v21 = vld [vmem:[%s7469_s27 + $0xc0] sm:$0xff] }
0x20a2   :  { %v5488_v49 = vmul.f32 %v6954_v62, %v8110_v36  ;;  %6727 = vmatprep.subr.mxu1 %v6109_v8 }
0x20a3   :  { %6679 = vmatmul.mubr.msk.f32.vlgmr.msra.gmra.mxu0 %vm552_vm3, %v4814_v55  ;;  %6728 = vmatpush3.msra.mxu1 %v6109_v8  ;;  %v6123_v55 = vld [vmem:[%s8260_s10 + $0x68] sm:$0xff] }
0x20a4   :  { %6687 = vmatpush3.msra.mxu0 %v4995_v54  ;;  %6688 = vmatprep.mubr.msk.f32.mxu0 %vm7308_vm2, %v7307_v22  ;;  %v6124_v54 = vld [vmem:[%s8260_s10 + $0x70] sm:$0xff] }
0x20a5   :  { %6696 = vmatprep.subr.mxu0 %v7307_v22 }
0x20a7   :  { %6689 = vmatmul.mubr.msk.f32.vlgmr.msra.gmra.mxu0 %vm552_vm3, %v4993_v57  ;;  %v6120_v57 = vld [vmem:[%s8260_s10 + $0x50] sm:$0xff] }
0x20a8   :  { %6697 = vmatpush3.msra.mxu0 %v5160_v16  ;;  %6698 = vmatprep.mubr.msk.f32.mxu0 %vm7308_vm2, %v7307_v22  ;;  %v6121_v16 = vld [vmem:[%s8260_s10 + $0x58] sm:$0xff] }
0x20a9   :  { %6706 = vmatprep.subr.mxu0 %v7307_v22 }
0x20ab   :  { %6699 = vmatmul.mubr.msk.f32.vlgmr.msra.gmra.mxu0 %vm552_vm3, %v5158_v18  ;;  %v6118_v18 = vld [vmem:[%s8260_s10 + $0x40] sm:$0xff] }
0x20ac   :  { %6707 = vmatpush3.msra.mxu0 %v5325_v60  ;;  %6708 = vmatprep.mubr.msk.f32.mxu0 %vm7308_vm2, %v7307_v22 }
0x20ad   :  { %6716 = vmatprep.subr.mxu0 %v7307_v22 }
0x20af   :  { %6709 = vmatmul.mubr.msk.f32.vlgmr.msra.gmra.mxu0 %vm552_vm3, %v5323_v27 }
0x20b0   :  { %6717 = vmatpush3.msra.mxu0 %v5490_v63  ;;  %6718 = vmatprep.mubr.msk.f32.mxu0 %vm7308_vm2, %v7307_v22 }
0x20b1   :  { %5795 = vmatprep.subr.mxu0 %v6125_v53 }
0x20b3   :  { %6719 = vmatmul.mubr.msk.f32.vlgmr.msra.gmra.mxu0 %vm552_vm3, %v5488_v49 }
0x20b4   :  { %5835 = vmatprep.mubr.f32.mxu0 %v7307_v22  ;;  %5796 = vmatpush1.msra.mxu0 %v6124_v54 }
0x20b5   :  { %5797 = vmatprep.subr.mxu0 %v6123_v55 }
0x20b6   :  { %5798 = vmatpush1.msra.mxu0 %v6122_v56 }
0x20b7   :  { %5799 = vmatprep.subr.mxu0 %v6121_v16 }
0x20b8   :  { %5800 = vmatpush1.msra.mxu0 %v6120_v57 }
0x20b9   :  { %5801 = vmatprep.subr.mxu0 %v6119_v43 }
0x20ba   :  { %5802 = vmatpush1.msra.mxu0 %v6118_v18 }
0x215f   :  { %v4722_v3 = vpop.f32.mrf.mxu0 }
0x2160   :  { %4896 = vrot.lane.b32.xlu0 %v4722_v3, %s7304_s30 }
0x2161   :  { %v6670_v6 = vpop.f32.mrf.mxu0 }
0x2162   :  { %v6144_v6 = vld [vmem:[%s8262_s15 + $0x1] ss:$0 sm:$0xff] }
0x2163   :  { %v4887_v7 = vpop.f32.mrf.mxu0 }
0x2164   :  { %4900 = vrot.lane.b32.xlu0 %v4887_v7, %s7316_s23 }
0x2165   :  { %v6680_v9 = vpop.f32.mrf.mxu0 }
0x2167   :  { %v5066_v10 = vpop.f32.mrf.mxu0 }
0x2169   :  { %v6690_v12 = vpop.f32.mrf.mxu0 }
0x216b   :  { %v5231_v13 = vpop.f32.mrf.mxu0 }
0x216c   :  { %5566 = vrot.lane.b32.xlu1 %v5231_v13, %s7297_s7  ;;  %v6142_v13 = vld [vmem:[%s7469_s27 + $0xf8] sm:$0xff] }
0x216d   :  { %v6700_v0 = vpop.f32.mrf.mxu0  ;;  %6732 = vmatprep.subr.mxu1 %v6142_v13 }
0x216e   :  { %v6141_v0 = vld [vmem:[%s7469_s27 + $0xf0] sm:$0xff] }
0x216f   :  { %v5396_v14 = vpop.f32.mrf.mxu0 }
0x2170   :  { %5570 = vrot.lane.b32.xlu1 %v5396_v14, %s7304_s30  ;;  %v6140_v14 = vld [vmem:[%s7469_s27 + $0xe8] sm:$0xff] }
0x2171   :  { %v6710_v15 = vpop.f32.mrf.mxu0 }
0x2172   :  { %v6139_v15 = vld [vmem:[%s7469_s27 + $0xe0] sm:$0xff] }
0x2173   :  { %v5561_v17 = vpop.f32.mrf.mxu0 }
0x2174   :  { %5574 = vrot.lane.b32.xlu0 %v5561_v17, %s7316_s23  ;;  %v6137_v17 = vld [vmem:[%s7469_s27 + $0xd0] sm:$0xff] }
0x2175   :  { %v6720_v19 = vpop.f32.mrf.mxu0 }
0x2176   :  { %v6136_v19 = vld [vmem:[%s7469_s27 + $0xc8] sm:$0xff] }
0x21d2   :  { %v4897_v23 = vpop.permute.xlu0 %4896 }
0x21d3   :  { %v4904_v26 = vsel %vm1224_vm4, %v4903_v24, %v4897_v23  ;;  %v6134_v23 = vld [vmem:[%s7469_s27 + $0xb8] sm:$0xff]  ;;  %v6133_v24 = vld [vmem:[%s7469_s27 + $0xb0] sm:$0xff] }
0x21d6   :  { %v4901_v1 = vpop.permute.xlu0 %4900 }
0x21d7   :  { %v4905_v29 = vsel %vm1226_vm5, %v4904_v26, %v4901_v1  ;;  %v6132_v26 = vld [vmem:[%s7469_s27 + $0xa8] sm:$0xff]  ;;  %v6131_v1 = vld [vmem:[%s7469_s27 + $0xa0] sm:$0xff] }
0x21d8   :  { %6729 = vmatprep.mubr.msk.f32.mxu1 %vm297_vm0, %v4905_v29  ;;  %v6130_v29 = vld [vmem:[%s7469_s27 + $0x98] sm:$0xff] }
0x21de   :  { %v5567_v32 = vpop.permute.xlu1 %5566 }
0x21df   :  { %v5577_v34 = vsel %vm552_vm3, %v5066_v10, %v5567_v32  ;;  %v6129_v32 = vld [vmem:[%s7469_s27 + $0x90] sm:$0xff] }
0x21e2   :  { %v5571_v33 = vpop.permute.xlu1 %5570 }
0x21e3   :  { %v5578_v35 = vsel %vm1224_vm4, %v5577_v34, %v5571_v33  ;;  %v6128_v33 = vld [vmem:[%s7469_s27 + $0x88] sm:$0xff]  ;;  %v6127_v34 = vld [vmem:[%s7469_s27 + $0x80] sm:$0xff] }
0x21e6   :  { %v5575_v36 = vpop.permute.xlu0 %5574 }
0x21e7   :  { %v5579_v59 = vsel %vm1226_vm5, %v5578_v35, %v5575_v36  ;;  %v6126_v35 = vld [vmem:[%s7464_s29 + $0x2] sm:$0x3] }
0x21e8   :  { %6730 = vmatmul.mubr.msk.f32.vlgmr.msra.gmra.mxu1 %vm297_vm0, %v5579_v59  ;;  %v5762_v36 = vrot.slane %v6126_v35, %v7734_v11  ;;  %v5758_v11 = vrot.slane %v6126_v35, %v7737_v31 }
0x21e9   :  { %6733 = vmatpush3.msra.mxu1 %v6142_v13 }
0x21ea   :  { %6734 = vmatprep.subr.mxu1 %v6141_v0 }
0x21eb   :  { %6735 = vmatpush3.msra.mxu1 %v6141_v0 }
0x21ec   :  { %6736 = vmatprep.subr.mxu1 %v6140_v14 }
0x21ed   :  { %6737 = vmatpush3.msra.mxu1 %v6140_v14 }
0x21ee   :  { %6738 = vmatprep.subr.mxu1 %v6139_v15 }
0x21ef   :  { %6739 = vmatpush3.msra.mxu1 %v6139_v15 }
0x22a8   :  { %v6731_v37 = vpop.f32.mrf.mxu1 }
0x22a9   :  { %v5667_v61 = vadd.f32 %v6731_v37, %v7984_v28 }
0x22aa   :  { %v5657_v38 = vpop.f32.mrf.mxu1 }
0x22ab   :  { %v8172_v39 = vadd.f32 %v6115_v20, %v5667_v61  ;;  %v5666_v40 = vadd.f32 %v5657_v38, %v7987_v30 }
0x22ad   :  { %v8175_v41 = vadd.f32 %v6115_v20, %v5666_v40  ;;  %v5715_v51 = vsel %vm297_vm0, %v8172_v39, 0.0 }
0x22ae   :  { %5716 = vadd.xlane.f32.xlu0 %v5715_v51 }
0x22af   :  { %v5712_v42 = vsel %vm297_vm0, %v8175_v41, 0.0 }
0x22b0   :  { %5713 = vadd.xlane.f32.xlu1 %v5712_v42 }
0x2337   :  { %v5717_v44 = vpop.xlane.xlu0 %5716 }
0x2338   :  { %v5719_v28 = vmul.f32 0.03125, %v5717_v44 }
0x2339   :  { %v5714_v45 = vpop.xlane.xlu1 %5713 }
0x233a   :  { %v5718_v46 = vmul.f32 0.03125, %v5714_v45  ;;  %v5721_v30 = vsub.f32 %v8172_v39, %v5719_v28 }
0x233c   :  { %v5720_v47 = vsub.f32 %v8175_v41, %v5718_v46  ;;  %v5723_v52 = vmul.f32 %v5721_v30, %v5721_v30 }
0x233e   :  { %v5722_v48 = vmul.f32 %v5720_v47, %v5720_v47  ;;  %v5727_v2 = vsel %vm297_vm0, %v5723_v52, 0.0 }
0x2340   :  { %v5724_v50 = vsel %vm297_vm0, %v5722_v48, 0.0 }
0x2341   :  { %5725 = vadd.xlane.f32.xlu0 %v5724_v50 }
0x2345   :  { %5728 = vadd.xlane.f32.xlu0 %v5727_v2 }
0x23ca   :  { %v5726_v58 = vpop.xlane.xlu0 %5725 }
0x23cb   :  { %v5730_v60 = vmul.f32 0.03125, %v5726_v58 }
0x23cd   :  { %v5732_v27 = vadd.f32 1e-05, %v5730_v60 }
0x23ce   :  { %v5729_v62 = vpop.xlane.xlu0 %5728 }
0x23cf   :  { %6955 = vrsqrt.f32 %v5732_v27  ;;  %v5731_v63 = vmul.f32 0.03125, %v5729_v62  ;;  %v6147_v27 = vld [vmem:[#allocation22 + $0x1] ss:$0 sm:$0xff] }
0x23d1   :  { %v5733_v49 = vadd.f32 1e-05, %v5731_v63 }
0x23d3   :  { %6957 = vrsqrt.f32 %v5733_v49 }
0x23dc   :  { %v6956_v3 = vpop.eup %6955 }
0x23dd   :  { %v5736_v5 = vmul.f32 %v6956_v3, %v5720_v47 }
0x23df   :  { %v5744_v7 = vmul.f32 %v6143_v4, %v5736_v5 }
0x23e0   :  { %v6958_v25 = vpop.eup %6957 }
0x23e1   :  { %v5752_v8 = vadd.f32 %v6144_v6, %v5744_v7  ;;  %v5737_v9 = vmul.f32 %v6958_v25, %v5721_v30 }
0x23e3   :  { %6145 = vmatmul.mubr.msk.f32.vlgmr.msra.gmra.mxu0 %vm297_vm0, %v5752_v8  ;;  %v5745_v10 = vmul.f32 %v6143_v4, %v5737_v9 }
0x23e4   :  { %5841 = vmatprep.mubr.f32.mxu0 %v7307_v22  ;;  %v6138_v22 = vld [vmem:[%s7469_s27 + $0xd8] sm:$0xff] }
0x23e5   :  { %v5753_v12 = vadd.f32 %v6144_v6, %v5745_v10  ;;  %6740 = vmatprep.subr.mxu1 %v6138_v22 }
0x23e6   :  { %6741 = vmatpush3.msra.mxu1 %v6138_v22 }
0x23e7   :  { %6146 = vmatmul.mubr.msk.f32.gmra.mxu0 %vm297_vm0, %v5753_v12  ;;  %6742 = vmatprep.subr.mxu1 %v6137_v17 }
0x23e8   :  { %6743 = vmatpush3.msra.mxu1 %v6137_v17 }
0x23e9   :  { %6744 = vmatprep.subr.mxu1 %v6136_v19 }
0x23ea   :  { %6745 = vmatpush3.msra.mxu1 %v6136_v19 }
0x23eb   :  { %6746 = vmatprep.subr.mxu1 %v6135_v21 }
0x23ec   :  { %6747 = vmatpush3.msra.mxu1 %v6135_v21 }
0x23ed   :  { %6748 = vmatprep.subr.mxu1 %v6134_v23 }
0x23ee   :  { %6749 = vmatpush3.msra.mxu1 %v6134_v23 }
0x23ef   :  { %6750 = vmatprep.subr.mxu1 %v6133_v24 }
0x23f0   :  { %6751 = vmatpush3.msra.mxu1 %v6133_v24 }
0x23f1   :  { %6752 = vmatprep.subr.mxu1 %v6132_v26 }
0x23f2   :  { %6753 = vmatpush3.msra.mxu1 %v6132_v26 }
0x23f3   :  { %6754 = vmatprep.subr.mxu1 %v6131_v1 }
0x23f4   :  { %6755 = vmatpush3.msra.mxu1 %v6131_v1 }
0x23f5   :  { %6756 = vmatprep.subr.mxu1 %v6130_v29 }
0x23f6   :  { %6757 = vmatpush3.msra.mxu1 %v6130_v29 }
0x23f7   :  { %6758 = vmatprep.subr.mxu1 %v6129_v32 }
0x23f8   :  { %6759 = vmatpush3.msra.mxu1 %v6129_v32 }
0x23f9   :  { %6760 = vmatprep.subr.mxu1 %v6128_v33 }
0x23fa   :  { %6761 = vmatpush3.msra.mxu1 %v6128_v33 }
0x23fb   :  { %6762 = vmatprep.subr.mxu1 %v6127_v34 }
0x23fc   :  { %6763 = vmatpush3.msra.mxu1 %v6127_v34 }
0x24a3   :  { %v5837_v59 = vpop.f32.mrf.mxu0 }
0x24a4   :  { %v5838_v54 = vadd.f32 %v5837_v59, %v5758_v11 }
0x24a5   :  { %v5839_v37 = vpop.f32.mrf.mxu0 }
0x24a6   :  { %v5840_v20 = vadd.f32 %v5839_v37, %v5762_v36 }
0x24a7   :  { %v5843_v61 = vpop.f32.mrf.mxu0 }
0x24a8   :  { %v5850_v38 = vmul.f32 0.044715, %v5840_v20  ;;  %v5848_v2 = vmul.f32 0.5, %v5840_v20  ;;  %v5844_v18 = vadd.f32 %v5843_v61, %v5758_v11 }
0x24a9   :  { %v5845_v40 = vpop.f32.mrf.mxu0 }
0x24aa   :  { %v5852_v51 = vmul.f32 %v5850_v38, %v5840_v20  ;;  %v5846_v42 = vadd.f32 %v5845_v40, %v5762_v36 }
0x24ac   :  { %v5854_v44 = vmul.f32 %v5852_v51, %v5840_v20  ;;  %v5851_v28 = vmul.f32 0.044715, %v5846_v42  ;;  %v5849_v57 = vmul.f32 0.5, %v5846_v42 }
0x24ae   :  { %v5853_v45 = vmul.f32 %v5851_v28, %v5846_v42  ;;  %v5856_v46 = vadd.f32 %v5854_v44, %v5840_v20 }
0x24b0   :  { %v5855_v30 = vmul.f32 %v5853_v45, %v5846_v42  ;;  %v5858_v47 = vmul.f32 0.7978846, %v5856_v46 }
0x24b2   :  { %v5857_v48 = vadd.f32 %v5855_v30, %v5846_v42  ;;  %6959 = vtanh.f32 %v5858_v47 }
0x24b4   :  { %v5859_v50 = vmul.f32 0.7978846, %v5857_v48 }
0x24b6   :  { %6961 = vtanh.f32 %v5859_v50 }
0x24bf   :  { %v6960_v52 = vpop.eup %6959 }
0x24c0   :  { %v5862_v53 = vadd.f32 1.0, %v6960_v52 }
0x24c2   :  { %v5864_v55 = vmul.f32 %v5862_v53, %v5848_v2 }
0x24c3   :  { %v6962_v56 = vpop.eup %6961 }
0x24c4   :  { %v5866_v16 = vmul.f32 %v5864_v55, %v5838_v54  ;;  %v5863_v43 = vadd.f32 1.0, %v6962_v56 }
0x24c6   :  { %6764 = vmatprep.mubr.f32.mxu1 %v5866_v16  ;;  %v5865_v58 = vmul.f32 %v5863_v43, %v5849_v57 }
0x24c8   :  { %v5867_v60 = vmul.f32 %v5865_v58, %v5844_v18 }
0x24ca   :  { %6765 = vmatmul.mubr.f32.vlgmr.msra.gmra.mxu1 %v5867_v60 }
0x258a   :  { %v6766_v62 = vpop.f32.mrf.mxu1 }
0x258b   :  { %v5946_v63 = vadd.f32 %v6766_v62, %v6147_v27 }
0x258c   :  { %v5940_v31 = vpop.f32.mrf.mxu1 }
0x258d   :  { %v5950_v49 = vadd.f32 %v5946_v63, %v8172_v39  ;;  %v5941_v3 = vadd.f32 %v6147_v27, %v5940_v31 }
0x258f   :  { %5952 = vst.msk [vmem:[%s7479_s12 + $0x8] sm:$0xff] %vm297_vm0, %v5950_v49  ;;  %v5949_v4 = vadd.f32 %v5941_v3, %v8175_v41 }
0x2591   :  { %5951 = vst.msk [vmem:[%s7479_s12] sm:$0xff] %vm297_vm0, %v5949_v4 }
0x2592   :  { %5957 = vsyncpa [#allocation3], 1 }
0x2593   :  { %5958 = vsyncpa [#allocation5], 1 }
0x2594   :  { %5959 = vsyncpa [#allocation8], 1 }
0x2595   :  { %5960 = vsyncpa [#allocation11], 1 }
0x2596   :  { %5961 = vsyncpa [#allocation14], 1 }
0x2597   :  { %5962 = vsyncpa [#allocation17], 1 }
0x2598   :  { %5963 = vsyncpa [#allocation20], 1 }
0x2599   :  { %5964 = vsyncpa [#allocation23], 1 }

</bundles_post_ra>
